<compile_context>
chip_gen: v7x
topology: tpu7x:2x2x1
jax: 0.10.0
libtpu: 0.0.40
codegen_flags: <defaults>
</compile_context>

<pallas_src>
import functools

import jax
import jax.numpy as jnp
from jax.experimental import pallas as pl
from jax.experimental.pallas import tpu as pltpu

EPS = 1e-5
LANE = 128                       # channel padding granularity (lane-dense)
TM_DEFAULT = 256                 # row tile; v5e/v7x ~256, v6e could use 512-1024
VMEM_LIMIT = 48 * 1024 * 1024    # explicit scoped-VMEM budget (safe on v5e/v6e/v7x)


def _round_up(x, m):
    return (x + m - 1) // m * m


def _row_tile(m):
    return min(TM_DEFAULT, _round_up(m, 8))


def _pad_rows(a):
    m = a.shape[0]
    mp = _round_up(m, _row_tile(m))
    if mp != m:
        a = jnp.pad(a, ((0, mp - m), (0, 0)))
    return a


# ------------- tiled matmul (+ optional fused input BN/ReLU) + BN stats ------------- #
def _mm_stats_kernel(x_ref, w_ref, *rest, fuse, relu, valid_rows, tm):
    if fuse:
        sc_ref, sh_ref, y_ref, sum_ref, sq_ref = rest
    else:
        y_ref, sum_ref, sq_ref = rest

    x = x_ref[...]
    if fuse:
        # fused BN(scale,shift) + ReLU of the PREVIOUS conv, applied to the
        # loaded tile -- saves one full activation HBM round-trip.
        xf = x.astype(jnp.float32) * sc_ref[...] + sh_ref[...]
        if relu:
            xf = jnp.maximum(xf, 0.0)
        if valid_rows is not None:
            # zero padded rows so they cannot bias this conv's BN statistics
            row = (jax.lax.broadcasted_iota(jnp.int32, xf.shape, 0)
                   + pl.program_id(0) * tm)
            xf = jnp.where(row < valid_rows, xf, 0.0)
        x = xf.astype(jnp.bfloat16)

    y = jnp.dot(x, w_ref[...], preferred_element_type=jnp.float32)  # MXU, f32 acc
    y_ref[...] = y.astype(y_ref.dtype)                              # bf16 writeback
    s = jnp.sum(y, axis=0, keepdims=True)                           # f32 stats
    q = jnp.sum(y * y, axis=0, keepdims=True)
    sum_ref[...] = s[None]
    sq_ref[...] = q[None]


def matmul_stats(x, w, *, scale=None, shift=None, relu=False, valid_rows=None,
                 out_dtype=jnp.bfloat16):
    """x:(Mp,Kp) bf16, w:(Kp,Cp) bf16 (VMEM-resident) -> y bf16 + per-channel stats."""
    mp, kp = x.shape
    cp = w.shape[1]
    tm = min(TM_DEFAULT, mp)
    assert mp % tm == 0 and cp % LANE == 0 and kp % LANE == 0
    mt = mp // tm
    fuse = scale is not None
    vr = valid_rows if (valid_rows is not None and valid_rows < mp) else None
    kernel = functools.partial(_mm_stats_kernel, fuse=fuse, relu=relu,
                               valid_rows=vr, tm=tm)

    in_specs = [pl.BlockSpec((tm, kp), lambda m: (m, 0)),
                pl.BlockSpec((kp, cp), lambda m: (0, 0))]   # weight: constant -> resident
    args = [x, w]
    if fuse:
        in_specs += [pl.BlockSpec((1, kp), lambda m: (0, 0)),
                     pl.BlockSpec((1, kp), lambda m: (0, 0))]
        args += [scale, shift]

    y, s, q = pl.pallas_call(
        kernel,
        out_shape=(jax.ShapeDtypeStruct((mp, cp), out_dtype),
                   jax.ShapeDtypeStruct((mt, 1, cp), jnp.float32),
                   jax.ShapeDtypeStruct((mt, 1, cp), jnp.float32)),
        grid=(mt,),
        in_specs=in_specs,
        out_specs=(pl.BlockSpec((tm, cp), lambda m: (m, 0)),
                   pl.BlockSpec((1, 1, cp), lambda m: (m, 0, 0)),
                   pl.BlockSpec((1, 1, cp), lambda m: (m, 0, 0))),
        compiler_params=pltpu.CompilerParams(
            dimension_semantics=("parallel",),
            vmem_limit_bytes=VMEM_LIMIT),
    )(*args)
    return y, s[:, 0, :].sum(axis=0), q[:, 0, :].sum(axis=0)


# ----------------------- fused per-channel scale/shift (+ReLU) ---------------------- #
def _bn_apply_kernel(y_ref, s_ref, b_ref, o_ref, *, relu):
    out = y_ref[...].astype(jnp.float32) * s_ref[...] + b_ref[...]
    if relu:
        out = jnp.maximum(out, 0.0)
    o_ref[...] = out.astype(o_ref.dtype)


def bn_apply(y, scale, shift, *, relu, out_dtype=jnp.bfloat16):
    mp, cp = y.shape
    tm = min(TM_DEFAULT, mp)
    assert mp % tm == 0 and cp % LANE == 0
    mt = mp // tm
    return pl.pallas_call(
        functools.partial(_bn_apply_kernel, relu=relu),
        out_shape=jax.ShapeDtypeStruct((mp, cp), out_dtype),
        grid=(mt,),
        in_specs=[pl.BlockSpec((tm, cp), lambda m: (m, 0)),
                  pl.BlockSpec((1, cp), lambda m: (0, 0)),
                  pl.BlockSpec((1, cp), lambda m: (0, 0))],
        out_specs=pl.BlockSpec((tm, cp), lambda m: (m, 0)),
        compiler_params=pltpu.CompilerParams(
            dimension_semantics=("parallel",),
            vmem_limit_bytes=VMEM_LIMIT),
    )(y, scale, shift)


# ------------- fused epilogue: BN(main) + BN(identity) + residual + ReLU ------------- #
def _bn_add_relu_kernel(y_ref, s_ref, b_ref, id_ref, si_ref, bi_ref, o_ref):
    main = y_ref[...].astype(jnp.float32) * s_ref[...] + b_ref[...]
    iden = id_ref[...].astype(jnp.float32) * si_ref[...] + bi_ref[...]
    o_ref[...] = jnp.maximum(main + iden, 0.0).astype(o_ref.dtype)


def bn_add_relu(y, scale, shift, iden, iscale, ishift):
    mp, cp = y.shape
    tm = min(TM_DEFAULT, mp)
    assert mp % tm == 0 and cp % LANE == 0 and iden.shape == (mp, cp)
    mt = mp // tm
    return pl.pallas_call(
        _bn_add_relu_kernel,
        out_shape=jax.ShapeDtypeStruct((mp, cp), jnp.float32),
        grid=(mt,),
        in_specs=[pl.BlockSpec((tm, cp), lambda m: (m, 0)),
                  pl.BlockSpec((1, cp), lambda m: (0, 0)),
                  pl.BlockSpec((1, cp), lambda m: (0, 0)),
                  pl.BlockSpec((tm, cp), lambda m: (m, 0)),
                  pl.BlockSpec((1, cp), lambda m: (0, 0)),
                  pl.BlockSpec((1, cp), lambda m: (0, 0))],
        out_specs=pl.BlockSpec((tm, cp), lambda m: (m, 0)),
        compiler_params=pltpu.CompilerParams(
            dimension_semantics=("parallel",),
            vmem_limit_bytes=VMEM_LIMIT),
    )(y, scale, shift, iden, iscale, ishift)


def _bn_scale_shift(sums, sqs, count, gamma, beta):
    mean = sums / count
    var = jnp.maximum(sqs / count - mean * mean, 0.0)
    scale = gamma * jax.lax.rsqrt(var + EPS)
    shift = beta - mean * scale
    return scale.reshape(1, -1), shift.reshape(1, -1)


# -------------------------------------- module -------------------------------------- #
class BottleneckPallas:
    def __init__(self, in_ch, out_ch, stride, dilation=1, downsample=False, *, key):
        mid = out_ch // 4
        self.in_ch, self.out_ch, self.mid = in_ch, out_ch, mid
        self.stride, self.dilation, self.has_down = stride, dilation, downsample
        self.cin_p = _round_up(in_ch, LANE)
        self.cmid_p = _round_up(mid, LANE)
        self.cout_p = _round_up(out_ch, LANE)

        ks = jax.random.split(key, 4)

        def he(k, shape):  # OIHW He init, rounded to bf16-representable values
            fan_in = shape[1] * shape[2] * shape[3]
            w = jax.random.normal(k, shape, jnp.float32) * jnp.sqrt(2.0 / fan_in)
            return w.astype(jnp.bfloat16).astype(jnp.float32)

        self.w1 = he(ks[0], (mid, in_ch, 1, 1))
        self.w2 = he(ks[1], (mid, mid, 3, 3))
        self.w3 = he(ks[2], (out_ch, mid, 1, 1))
        self.wd = he(ks[3], (out_ch, in_ch, 1, 1)) if downsample else None

        def bn_params(c, seed):
            idx = jnp.arange(c, dtype=jnp.float32)
            return (1.0 + 0.05 * jnp.cos(idx + seed)).reshape(1, c), \
                   (0.05 * jnp.sin(idx + seed)).reshape(1, c)

        self.g1, self.b1 = bn_params(mid, 0.0)
        self.g2, self.b2 = bn_params(mid, 1.0)
        self.g3, self.b3 = bn_params(out_ch, 2.0)
        if downsample:
            self.gd, self.bd = bn_params(out_ch, 3.0)

        def pad_mat(w2d, rows, cols):
            return jnp.pad(w2d, ((0, rows - w2d.shape[0]),
                                 (0, cols - w2d.shape[1]))).astype(jnp.bfloat16)

        def pad_vec(v, n):
            return jnp.pad(v.reshape(-1), (0, n - v.size))

        # lane-dense bf16 matmul weights (zero-padded channels stay exactly zero)
        self.w1m = pad_mat(self.w1[:, :, 0, 0].T, self.cin_p, self.cmid_p)
        w2t = jnp.transpose(self.w2, (2, 3, 1, 0)).reshape(9, mid, mid)  # (tap,Cin,Cout)
        w2t = jnp.pad(w2t, ((0, 0), (0, self.cmid_p - mid), (0, self.cmid_p - mid)))
        self.w2m = w2t.reshape(9 * self.cmid_p, self.cmid_p).astype(jnp.bfloat16)
        self.w3m = pad_mat(self.w3[:, :, 0, 0].T, self.cmid_p, self.cout_p)
        self.wdm = (pad_mat(self.wd[:, :, 0, 0].T, self.cin_p, self.cout_p)
                    if downsample else None)

        # zero-padded affine params -> padded channels never bias the statistics
        self.g1p, self.b1p = pad_vec(self.g1, self.cmid_p), pad_vec(self.b1, self.cmid_p)
        self.g2p, self.b2p = pad_vec(self.g2, self.cmid_p), pad_vec(self.b2, self.cmid_p)
        self.g3p, self.b3p = pad_vec(self.g3, self.cout_p), pad_vec(self.b3, self.cout_p)
        if downsample:
            self.gdp, self.bdp = pad_vec(self.gd, self.cout_p), pad_vec(self.bd, self.cout_p)

    def __call__(self, x_nchw):
        x = jnp.transpose(x_nchw, (0, 2, 3, 1)).astype(jnp.float32)
        N, H, W, Cin = x.shape
        s, d = self.stride, self.dilation
        Ho, Wo = (H - 1) // s + 1, (W - 1) // s + 1
        M1, Mo = N * H * W, N * Ho * Wo

        xp = jnp.pad(x, ((0, 0), (0, 0), (0, 0),
                         (0, self.cin_p - Cin))).astype(jnp.bfloat16)
        x2d = xp.reshape(M1, self.cin_p)

        # ---- conv1 (1x1) + exact BN stats ----
        y1, s1, q1 = matmul_stats(_pad_rows(x2d), self.w1m)
        sc1, sh1 = _bn_scale_shift(s1, q1, float(M1), self.g1p, self.b1p)
        # BN1+ReLU applied explicitly (its zero spatial padding for conv2 must
        # happen AFTER the affine, so it cannot be fused into conv2's input).
        h1 = bn_apply(y1, sc1, sh1, relu=True)[:M1].reshape(N, H, W, self.cmid_p)

        # ---- conv2 (3x3, stride s, dilation d, pad d) as one strided-im2col GEMM ----
        h1p = jnp.pad(h1, ((0, 0), (d, d), (d, d), (0, 0)))
        taps = [h1p[:, ki * d: ki * d + (Ho - 1) * s + 1: s,
                    kj * d: kj * d + (Wo - 1) * s + 1: s, :]
                for ki in range(3) for kj in range(3)]          # only real output rows
        x_col = jnp.concatenate(taps, axis=-1).reshape(Mo, 9 * self.cmid_p)
        y2, s2, q2 = matmul_stats(_pad_rows(x_col), self.w2m)
        sc2, sh2 = _bn_scale_shift(s2, q2, float(Mo), self.g2p, self.b2p)

        # ---- conv3 (1x1) with BN2+ReLU fused into its input path ----
        y3, s3, q3 = matmul_stats(y2, self.w3m, scale=sc2, shift=sh2,
                                  relu=True, valid_rows=Mo)
        sc3, sh3 = _bn_scale_shift(s3, q3, float(Mo), self.g3p, self.b3p)

        # ---- identity path ----
        if self.has_down:
            xs = xp[:, 0:(Ho - 1) * s + 1:s, 0:(Wo - 1) * s + 1:s, :].reshape(
                Mo, self.cin_p)
            yd, sd_, qd_ = matmul_stats(_pad_rows(xs), self.wdm)
            isc, ish = _bn_scale_shift(sd_, qd_, float(Mo), self.gdp, self.bdp)
            iden = yd
        else:
            iden = _pad_rows(x2d)      # stride==1 and in_ch==out_ch (ResNet identity)
            isc = jnp.ones((1, self.cout_p), jnp.float32)
            ish = jnp.zeros((1, self.cout_p), jnp.float32)

        # fused epilogue: BN3(main) + BN(identity) + residual add + ReLU
        out = bn_add_relu(y3, sc3, sh3, iden, isc, ish)[:Mo, :self.out_ch]
        return jnp.transpose(out.reshape(N, Ho, Wo, self.out_ch), (0, 3, 1, 2))


# ------------------------------- pure-JAX reference --------------------------------- #
def _ref_conv(x, w, stride, padding, dilation):
    return jax.lax.conv_general_dilated(
        x, w, (stride, stride), ((padding, padding), (padding, padding)),
        rhs_dilation=(dilation, dilation),
        dimension_numbers=("NCHW", "OIHW", "NCHW"))


def _ref_bn(x, g, b):
    mean = jnp.mean(x, axis=(0, 2, 3), keepdims=True)
    var = jnp.mean(jnp.square(x - mean), axis=(0, 2, 3), keepdims=True)
    return ((x - mean) * jax.lax.rsqrt(var + EPS) * g.reshape(1, -1, 1, 1)
            + b.reshape(1, -1, 1, 1))


def bottleneck_ref(m, x):
    h = jnp.maximum(_ref_bn(_ref_conv(x, m.w1, 1, 0, 1), m.g1, m.b1), 0.0)
    h = jnp.maximum(
        _ref_bn(_ref_conv(h, m.w2, m.stride, m.dilation, m.dilation), m.g2, m.b2), 0.0)
    h = _ref_bn(_ref_conv(h, m.w3, 1, 0, 1), m.g3, m.b3)
    iden = x
    if m.has_down:
        iden = _ref_bn(_ref_conv(x, m.wd, m.stride, 0, 1), m.gd, m.bd)
    return jnp.maximum(h + iden, 0.0)


# --------------------------------------- main ---------------------------------------- #
if __name__ == "__main__":
    key = jax.random.PRNGKey(0)
    kx, kp1, kp2 = jax.random.split(key, 3)

    # Config 1: downsample path (stride 2, channel expansion)
    x1 = jax.random.normal(kx, (2, 4, 16, 16), jnp.float32)
    x1 = x1.astype(jnp.bfloat16).astype(jnp.float32)   # bf16-representable data
    m1 = BottleneckPallas(4, 16, stride=2, dilation=1, downsample=True, key=kp1)
    y1 = jax.block_until_ready(jax.jit(m1.__call__)(x1))
    r1 = bottleneck_ref(m1, x1)
    assert y1.shape == (2, 16, 8, 8), y1.shape
    assert jnp.allclose(y1, r1, atol=5e-2, rtol=5e-2), float(jnp.max(jnp.abs(y1 - r1)))

    # Config 2: plain identity skip (stride 1, dilation 2, in_ch == out_ch)
    x2 = jax.random.normal(kx, (2, 8, 16, 16), jnp.float32)
    x2 = x2.astype(jnp.bfloat16).astype(jnp.float32)
    m2 = BottleneckPallas(8, 8, stride=1, dilation=2, downsample=False, key=kp2)
    y2 = jax.block_until_ready(jax.jit(m2.__call__)(x2))
    r2 = bottleneck_ref(m2, x2)
    assert y2.shape == (2, 8, 16, 16), y2.shape
    assert jnp.allclose(y2, r2, atol=5e-2, rtol=5e-2), float(jnp.max(jnp.abs(y2 - r2)))

    print("KERNEL_OK")
</pallas_src>

<mosaic_0001>
module attributes {stable_mosaic.version = 11 : i64} {
  func.func @_mm_stats_kernel(%arg0: i32, %arg1: memref<128x128xbf16, #tpu.memory_space<vmem>>, %arg2: memref<128x128xbf16, #tpu.memory_space<vmem>>, %arg3: memref<128x128xbf16, #tpu.memory_space<vmem>>, %arg4: memref<1x1x128xf32, #tpu.memory_space<vmem>>, %arg5: memref<1x1x128xf32, #tpu.memory_space<vmem>>) attributes {dimension_semantics = [#tpu.dimension_semantics<parallel>], iteration_bounds = array<i64: 1>, scalar_prefetch = 0 : i64, scratch_operands = 0 : i64, tpu.core_type = #tpu.core_type<tc>, window_params = [{transform_indices = @transform_0, window_bounds = array<i64: 128, 128>}, {pipeline_mode = #tpu.pipeline_mode<synchronous>, transform_indices = @transform_1, window_bounds = array<i64: 128, 128>}, {transform_indices = @transform_2, window_bounds = array<i64: 128, 128>}, {transform_indices = @transform_3, window_bounds = array<i64: 1, 1, 128>}, {transform_indices = @transform_4, window_bounds = array<i64: 1, 1, 128>}]} {
    %c0 = arith.constant 0 : index
    %c0_0 = arith.constant 0 : index
    %0 = vector.load %arg1[%c0, %c0_0] : memref<128x128xbf16, #tpu.memory_space<vmem>>, vector<128x128xbf16>
    %c0_1 = arith.constant 0 : index
    %c0_2 = arith.constant 0 : index
    %1 = vector.load %arg2[%c0_1, %c0_2] : memref<128x128xbf16, #tpu.memory_space<vmem>>, vector<128x128xbf16>
    %cst = arith.constant dense<0.000000e+00> : vector<128x128xf32>
    %2 = tpu.matmul %0, %1, %cst {dimension_numbers = #tpu.dot_dimension_numbers<[1], [0], [0], [1], [0, 0, 1, 1], [], []>} : vector<128x128xbf16>, vector<128x128xbf16>, vector<128x128xf32> -> vector<128x128xf32>
    %3 = arith.truncf %2 : vector<128x128xf32> to vector<128x128xbf16>
    %c0_3 = arith.constant 0 : index
    %c0_4 = arith.constant 0 : index
    %4 = vector.load %arg3[%c0_3, %c0_4] : memref<128x128xbf16, #tpu.memory_space<vmem>>, vector<128x128xbf16>
    tpu.vector_store %arg3[%c0_3, %c0_4], %3 {strides = array<i32>} : memref<128x128xbf16, #tpu.memory_space<vmem>>, vector<128x128xbf16>,
    %cst_5 = arith.constant dense<0.000000e+00> : vector<128xf32>
    %5 = vector.multi_reduction <add>, %2, %cst_5 [0] : vector<128x128xf32> to vector<128xf32>
    %6 = vector.shape_cast %5 : vector<128xf32> to vector<1x128xf32>
    %7 = arith.mulf %2, %2 : vector<128x128xf32>
    %cst_6 = arith.constant dense<0.000000e+00> : vector<128xf32>
    %8 = vector.multi_reduction <add>, %7, %cst_6 [0] : vector<128x128xf32> to vector<128xf32>
    %9 = vector.shape_cast %8 : vector<128xf32> to vector<1x128xf32>
    %10 = vector.shape_cast %6 : vector<1x128xf32> to vector<1x1x128xf32>
    %c0_7 = arith.constant 0 : index
    %c0_8 = arith.constant 0 : index
    %c0_9 = arith.constant 0 : index
    %11 = vector.load %arg4[%c0_7, %c0_8, %c0_9] : memref<1x1x128xf32, #tpu.memory_space<vmem>>, vector<1x1x128xf32>
    tpu.vector_store %arg4[%c0_7, %c0_8, %c0_9], %10 {strides = array<i32>} : memref<1x1x128xf32, #tpu.memory_space<vmem>>, vector<1x1x128xf32>,
    %12 = vector.shape_cast %9 : vector<1x128xf32> to vector<1x1x128xf32>
    %c0_10 = arith.constant 0 : index
    %c0_11 = arith.constant 0 : index
    %c0_12 = arith.constant 0 : index
    %13 = vector.load %arg5[%c0_10, %c0_11, %c0_12] : memref<1x1x128xf32, #tpu.memory_space<vmem>>, vector<1x1x128xf32>
    tpu.vector_store %arg5[%c0_10, %c0_11, %c0_12], %12 {strides = array<i32>} : memref<1x1x128xf32, #tpu.memory_space<vmem>>, vector<1x1x128xf32>,
    return
  }
  func.func @transform_0(%arg0: i32) -> (i32, i32) {
    %c0_i32 = arith.constant 0 : i32
    %c0_i32_0 = arith.constant 0 : i32
    return %arg0, %c0_i32 : i32, i32
  }
  func.func @transform_1(%arg0: i32) -> (i32, i32) {
    %c0_i32 = arith.constant 0 : i32
    %c0_i32_0 = arith.constant 0 : i32
    %c0_i32_1 = arith.constant 0 : i32
    return %c0_i32, %c0_i32_0 : i32, i32
  }
  func.func @transform_2(%arg0: i32) -> (i32, i32) {
    %c0_i32 = arith.constant 0 : i32
    %c0_i32_0 = arith.constant 0 : i32
    return %arg0, %c0_i32 : i32, i32
  }
  func.func @transform_3(%arg0: i32) -> (i32, i32, i32) {
    %c0_i32 = arith.constant 0 : i32
    %c0_i32_0 = arith.constant 0 : i32
    %c0_i32_1 = arith.constant 0 : i32
    return %arg0, %c0_i32, %c0_i32_0 : i32, i32, i32
  }
  func.func @transform_4(%arg0: i32) -> (i32, i32, i32) {
    %c0_i32 = arith.constant 0 : i32
    %c0_i32_0 = arith.constant 0 : i32
    %c0_i32_1 = arith.constant 0 : i32
    return %arg0, %c0_i32, %c0_i32_0 : i32, i32, i32
  }
}

module attributes {stable_mosaic.version = 11 : i64} {
  func.func @_mm_stats_kernel(%arg0: i32, %arg1: memref<256x128xbf16, #tpu.memory_space<vmem>>, %arg2: memref<128x128xbf16, #tpu.memory_space<vmem>>, %arg3: memref<256x128xbf16, #tpu.memory_space<vmem>>, %arg4: memref<1x1x128xf32, #tpu.memory_space<vmem>>, %arg5: memref<1x1x128xf32, #tpu.memory_space<vmem>>) attributes {dimension_semantics = [#tpu.dimension_semantics<parallel>], iteration_bounds = array<i64: 2>, scalar_prefetch = 0 : i64, scratch_operands = 0 : i64, tpu.core_type = #tpu.core_type<tc>, window_params = [{transform_indices = @transform_0, window_bounds = array<i64: 256, 128>}, {pipeline_mode = #tpu.pipeline_mode<synchronous>, transform_indices = @transform_1, window_bounds = array<i64: 128, 128>}, {transform_indices = @transform_2, window_bounds = array<i64: 256, 128>}, {transform_indices = @transform_3, window_bounds = array<i64: 1, 1, 128>}, {transform_indices = @transform_4, window_bounds = array<i64: 1, 1, 128>}]} {
    %c0 = arith.constant 0 : index
    %c0_0 = arith.constant 0 : index
    %0 = vector.load %arg1[%c0, %c0_0] : memref<256x128xbf16, #tpu.memory_space<vmem>>, vector<256x128xbf16>
    %c0_1 = arith.constant 0 : index
    %c0_2 = arith.constant 0 : index
    %1 = vector.load %arg2[%c0_1, %c0_2] : memref<128x128xbf16, #tpu.memory_space<vmem>>, vector<128x128xbf16>
    %cst = arith.constant dense<0.000000e+00> : vector<256x128xf32>
    %2 = tpu.matmul %0, %1, %cst {dimension_numbers = #tpu.dot_dimension_numbers<[1], [0], [0], [1], [0, 0, 1, 1], [], []>} : vector<256x128xbf16>, vector<128x128xbf16>, vector<256x128xf32> -> vector<256x128xf32>
    %3 = arith.truncf %2 : vector<256x128xf32> to vector<256x128xbf16>
    %c0_3 = arith.constant 0 : index
    %c0_4 = arith.constant 0 : index
    %4 = vector.load %arg3[%c0_3, %c0_4] : memref<256x128xbf16, #tpu.memory_space<vmem>>, vector<256x128xbf16>
    tpu.vector_store %arg3[%c0_3, %c0_4], %3 {strides = array<i32>} : memref<256x128xbf16, #tpu.memory_space<vmem>>, vector<256x128xbf16>,
    %cst_5 = arith.constant dense<0.000000e+00> : vector<128xf32>
    %5 = vector.multi_reduction <add>, %2, %cst_5 [0] : vector<256x128xf32> to vector<128xf32>
    %6 = vector.shape_cast %5 : vector<128xf32> to vector<1x128xf32>
    %7 = arith.mulf %2, %2 : vector<256x128xf32>
    %cst_6 = arith.constant dense<0.000000e+00> : vector<128xf32>
    %8 = vector.multi_reduction <add>, %7, %cst_6 [0] : vector<256x128xf32> to vector<128xf32>
    %9 = vector.shape_cast %8 : vector<128xf32> to vector<1x128xf32>
    %10 = vector.shape_cast %6 : vector<1x128xf32> to vector<1x1x128xf32>
    %c0_7 = arith.constant 0 : index
    %c0_8 = arith.constant 0 : index
    %c0_9 = arith.constant 0 : index
    %11 = vector.load %arg4[%c0_7, %c0_8, %c0_9] : memref<1x1x128xf32, #tpu.memory_space<vmem>>, vector<1x1x128xf32>
    tpu.vector_store %arg4[%c0_7, %c0_8, %c0_9], %10 {strides = array<i32>} : memref<1x1x128xf32, #tpu.memory_space<vmem>>, vector<1x1x128xf32>,
    %12 = vector.shape_cast %9 : vector<1x128xf32> to vector<1x1x128xf32>
    %c0_10 = arith.constant 0 : index
    %c0_11 = arith.constant 0 : index
    %c0_12 = arith.constant 0 : index
    %13 = vector.load %arg5[%c0_10, %c0_11, %c0_12] : memref<1x1x128xf32, #tpu.memory_space<vmem>>, vector<1x1x128xf32>
    tpu.vector_store %arg5[%c0_10, %c0_11, %c0_12], %12 {strides = array<i32>} : memref<1x1x128xf32, #tpu.memory_space<vmem>>, vector<1x1x128xf32>,
    return
  }
  func.func @transform_0(%arg0: i32) -> (i32, i32) {
    %c0_i32 = arith.constant 0 : i32
    %c0_i32_0 = arith.constant 0 : i32
    return %arg0, %c0_i32 : i32, i32
  }
  func.func @transform_1(%arg0: i32) -> (i32, i32) {
    %c0_i32 = arith.constant 0 : i32
    %c0_i32_0 = arith.constant 0 : i32
    %c0_i32_1 = arith.constant 0 : i32
    return %c0_i32, %c0_i32_0 : i32, i32
  }
  func.func @transform_2(%arg0: i32) -> (i32, i32) {
    %c0_i32 = arith.constant 0 : i32
    %c0_i32_0 = arith.constant 0 : i32
    return %arg0, %c0_i32 : i32, i32
  }
  func.func @transform_3(%arg0: i32) -> (i32, i32, i32) {
    %c0_i32 = arith.constant 0 : i32
    %c0_i32_0 = arith.constant 0 : i32
    %c0_i32_1 = arith.constant 0 : i32
    return %arg0, %c0_i32, %c0_i32_0 : i32, i32, i32
  }
  func.func @transform_4(%arg0: i32) -> (i32, i32, i32) {
    %c0_i32 = arith.constant 0 : i32
    %c0_i32_0 = arith.constant 0 : i32
    %c0_i32_1 = arith.constant 0 : i32
    return %arg0, %c0_i32, %c0_i32_0 : i32, i32, i32
  }
}

module attributes {stable_mosaic.version = 11 : i64} {
  func.func @_bn_apply_kernel(%arg0: i32, %arg1: memref<256x128xbf16, #tpu.memory_space<vmem>>, %arg2: memref<1x128xf32, #tpu.memory_space<vmem>>, %arg3: memref<1x128xf32, #tpu.memory_space<vmem>>, %arg4: memref<256x128xbf16, #tpu.memory_space<vmem>>) attributes {dimension_semantics = [#tpu.dimension_semantics<parallel>], iteration_bounds = array<i64: 2>, scalar_prefetch = 0 : i64, scratch_operands = 0 : i64, tpu.core_type = #tpu.core_type<tc>, window_params = [{transform_indices = @transform_0, window_bounds = array<i64: 256, 128>}, {pipeline_mode = #tpu.pipeline_mode<synchronous>, transform_indices = @transform_1, window_bounds = array<i64: 1, 128>}, {pipeline_mode = #tpu.pipeline_mode<synchronous>, transform_indices = @transform_2, window_bounds = array<i64: 1, 128>}, {transform_indices = @transform_3, window_bounds = array<i64: 256, 128>}]} {
    %c0 = arith.constant 0 : index
    %c0_0 = arith.constant 0 : index
    %0 = vector.load %arg1[%c0, %c0_0] : memref<256x128xbf16, #tpu.memory_space<vmem>>, vector<256x128xbf16>
    %1 = arith.extf %0 : vector<256x128xbf16> to vector<256x128xf32>
    %c0_1 = arith.constant 0 : index
    %c0_2 = arith.constant 0 : index
    %2 = vector.load %arg2[%c0_1, %c0_2] : memref<1x128xf32, #tpu.memory_space<vmem>>, vector<1x128xf32>
    %3 = vector.broadcast %2 : vector<1x128xf32> to vector<256x128xf32>
    %4 = arith.mulf %1, %3 : vector<256x128xf32>
    %c0_3 = arith.constant 0 : index
    %c0_4 = arith.constant 0 : index
    %5 = vector.load %arg3[%c0_3, %c0_4] : memref<1x128xf32, #tpu.memory_space<vmem>>, vector<1x128xf32>
    %6 = vector.broadcast %5 : vector<1x128xf32> to vector<256x128xf32>
    %7 = arith.addf %4, %6 : vector<256x128xf32>
    %cst = arith.constant 0.000000e+00 : f32
    %8 = vector.broadcast %cst : f32 to vector<256x128xf32>
    %9 = arith.maximumf %7, %8 : vector<256x128xf32>
    %10 = arith.truncf %9 : vector<256x128xf32> to vector<256x128xbf16>
    %c0_5 = arith.constant 0 : index
    %c0_6 = arith.constant 0 : index
    %11 = vector.load %arg4[%c0_5, %c0_6] : memref<256x128xbf16, #tpu.memory_space<vmem>>, vector<256x128xbf16>
    tpu.vector_store %arg4[%c0_5, %c0_6], %10 {strides = array<i32>} : memref<256x128xbf16, #tpu.memory_space<vmem>>, vector<256x128xbf16>,
    return
  }
  func.func @transform_0(%arg0: i32) -> (i32, i32) {
    %c0_i32 = arith.constant 0 : i32
    %c0_i32_0 = arith.constant 0 : i32
    return %arg0, %c0_i32 : i32, i32
  }
  func.func @transform_1(%arg0: i32) -> (i32, i32) {
    %c0_i32 = arith.constant 0 : i32
    %c0_i32_0 = arith.constant 0 : i32
    %c0_i32_1 = arith.constant 0 : i32
    return %c0_i32, %c0_i32_0 : i32, i32
  }
  func.func @transform_2(%arg0: i32) -> (i32, i32) {
    %c0_i32 = arith.constant 0 : i32
    %c0_i32_0 = arith.constant 0 : i32
    %c0_i32_1 = arith.constant 0 : i32
    return %c0_i32, %c0_i32_0 : i32, i32
  }
  func.func @transform_3(%arg0: i32) -> (i32, i32) {
    %c0_i32 = arith.constant 0 : i32
    %c0_i32_0 = arith.constant 0 : i32
    return %arg0, %c0_i32 : i32, i32
  }
}

module attributes {stable_mosaic.version = 11 : i64} {
  func.func @_mm_stats_kernel(%arg0: i32, %arg1: memref<128x128xbf16, #tpu.memory_space<vmem>>, %arg2: memref<128x128xbf16, #tpu.memory_space<vmem>>, %arg3: memref<1x128xf32, #tpu.memory_space<vmem>>, %arg4: memref<1x128xf32, #tpu.memory_space<vmem>>, %arg5: memref<128x128xbf16, #tpu.memory_space<vmem>>, %arg6: memref<1x1x128xf32, #tpu.memory_space<vmem>>, %arg7: memref<1x1x128xf32, #tpu.memory_space<vmem>>) attributes {dimension_semantics = [#tpu.dimension_semantics<parallel>], iteration_bounds = array<i64: 1>, scalar_prefetch = 0 : i64, scratch_operands = 0 : i64, tpu.core_type = #tpu.core_type<tc>, window_params = [{transform_indices = @transform_0, window_bounds = array<i64: 128, 128>}, {pipeline_mode = #tpu.pipeline_mode<synchronous>, transform_indices = @transform_1, window_bounds = array<i64: 128, 128>}, {pipeline_mode = #tpu.pipeline_mode<synchronous>, transform_indices = @transform_2, window_bounds = array<i64: 1, 128>}, {pipeline_mode = #tpu.pipeline_mode<synchronous>, transform_indices = @transform_3, window_bounds = array<i64: 1, 128>}, {transform_indices = @transform_4, window_bounds = array<i64: 128, 128>}, {transform_indices = @transform_5, window_bounds = array<i64: 1, 1, 128>}, {transform_indices = @transform_6, window_bounds = array<i64: 1, 1, 128>}]} {
    %c0 = arith.constant 0 : index
    %c0_0 = arith.constant 0 : index
    %0 = vector.load %arg1[%c0, %c0_0] : memref<128x128xbf16, #tpu.memory_space<vmem>>, vector<128x128xbf16>
    %1 = arith.extf %0 : vector<128x128xbf16> to vector<128x128xf32>
    %c0_1 = arith.constant 0 : index
    %c0_2 = arith.constant 0 : index
    %2 = vector.load %arg3[%c0_1, %c0_2] : memref<1x128xf32, #tpu.memory_space<vmem>>, vector<1x128xf32>
    %3 = vector.broadcast %2 : vector<1x128xf32> to vector<128x128xf32>
    %4 = arith.mulf %1, %3 : vector<128x128xf32>
    %c0_3 = arith.constant 0 : index
    %c0_4 = arith.constant 0 : index
    %5 = vector.load %arg4[%c0_3, %c0_4] : memref<1x128xf32, #tpu.memory_space<vmem>>, vector<1x128xf32>
    %6 = vector.broadcast %5 : vector<1x128xf32> to vector<128x128xf32>
    %7 = arith.addf %4, %6 : vector<128x128xf32>
    %cst = arith.constant 0.000000e+00 : f32
    %8 = vector.broadcast %cst : f32 to vector<128x128xf32>
    %9 = arith.maximumf %7, %8 : vector<128x128xf32>
    %10 = arith.truncf %9 : vector<128x128xf32> to vector<128x128xbf16>
    %c0_5 = arith.constant 0 : index
    %c0_6 = arith.constant 0 : index
    %11 = vector.load %arg2[%c0_5, %c0_6] : memref<128x128xbf16, #tpu.memory_space<vmem>>, vector<128x128xbf16>
    %cst_7 = arith.constant dense<0.000000e+00> : vector<128x128xf32>
    %12 = tpu.matmul %10, %11, %cst_7 {dimension_numbers = #tpu.dot_dimension_numbers<[1], [0], [0], [1], [0, 0, 1, 1], [], []>} : vector<128x128xbf16>, vector<128x128xbf16>, vector<128x128xf32> -> vector<128x128xf32>
    %13 = arith.truncf %12 : vector<128x128xf32> to vector<128x128xbf16>
    %c0_8 = arith.constant 0 : index
    %c0_9 = arith.constant 0 : index
    %14 = vector.load %arg5[%c0_8, %c0_9] : memref<128x128xbf16, #tpu.memory_space<vmem>>, vector<128x128xbf16>
    tpu.vector_store %arg5[%c0_8, %c0_9], %13 {strides = array<i32>} : memref<128x128xbf16, #tpu.memory_space<vmem>>, vector<128x128xbf16>,
    %cst_10 = arith.constant dense<0.000000e+00> : vector<128xf32>
    %15 = vector.multi_reduction <add>, %12, %cst_10 [0] : vector<128x128xf32> to vector<128xf32>
    %16 = vector.shape_cast %15 : vector<128xf32> to vector<1x128xf32>
    %17 = arith.mulf %12, %12 : vector<128x128xf32>
    %cst_11 = arith.constant dense<0.000000e+00> : vector<128xf32>
    %18 = vector.multi_reduction <add>, %17, %cst_11 [0] : vector<128x128xf32> to vector<128xf32>
    %19 = vector.shape_cast %18 : vector<128xf32> to vector<1x128xf32>
    %20 = vector.shape_cast %16 : vector<1x128xf32> to vector<1x1x128xf32>
    %c0_12 = arith.constant 0 : index
    %c0_13 = arith.constant 0 : index
    %c0_14 = arith.constant 0 : index
    %21 = vector.load %arg6[%c0_12, %c0_13, %c0_14] : memref<1x1x128xf32, #tpu.memory_space<vmem>>, vector<1x1x128xf32>
    tpu.vector_store %arg6[%c0_12, %c0_13, %c0_14], %20 {strides = array<i32>} : memref<1x1x128xf32, #tpu.memory_space<vmem>>, vector<1x1x128xf32>,
    %22 = vector.shape_cast %19 : vector<1x128xf32> to vector<1x1x128xf32>
    %c0_15 = arith.constant 0 : index
    %c0_16 = arith.constant 0 : index
    %c0_17 = arith.constant 0 : index
    %23 = vector.load %arg7[%c0_15, %c0_16, %c0_17] : memref<1x1x128xf32, #tpu.memory_space<vmem>>, vector<1x1x128xf32>
    tpu.vector_store %arg7[%c0_15, %c0_16, %c0_17], %22 {strides = array<i32>} : memref<1x1x128xf32, #tpu.memory_space<vmem>>, vector<1x1x128xf32>,
    return
  }
  func.func @transform_0(%arg0: i32) -> (i32, i32) {
    %c0_i32 = arith.constant 0 : i32
    %c0_i32_0 = arith.constant 0 : i32
    return %arg0, %c0_i32 : i32, i32
  }
  func.func @transform_1(%arg0: i32) -> (i32, i32) {
    %c0_i32 = arith.constant 0 : i32
    %c0_i32_0 = arith.constant 0 : i32
    %c0_i32_1 = arith.constant 0 : i32
    return %c0_i32, %c0_i32_0 : i32, i32
  }
  func.func @transform_2(%arg0: i32) -> (i32, i32) {
    %c0_i32 = arith.constant 0 : i32
    %c0_i32_0 = arith.constant 0 : i32
    %c0_i32_1 = arith.constant 0 : i32
    return %c0_i32, %c0_i32_0 : i32, i32
  }
  func.func @transform_3(%arg0: i32) -> (i32, i32) {
    %c0_i32 = arith.constant 0 : i32
    %c0_i32_0 = arith.constant 0 : i32
    %c0_i32_1 = arith.constant 0 : i32
    return %c0_i32, %c0_i32_0 : i32, i32
  }
  func.func @transform_4(%arg0: i32) -> (i32, i32) {
    %c0_i32 = arith.constant 0 : i32
    %c0_i32_0 = arith.constant 0 : i32
    return %arg0, %c0_i32 : i32, i32
  }
  func.func @transform_5(%arg0: i32) -> (i32, i32, i32) {
    %c0_i32 = arith.constant 0 : i32
    %c0_i32_0 = arith.constant 0 : i32
    %c0_i32_1 = arith.constant 0 : i32
    return %arg0, %c0_i32, %c0_i32_0 : i32, i32, i32
  }
  func.func @transform_6(%arg0: i32) -> (i32, i32, i32) {
    %c0_i32 = arith.constant 0 : i32
    %c0_i32_0 = arith.constant 0 : i32
    %c0_i32_1 = arith.constant 0 : i32
    return %arg0, %c0_i32, %c0_i32_0 : i32, i32, i32
  }
}

module attributes {stable_mosaic.version = 11 : i64} {
  func.func @_mm_stats_kernel(%arg0: i32, %arg1: memref<128x1152xbf16, #tpu.memory_space<vmem>>, %arg2: memref<1152x128xbf16, #tpu.memory_space<vmem>>, %arg3: memref<128x128xbf16, #tpu.memory_space<vmem>>, %arg4: memref<1x1x128xf32, #tpu.memory_space<vmem>>, %arg5: memref<1x1x128xf32, #tpu.memory_space<vmem>>) attributes {dimension_semantics = [#tpu.dimension_semantics<parallel>], iteration_bounds = array<i64: 1>, scalar_prefetch = 0 : i64, scratch_operands = 0 : i64, tpu.core_type = #tpu.core_type<tc>, window_params = [{transform_indices = @transform_0, window_bounds = array<i64: 128, 1152>}, {pipeline_mode = #tpu.pipeline_mode<synchronous>, transform_indices = @transform_1, window_bounds = array<i64: 1152, 128>}, {transform_indices = @transform_2, window_bounds = array<i64: 128, 128>}, {transform_indices = @transform_3, window_bounds = array<i64: 1, 1, 128>}, {transform_indices = @transform_4, window_bounds = array<i64: 1, 1, 128>}]} {
    %c0 = arith.constant 0 : index
    %c0_0 = arith.constant 0 : index
    %0 = vector.load %arg1[%c0, %c0_0] : memref<128x1152xbf16, #tpu.memory_space<vmem>>, vector<128x1152xbf16>
    %c0_1 = arith.constant 0 : index
    %c0_2 = arith.constant 0 : index
    %1 = vector.load %arg2[%c0_1, %c0_2] : memref<1152x128xbf16, #tpu.memory_space<vmem>>, vector<1152x128xbf16>
    %cst = arith.constant dense<0.000000e+00> : vector<128x128xf32>
    %2 = tpu.matmul %0, %1, %cst {dimension_numbers = #tpu.dot_dimension_numbers<[1], [0], [0], [1], [0, 0, 1, 1], [], []>} : vector<128x1152xbf16>, vector<1152x128xbf16>, vector<128x128xf32> -> vector<128x128xf32>
    %3 = arith.truncf %2 : vector<128x128xf32> to vector<128x128xbf16>
    %c0_3 = arith.constant 0 : index
    %c0_4 = arith.constant 0 : index
    %4 = vector.load %arg3[%c0_3, %c0_4] : memref<128x128xbf16, #tpu.memory_space<vmem>>, vector<128x128xbf16>
    tpu.vector_store %arg3[%c0_3, %c0_4], %3 {strides = array<i32>} : memref<128x128xbf16, #tpu.memory_space<vmem>>, vector<128x128xbf16>,
    %cst_5 = arith.constant dense<0.000000e+00> : vector<128xf32>
    %5 = vector.multi_reduction <add>, %2, %cst_5 [0] : vector<128x128xf32> to vector<128xf32>
    %6 = vector.shape_cast %5 : vector<128xf32> to vector<1x128xf32>
    %7 = arith.mulf %2, %2 : vector<128x128xf32>
    %cst_6 = arith.constant dense<0.000000e+00> : vector<128xf32>
    %8 = vector.multi_reduction <add>, %7, %cst_6 [0] : vector<128x128xf32> to vector<128xf32>
    %9 = vector.shape_cast %8 : vector<128xf32> to vector<1x128xf32>
    %10 = vector.shape_cast %6 : vector<1x128xf32> to vector<1x1x128xf32>
    %c0_7 = arith.constant 0 : index
    %c0_8 = arith.constant 0 : index
    %c0_9 = arith.constant 0 : index
    %11 = vector.load %arg4[%c0_7, %c0_8, %c0_9] : memref<1x1x128xf32, #tpu.memory_space<vmem>>, vector<1x1x128xf32>
    tpu.vector_store %arg4[%c0_7, %c0_8, %c0_9], %10 {strides = array<i32>} : memref<1x1x128xf32, #tpu.memory_space<vmem>>, vector<1x1x128xf32>,
    %12 = vector.shape_cast %9 : vector<1x128xf32> to vector<1x1x128xf32>
    %c0_10 = arith.constant 0 : index
    %c0_11 = arith.constant 0 : index
    %c0_12 = arith.constant 0 : index
    %13 = vector.load %arg5[%c0_10, %c0_11, %c0_12] : memref<1x1x128xf32, #tpu.memory_space<vmem>>, vector<1x1x128xf32>
    tpu.vector_store %arg5[%c0_10, %c0_11, %c0_12], %12 {strides = array<i32>} : memref<1x1x128xf32, #tpu.memory_space<vmem>>, vector<1x1x128xf32>,
    return
  }
  func.func @transform_0(%arg0: i32) -> (i32, i32) {
    %c0_i32 = arith.constant 0 : i32
    %c0_i32_0 = arith.constant 0 : i32
    return %arg0, %c0_i32 : i32, i32
  }
  func.func @transform_1(%arg0: i32) -> (i32, i32) {
    %c0_i32 = arith.constant 0 : i32
    %c0_i32_0 = arith.constant 0 : i32
    %c0_i32_1 = arith.constant 0 : i32
    return %c0_i32, %c0_i32_0 : i32, i32
  }
  func.func @transform_2(%arg0: i32) -> (i32, i32) {
    %c0_i32 = arith.constant 0 : i32
    %c0_i32_0 = arith.constant 0 : i32
    return %arg0, %c0_i32 : i32, i32
  }
  func.func @transform_3(%arg0: i32) -> (i32, i32, i32) {
    %c0_i32 = arith.constant 0 : i32
    %c0_i32_0 = arith.constant 0 : i32
    %c0_i32_1 = arith.constant 0 : i32
    return %arg0, %c0_i32, %c0_i32_0 : i32, i32, i32
  }
  func.func @transform_4(%arg0: i32) -> (i32, i32, i32) {
    %c0_i32 = arith.constant 0 : i32
    %c0_i32_0 = arith.constant 0 : i32
    %c0_i32_1 = arith.constant 0 : i32
    return %arg0, %c0_i32, %c0_i32_0 : i32, i32, i32
  }
}

module attributes {stable_mosaic.version = 11 : i64} {
  func.func @_bn_add_relu_kernel(%arg0: i32, %arg1: memref<128x128xbf16, #tpu.memory_space<vmem>>, %arg2: memref<1x128xf32, #tpu.memory_space<vmem>>, %arg3: memref<1x128xf32, #tpu.memory_space<vmem>>, %arg4: memref<128x128xbf16, #tpu.memory_space<vmem>>, %arg5: memref<1x128xf32, #tpu.memory_space<vmem>>, %arg6: memref<1x128xf32, #tpu.memory_space<vmem>>, %arg7: memref<128x128xf32, #tpu.memory_space<vmem>>) attributes {dimension_semantics = [#tpu.dimension_semantics<parallel>], iteration_bounds = array<i64: 1>, scalar_prefetch = 0 : i64, scratch_operands = 0 : i64, tpu.core_type = #tpu.core_type<tc>, window_params = [{transform_indices = @transform_0, window_bounds = array<i64: 128, 128>}, {pipeline_mode = #tpu.pipeline_mode<synchronous>, transform_indices = @transform_1, window_bounds = array<i64: 1, 128>}, {pipeline_mode = #tpu.pipeline_mode<synchronous>, transform_indices = @transform_2, window_bounds = array<i64: 1, 128>}, {transform_indices = @transform_3, window_bounds = array<i64: 128, 128>}, {pipeline_mode = #tpu.pipeline_mode<synchronous>, transform_indices = @transform_4, window_bounds = array<i64: 1, 128>}, {pipeline_mode = #tpu.pipeline_mode<synchronous>, transform_indices = @transform_5, window_bounds = array<i64: 1, 128>}, {transform_indices = @transform_6, window_bounds = array<i64: 128, 128>}]} {
    %c0 = arith.constant 0 : index
    %c0_0 = arith.constant 0 : index
    %0 = vector.load %arg1[%c0, %c0_0] : memref<128x128xbf16, #tpu.memory_space<vmem>>, vector<128x128xbf16>
    %1 = arith.extf %0 : vector<128x128xbf16> to vector<128x128xf32>
    %c0_1 = arith.constant 0 : index
    %c0_2 = arith.constant 0 : index
    %2 = vector.load %arg2[%c0_1, %c0_2] : memref<1x128xf32, #tpu.memory_space<vmem>>, vector<1x128xf32>
    %3 = vector.broadcast %2 : vector<1x128xf32> to vector<128x128xf32>
    %4 = arith.mulf %1, %3 : vector<128x128xf32>
    %c0_3 = arith.constant 0 : index
    %c0_4 = arith.constant 0 : index
    %5 = vector.load %arg3[%c0_3, %c0_4] : memref<1x128xf32, #tpu.memory_space<vmem>>, vector<1x128xf32>
    %6 = vector.broadcast %5 : vector<1x128xf32> to vector<128x128xf32>
    %7 = arith.addf %4, %6 : vector<128x128xf32>
    %c0_5 = arith.constant 0 : index
    %c0_6 = arith.constant 0 : index
    %8 = vector.load %arg4[%c0_5, %c0_6] : memref<128x128xbf16, #tpu.memory_space<vmem>>, vector<128x128xbf16>
    %9 = arith.extf %8 : vector<128x128xbf16> to vector<128x128xf32>
    %c0_7 = arith.constant 0 : index
    %c0_8 = arith.constant 0 : index
    %10 = vector.load %arg5[%c0_7, %c0_8] : memref<1x128xf32, #tpu.memory_space<vmem>>, vector<1x128xf32>
    %11 = vector.broadcast %10 : vector<1x128xf32> to vector<128x128xf32>
    %12 = arith.mulf %9, %11 : vector<128x128xf32>
    %c0_9 = arith.constant 0 : index
    %c0_10 = arith.constant 0 : index
    %13 = vector.load %arg6[%c0_9, %c0_10] : memref<1x128xf32, #tpu.memory_space<vmem>>, vector<1x128xf32>
    %14 = vector.broadcast %13 : vector<1x128xf32> to vector<128x128xf32>
    %15 = arith.addf %12, %14 : vector<128x128xf32>
    %16 = arith.addf %7, %15 : vector<128x128xf32>
    %cst = arith.constant 0.000000e+00 : f32
    %17 = vector.broadcast %cst : f32 to vector<128x128xf32>
    %18 = arith.maximumf %16, %17 : vector<128x128xf32>
    %c0_11 = arith.constant 0 : index
    %c0_12 = arith.constant 0 : index
    %19 = vector.load %arg7[%c0_11, %c0_12] : memref<128x128xf32, #tpu.memory_space<vmem>>, vector<128x128xf32>
    tpu.vector_store %arg7[%c0_11, %c0_12], %18 {strides = array<i32>} : memref<128x128xf32, #tpu.memory_space<vmem>>, vector<128x128xf32>,
    return
  }
  func.func @transform_0(%arg0: i32) -> (i32, i32) {
    %c0_i32 = arith.constant 0 : i32
    %c0_i32_0 = arith.constant 0 : i32
    return %arg0, %c0_i32 : i32, i32
  }
  func.func @transform_1(%arg0: i32) -> (i32, i32) {
    %c0_i32 = arith.constant 0 : i32
    %c0_i32_0 = arith.constant 0 : i32
    %c0_i32_1 = arith.constant 0 : i32
    return %c0_i32, %c0_i32_0 : i32, i32
  }
  func.func @transform_2(%arg0: i32) -> (i32, i32) {
    %c0_i32 = arith.constant 0 : i32
    %c0_i32_0 = arith.constant 0 : i32
    %c0_i32_1 = arith.constant 0 : i32
    return %c0_i32, %c0_i32_0 : i32, i32
  }
  func.func @transform_3(%arg0: i32) -> (i32, i32) {
    %c0_i32 = arith.constant 0 : i32
    %c0_i32_0 = arith.constant 0 : i32
    return %arg0, %c0_i32 : i32, i32
  }
  func.func @transform_4(%arg0: i32) -> (i32, i32) {
    %c0_i32 = arith.constant 0 : i32
    %c0_i32_0 = arith.constant 0 : i32
    %c0_i32_1 = arith.constant 0 : i32
    return %c0_i32, %c0_i32_0 : i32, i32
  }
  func.func @transform_5(%arg0: i32) -> (i32, i32) {
    %c0_i32 = arith.constant 0 : i32
    %c0_i32_0 = arith.constant 0 : i32
    %c0_i32_1 = arith.constant 0 : i32
    return %c0_i32, %c0_i32_0 : i32, i32
  }
  func.func @transform_6(%arg0: i32) -> (i32, i32) {
    %c0_i32 = arith.constant 0 : i32
    %c0_i32_0 = arith.constant 0 : i32
    return %arg0, %c0_i32 : i32, i32
  }
}

</mosaic_0001>

<bundles_post_ra>
// kernel: a_call__.10
= control target key start
LH: loop header
LB: loop body
LE: loop exit
PB: predicated region body
PF: predicated region fallthrough
CT: control target
= control target key end

     0   :  { %s670_s1 = inlined_call_operand.vmem [shape: bf16[128,128], index: 1, kind: input, shape index: {}]   ;;  %s671_s0 = inlined_call_operand.vmem [shape: bf16[128,128], index: 0, kind: input, shape index: {}]   ;;  %s672_s2 = inlined_call_operand.vmem [shape: bf16[128,128], index: 2, kind: output, shape index: {0}]   ;;  %s673_s3 = inlined_call_operand.vmem [shape: f32[1,1,128], index: 3, kind: output, shape index: {1}]   ;;  %s674_s4 = inlined_call_operand.vmem [shape: f32[1,1,128], index: 4, kind: output, shape index: {2}]  }
   0x1   :  { %v551_v0 = vld [vmem:[%s670_s1] sm:$0xff]   ;;  %v552_v1 = vld [vmem:[%s670_s1 + $0x8] sm:$0xff]   ;;  %v553_v2 = vld [vmem:[%s670_s1 + $0x10] sm:$0xff]  }
   0x2   :  { %503 = vmatprep.subr.bf16.mxu0 %v551_v0  ;;  %535 = vmatprep.subr.bf16.mxu1 %v551_v0  ;;  %v554_v3 = vld [vmem:[%s670_s1 + $0x18] sm:$0xff]   ;;  %v559_v4 = vld [vmem:[%s671_s0] sm:$0xff]   ;;  %v556_v7 = vld [vmem:[%s670_s1 + $0x28] sm:$0xff]  }
   0x3   :  { %504 = vmatpush3.bf16.msra.mxu0 %v551_v0  ;;  %543 = vmatpush3.bf16.msra.mxu1 %v551_v0  ;;  %v555_v5 = vld [vmem:[%s670_s1 + $0x20] sm:$0xff]   ;;  %v557_v8 = vld [vmem:[%s670_s1 + $0x30] sm:$0xff]   ;;  %v558_v9 = vld [vmem:[%s670_s1 + $0x38] sm:$0xff]  }
   0x4   :  { %505 = vmatprep.subr.bf16.mxu0 %v552_v1  ;;  %536 = vmatprep.subr.bf16.mxu1 %v552_v1  ;;  %v563_v6 = vld [vmem:[%s671_s0 + $0x20] sm:$0xff]   ;;  %v560_v10 = vld [vmem:[%s671_s0 + $0x8] sm:$0xff]   ;;  %v561_v12 = vld [vmem:[%s671_s0 + $0x10] sm:$0xff]  }
   0x5   :  { %519 = vmatprep.mubr.bf16.mxu0 %v559_v4  ;;  %527 = vmatprep.mubr.bf16.mxu1 %v563_v6  ;;  %v564_v11 = vld [vmem:[%s671_s0 + $0x28] sm:$0xff]   ;;  %v565_v13 = vld [vmem:[%s671_s0 + $0x30] sm:$0xff]   ;;  %v562_v14 = vld [vmem:[%s671_s0 + $0x18] sm:$0xff]  }
   0x6   :  { %v566_v15 = vld [vmem:[%s671_s0 + $0x38] sm:$0xff]  }
   0x7   :  { %506 = vmatpush3.bf16.msra.mxu0 %v552_v1  ;;  %544 = vmatpush3.bf16.msra.mxu1 %v552_v1 }
   0x8   :  { %507 = vmatprep.subr.bf16.mxu0 %v553_v2  ;;  %537 = vmatprep.subr.bf16.mxu1 %v553_v2 }
   0xb   :  { %508 = vmatpush3.bf16.msra.mxu0 %v553_v2  ;;  %545 = vmatpush3.bf16.msra.mxu1 %v553_v2 }
   0xc   :  { %509 = vmatprep.subr.bf16.mxu0 %v554_v3  ;;  %538 = vmatprep.subr.bf16.mxu1 %v554_v3 }
   0xf   :  { %510 = vmatpush3.bf16.msra.mxu0 %v554_v3  ;;  %546 = vmatpush3.bf16.msra.mxu1 %v554_v3 }
  0x10   :  { %511 = vmatprep.subr.bf16.mxu0 %v555_v5  ;;  %539 = vmatprep.subr.bf16.mxu1 %v555_v5 }
  0x13   :  { %512 = vmatpush3.bf16.msra.mxu0 %v555_v5  ;;  %547 = vmatpush3.bf16.msra.mxu1 %v555_v5 }
  0x14   :  { %513 = vmatprep.subr.bf16.mxu0 %v556_v7  ;;  %540 = vmatprep.subr.bf16.mxu1 %v556_v7 }
  0x17   :  { %514 = vmatpush3.bf16.msra.mxu0 %v556_v7  ;;  %548 = vmatpush3.bf16.msra.mxu1 %v556_v7 }
  0x18   :  { %515 = vmatprep.subr.bf16.mxu0 %v557_v8  ;;  %541 = vmatprep.subr.bf16.mxu1 %v557_v8 }
  0x1b   :  { %516 = vmatpush3.bf16.msra.mxu0 %v557_v8  ;;  %549 = vmatpush3.bf16.msra.mxu1 %v557_v8 }
  0x1c   :  { %517 = vmatprep.subr.bf16.mxu0 %v558_v9  ;;  %542 = vmatprep.subr.bf16.mxu1 %v558_v9 }
  0x1f   :  { %518 = vmatpush3.bf16.msra.mxu0 %v558_v9  ;;  %550 = vmatpush3.bf16.msra.mxu1 %v558_v9 }
  0x22   :  { %520 = vmatmul.mubr.bf16.vlgmr.msra.gmra.mrb[0].mxu0 %v560_v10  ;;  %528 = vmatmul.mubr.bf16.vlgmr.msra.gmra.mrb[0].mxu1 %v564_v11 }
  0x23   :  { %523 = vmatprep.mubr.bf16.mxu0 %v561_v12  ;;  %531 = vmatprep.mubr.bf16.mxu1 %v565_v13 }
  0x2a   :  { %524 = vmatmul.mubr.bf16.gmra.mrb[4].mxu0 %v562_v14  ;;  %532 = vmatmul.mubr.bf16.gmra.mrb[4].mxu1 %v566_v15 }
  0xf5   :  { %v521_v16 = vpop.f32.mrb[0].mxu0  ;;  %v529_v17 = vpop.f32.mrb[0].mxu1 }
  0xf6   :  { %v177_v18 = vpop.f32.mrb[1].mxu0  ;;  %v209_v19 = vpop.f32.mrb[1].mxu1  ;;  %v343_v31 = vmul.f32 %v521_v16, %v521_v16  ;;  %v351_v3 = vmul.f32 %v529_v17, %v529_v17 }
  0xf7   :  { %v522_v20 = vpop.f32.mrb[2].mxu0  ;;  %v530_v21 = vpop.f32.mrb[2].mxu1  ;;  %v341_v22 = vmul.f32 %v177_v18, %v177_v18  ;;  %v349_v61 = vmul.f32 %v209_v19, %v209_v19 }
  0xf8   :  { %v448_v23 = vpack.c.bf16 %v522_v20, %v521_v16  ;;  %v180_v24 = vpop.f32.mrb[3].mxu0  ;;  %v468_v25 = vpack.c.bf16 %v530_v21, %v529_v17  ;;  %v212_v26 = vpop.f32.mrb[3].mxu1  ;;  %v344_v34 = vmul.f32 %v522_v20, %v522_v20  ;;  %v352_v6 = vmul.f32 %v530_v21, %v530_v21 }
  0xf9   :  { %v443_v27 = vpack.c.bf16 %v180_v24, %v177_v18  ;;  %v320_v28 = vadd.f32 %v180_v24, %v177_v18  ;;  %v342_v29 = vmul.f32 %v180_v24, %v180_v24  ;;  %v463_v30 = vpack.c.bf16 %v212_v26, %v209_v19 }
  0xfa   :  { %480 = vst [vmem:[%s672_s2 + $0x8] sm:$0xff] %v448_v23   ;;  %484 = vst [vmem:[%s672_s2 + $0x28] sm:$0xff] %v468_v25   ;;  %v350_v2 = vmul.f32 %v212_v26, %v212_v26 }
  0xfb   :  { %444 = vst [vmem:[%s672_s2] sm:$0xff] %v443_v27   ;;  %v321_v32 = vadd.f32 %v521_v16, %v320_v28  ;;  %v357_v33 = vadd.f32 %v342_v29, %v341_v22  ;;  %483 = vst [vmem:[%s672_s2 + $0x20] sm:$0xff] %v463_v30  }
  0xfd   :  { %v358_v35 = vadd.f32 %v357_v33, %v343_v31  ;;  %v525_v36 = vpop.f32.mrb[4].mxu0  ;;  %v322_v37 = vadd.f32 %v522_v20, %v321_v32  ;;  %v533_v38 = vpop.f32.mrb[4].mxu1 }
  0xfe   :  { %v193_v39 = vpop.f32.mrb[5].mxu0  ;;  %v225_v40 = vpop.f32.mrb[5].mxu1  ;;  %v347_v55 = vmul.f32 %v525_v36, %v525_v36  ;;  %v355_v15 = vmul.f32 %v533_v38, %v533_v38 }
  0xff   :  { %v323_v41 = vadd.f32 %v322_v37, %v193_v39  ;;  %v345_v42 = vmul.f32 %v193_v39, %v193_v39  ;;  %v359_v43 = vadd.f32 %v358_v35, %v344_v34  ;;  %v526_v44 = vpop.f32.mrb[6].mxu0  ;;  %v534_v45 = vpop.f32.mrb[6].mxu1  ;;  %v353_v9 = vmul.f32 %v225_v40, %v225_v40 }
 0x100   :  { %v458_v46 = vpack.c.bf16 %v526_v44, %v525_v36  ;;  %v196_v47 = vpop.f32.mrb[7].mxu0  ;;  %v478_v48 = vpack.c.bf16 %v534_v45, %v533_v38  ;;  %v228_v49 = vpop.f32.mrb[7].mxu1  ;;  %v348_v58 = vmul.f32 %v526_v44, %v526_v44 }
 0x101   :  { %v360_v50 = vadd.f32 %v359_v43, %v345_v42  ;;  %v453_v51 = vpack.c.bf16 %v196_v47, %v193_v39  ;;  %v324_v52 = vadd.f32 %v323_v41, %v196_v47  ;;  %v346_v53 = vmul.f32 %v196_v47, %v196_v47 }
 0x102   :  { %482 = vst [vmem:[%s672_s2 + $0x18] sm:$0xff] %v458_v46   ;;  %486 = vst [vmem:[%s672_s2 + $0x38] sm:$0xff] %v478_v48   ;;  %v473_v54 = vpack.c.bf16 %v228_v49, %v225_v40  ;;  %v354_v14 = vmul.f32 %v228_v49, %v228_v49 }
 0x103   :  { %481 = vst [vmem:[%s672_s2 + $0x10] sm:$0xff] %v453_v51   ;;  %v325_v56 = vadd.f32 %v525_v36, %v324_v52  ;;  %v361_v57 = vadd.f32 %v360_v50, %v346_v53 }
 0x104   :  { %485 = vst [vmem:[%s672_s2 + $0x30] sm:$0xff] %v473_v54  }
 0x105   :  { %v362_v59 = vadd.f32 %v361_v57, %v347_v55  ;;  %v326_v60 = vadd.f32 %v526_v44, %v325_v56 }
 0x107   :  { %v327_v62 = vadd.f32 %v326_v60, %v209_v19  ;;  %v363_v63 = vadd.f32 %v362_v59, %v348_v58  ;;  %v356_v19 = vmul.f32 %v534_v45, %v534_v45 }
 0x109   :  { %v364_v0 = vadd.f32 %v363_v63, %v349_v61  ;;  %v328_v1 = vadd.f32 %v327_v62, %v212_v26 }
 0x10b   :  { %v329_v4 = vadd.f32 %v529_v17, %v328_v1  ;;  %v365_v5 = vadd.f32 %v364_v0, %v350_v2 }
 0x10d   :  { %v366_v7 = vadd.f32 %v365_v5, %v351_v3  ;;  %v330_v8 = vadd.f32 %v530_v21, %v329_v4 }
 0x10f   :  { %v331_v10 = vadd.f32 %v330_v8, %v225_v40  ;;  %v367_v11 = vadd.f32 %v366_v7, %v352_v6 }
 0x111   :  { %v368_v12 = vadd.f32 %v367_v11, %v353_v9  ;;  %v332_v13 = vadd.f32 %v331_v10, %v228_v49 }
 0x113   :  { %v333_v16 = vadd.f32 %v533_v38, %v332_v13  ;;  %v369_v18 = vadd.f32 %v368_v12, %v354_v14 }
 0x115   :  { %v334_v20 = vadd.f32 %v534_v45, %v333_v16  ;;  %v370_v22 = vadd.f32 %v369_v18, %v355_v15 }
 0x117   :  { %v335_v23 = vrot.slane %v334_v20, 4  ;;  %v371_v24 = vadd.f32 %v370_v22, %v356_v19 }
 0x119   :  { %v336_v25 = vadd.f32 %v335_v23, %v334_v20  ;;  %v372_v17 = vrot.slane %v371_v24, 4 }
 0x11b   :  { %v337_v26 = vrot.slane %v336_v25, 2  ;;  %v373_v27 = vadd.f32 %v372_v17, %v371_v24 }
 0x11d   :  { %v338_v28 = vadd.f32 %v337_v26, %v336_v25  ;;  %v374_v21 = vrot.slane %v373_v27, 2 }
 0x11f   :  { %v339_v29 = vrot.slane %v338_v28, 1  ;;  %v375_v30 = vadd.f32 %v374_v21, %v373_v27 }
 0x121   :  { %v340_v31 = vadd.f32 %v339_v29, %v338_v28  ;;  %v376_v32 = vrot.slane %v375_v30, 1 }
 0x123   :  { %v377_v33 = vadd.f32 %v376_v32, %v375_v30  ;;  %378 = vst [vmem:[%s673_s3] sm:$0x1] %v340_v31 }
 0x125   :  { %379 = vst [vmem:[%s674_s4] sm:$0x1] %v377_v33 }

// kernel: a_call__.6
= control target key start
LH: loop header
LB: loop body
LE: loop exit
PB: predicated region body
PF: predicated region fallthrough
CT: control target
= control target key end

     0   :  { %s1293_s15 = smov 0   ;;  %s1472_s0 = inlined_call_operand.vmem [shape: bf16[512,128], index: 0, kind: input, shape index: {}]   ;;  %s1473_s1 = inlined_call_operand.vmem [shape: bf16[128,128], index: 1, kind: input, shape index: {}]   ;;  %s1474_s2 = inlined_call_operand.vmem [shape: bf16[512,128], index: 2, kind: output, shape index: {0}]   ;;  %s1475_s3 = inlined_call_operand.vmem [shape: f32[2,1,128], index: 3, kind: output, shape index: {1}]   ;;  %s1476_s4 = inlined_call_operand.vmem [shape: f32[2,1,128], index: 4, kind: output, shape index: {2}]  }
   0x1 LB: > { %s1299_s16 = sadd.s32 4294967295, %s1266_s15   ;;  %p950_p0 = scmp.ge.s32.totalorder %s1266_s15, 1  ;;  %s1266_s15 = sphi %s1293_s15, %s15_s15  }
   0x2   : > { %p168_p1 = scmp.lt.s32.totalorder %s1266_s15, 3 }
   0x4   : > { %p169_p2 = pnand %p950_p0, %p168_p1 }
   0x5   : > { %v1236_v0 = vld [vmem:[%s1473_s1] sm:$0xff] (!%p169_p2)   ;;  %s951_s19 = sshll.u32 (!%p169_p2), %s1299_s16, 5  ;;  %v1237_v1 = vld [vmem:[%s1473_s1 + $0x8] sm:$0xff] (!%p169_p2)   ;;  %v1238_v2 = vld [vmem:[%s1473_s1 + $0x10] sm:$0xff] (!%p169_p2)   ;;  %p212_p4 = scmp.lt.s32.totalorder (!%p169_p2), %s1299_s16, 1 }
   0x6   : > { %172 = sbr.rel (%p169_p2) target bundleno = 330 (0x14a), region = 28  ;;  %p201_p3 = scmp.lt.s32.totalorder (!%p169_p2), %s951_s19, 63  ;;  %1164 = vmatprep.subr.bf16.mxu0 (!%p169_p2), %v1236_v0  ;;  %1212 = vmatprep.subr.bf16.mxu1 (!%p169_p2), %v1236_v0  ;;  %v1239_v3 = vld [vmem:[%s1473_s1 + $0x18] sm:$0xff] (!%p169_p2)   ;;  %v1240_v5 = vld [vmem:[%s1473_s1 + $0x20] sm:$0xff] (!%p169_p2)   ;;  %v1241_v6 = vld [vmem:[%s1473_s1 + $0x28] sm:$0xff] (!%p169_p2)  }
   0x7   : > { %1165 = vmatpush3.bf16.msra.mxu0 (!%p169_p2), %v1236_v0  ;;  %1220 = vmatpush3.bf16.msra.mxu1 (!%p169_p2), %v1236_v0  ;;  %v1242_v8 = vld [vmem:[%s1473_s1 + $0x30] sm:$0xff] (!%p169_p2)   ;;  %v1243_v9 = vld [vmem:[%s1473_s1 + $0x38] sm:$0xff] (!%p169_p2)  }
   0x8   : > { %1166 = vmatprep.subr.bf16.mxu0 (!%p169_p2), %v1237_v1  ;;  %1213 = vmatprep.subr.bf16.mxu1 (!%p169_p2), %v1237_v1 }
   0xb   : > { %1167 = vmatpush3.bf16.msra.mxu0 (!%p169_p2), %v1237_v1  ;;  %1221 = vmatpush3.bf16.msra.mxu1 (!%p169_p2), %v1237_v1 }
   0xc   : > { %1168 = vmatprep.subr.bf16.mxu0 (!%p169_p2), %v1238_v2  ;;  %1214 = vmatprep.subr.bf16.mxu1 (!%p169_p2), %v1238_v2 }
   0xd   : > { %s1478_s19 = smov (!%p201_p3, %s951_s19), 63  ;;  %s1480_s16 = smov (!%p212_p4, %s1299_s16), 1 }
   0xe   : > { %s952_s24 = sshll.u32 %s1478_s19, 2  ;;  %s214_s19 = scalar_lea.vmem %s1475_s3, %s1480_s16 }
   0xf   : > { %s1321_s27 = scalar_lea.vmem %s1472_s0, %s952_s24  ;;  %1169 = vmatpush3.bf16.msra.mxu0 %v1238_v2  ;;  %1222 = vmatpush3.bf16.msra.mxu1 %v1238_v2  ;;  %s1363_s14 = scalar_lea.vmem %s1474_s2, %s952_s24 }
  0x10   : > { %v1244_v4 = vld [vmem:[%s1321_s27] sm:$0xff]   ;;  %1170 = vmatprep.subr.bf16.mxu0 %v1239_v3  ;;  %1215 = vmatprep.subr.bf16.mxu1 %v1239_v3  ;;  %v1245_v10 = vld [vmem:[%s1321_s27 + $0x8] sm:$0xff]   ;;  %v1246_v12 = vld [vmem:[%s1321_s27 + $0x10] sm:$0xff]   ;;  %s217_s22 = scalar_lea.vmem %s1476_s4, %s1480_s16 }
  0x11   : > { %1180 = vmatprep.mubr.bf16.mxu0 %v1244_v4  ;;  %v1252_v7 = vld [vmem:[%s1321_s27 + $0x40] sm:$0xff]   ;;  %v1253_v11 = vld [vmem:[%s1321_s27 + $0x48] sm:$0xff]   ;;  %v1254_v13 = vld [vmem:[%s1321_s27 + $0x50] sm:$0xff]  }
  0x12   : > { %1196 = vmatprep.mubr.bf16.mxu1 %v1252_v7  ;;  %v1247_v14 = vld [vmem:[%s1321_s27 + $0x18] sm:$0xff]   ;;  %v1248_v16 = vld [vmem:[%s1321_s27 + $0x20] sm:$0xff]   ;;  %v1249_v18 = vld [vmem:[%s1321_s27 + $0x28] sm:$0xff]  }
  0x13   : > { %1171 = vmatpush3.bf16.msra.mxu0 %v1239_v3  ;;  %1223 = vmatpush3.bf16.msra.mxu1 %v1239_v3  ;;  %v1255_v15 = vld [vmem:[%s1321_s27 + $0x58] sm:$0xff]   ;;  %v1256_v17 = vld [vmem:[%s1321_s27 + $0x60] sm:$0xff]   ;;  %v1257_v19 = vld [vmem:[%s1321_s27 + $0x68] sm:$0xff]  }
  0x14   : > { %1172 = vmatprep.subr.bf16.mxu0 %v1240_v5  ;;  %1216 = vmatprep.subr.bf16.mxu1 %v1240_v5  ;;  %v1250_v20 = vld [vmem:[%s1321_s27 + $0x30] sm:$0xff]   ;;  %v1251_v22 = vld [vmem:[%s1321_s27 + $0x38] sm:$0xff]  }
  0x15   : > { %v1258_v21 = vld [vmem:[%s1321_s27 + $0x70] sm:$0xff]   ;;  %v1259_v23 = vld [vmem:[%s1321_s27 + $0x78] sm:$0xff]  }
  0x17   : > { %1173 = vmatpush3.bf16.msra.mxu0 %v1240_v5  ;;  %1224 = vmatpush3.bf16.msra.mxu1 %v1240_v5 }
  0x18   : > { %1174 = vmatprep.subr.bf16.mxu0 %v1241_v6  ;;  %1217 = vmatprep.subr.bf16.mxu1 %v1241_v6 }
  0x1b   : > { %1175 = vmatpush3.bf16.msra.mxu0 %v1241_v6  ;;  %1225 = vmatpush3.bf16.msra.mxu1 %v1241_v6 }
  0x1c   : > { %1176 = vmatprep.subr.bf16.mxu0 %v1242_v8  ;;  %1218 = vmatprep.subr.bf16.mxu1 %v1242_v8 }
  0x1f   : > { %1177 = vmatpush3.bf16.msra.mxu0 %v1242_v8  ;;  %1226 = vmatpush3.bf16.msra.mxu1 %v1242_v8 }
  0x20   : > { %1178 = vmatprep.subr.bf16.mxu0 %v1243_v9  ;;  %1219 = vmatprep.subr.bf16.mxu1 %v1243_v9 }
  0x23   : > { %1179 = vmatpush3.bf16.msra.mxu0 %v1243_v9  ;;  %1227 = vmatpush3.bf16.msra.mxu1 %v1243_v9 }
  0x26   : > { %1181 = vmatmul.mubr.bf16.vlgmr.msra.gmra.mrb[0].mxu0 %v1245_v10  ;;  %1197 = vmatmul.mubr.bf16.vlgmr.msra.gmra.mrb[0].mxu1 %v1253_v11 }
  0x27   : > { %1184 = vmatprep.mubr.bf16.mxu0 %v1246_v12  ;;  %1200 = vmatprep.mubr.bf16.mxu1 %v1254_v13 }
  0x2e   : > { %1185 = vmatmul.mubr.bf16.gmra.mrb[4].mxu0 %v1247_v14  ;;  %1201 = vmatmul.mubr.bf16.gmra.mrb[4].mxu1 %v1255_v15 }
  0x2f   : > { %1188 = vmatprep.mubr.bf16.mxu0 %v1248_v16  ;;  %1204 = vmatprep.mubr.bf16.mxu1 %v1256_v17 }
  0x36   : > { %1189 = vmatmul.mubr.bf16.gmra.mrb[8].mxu0 %v1249_v18  ;;  %1205 = vmatmul.mubr.bf16.gmra.mrb[8].mxu1 %v1257_v19 }
  0x37   : > { %1192 = vmatprep.mubr.bf16.mxu0 %v1250_v20  ;;  %1208 = vmatprep.mubr.bf16.mxu1 %v1258_v21 }
  0x3e   : > { %1193 = vmatmul.mubr.bf16.gmra.mrb[12].mxu0 %v1251_v22  ;;  %1209 = vmatmul.mubr.bf16.gmra.mrb[12].mxu1 %v1259_v23 }
  0xf9   : > { %v1182_v24 = vpop.f32.mrb[0].mxu0  ;;  %v1354_v25 = vpop.f32.mrb[0].mxu1 }
  0xfa   : > { %v445_v26 = vpop.f32.mrb[1].mxu0  ;;  %v1356_v27 = vpop.f32.mrb[1].mxu1  ;;  %v771_v39 = vmul.f32 %v1182_v24, %v1182_v24 }
  0xfb   : > { %v1183_v28 = vpop.f32.mrb[2].mxu0  ;;  %v1365_v29 = vpop.f32.mrb[2].mxu1  ;;  %v769_v30 = vmul.f32 %v445_v26, %v445_v26 }
  0xfc   : > { %v1053_v31 = vpack.c.bf16 %v1183_v28, %v1182_v24  ;;  %v448_v32 = vpop.f32.mrb[3].mxu0  ;;  %v1093_v33 = vpack.c.bf16 %v1365_v29, %v1354_v25  ;;  %v1369_v34 = vpop.f32.mrb[3].mxu1  ;;  %v772_v42 = vmul.f32 %v1183_v28, %v1183_v28 }
  0xfd   : > { %v1048_v35 = vpack.c.bf16 %v448_v32, %v445_v26  ;;  %v732_v36 = vadd.f32 %v448_v32, %v445_v26  ;;  %v770_v37 = vmul.f32 %v448_v32, %v448_v32  ;;  %v1088_v38 = vpack.c.bf16 %v1369_v34, %v1356_v27 }
  0xfe   : > { %1125 = vst [vmem:[%s1363_s14 + $0x8] sm:$0xff] %v1053_v31   ;;  %1133 = vst [vmem:[%s1363_s14 + $0x48] sm:$0xff] %v1093_v33  }
  0xff   : > { %1049 = vst [vmem:[%s1363_s14] sm:$0xff] %v1048_v35   ;;  %v733_v40 = vadd.f32 %v1182_v24, %v732_v36  ;;  %v801_v41 = vadd.f32 %v770_v37, %v769_v30  ;;  %1132 = vst [vmem:[%s1363_s14 + $0x40] sm:$0xff] %v1088_v38  }
 0x101   : > { %v802_v43 = vadd.f32 %v801_v41, %v771_v39  ;;  %v1186_v44 = vpop.f32.mrb[4].mxu0  ;;  %v734_v45 = vadd.f32 %v1183_v28, %v733_v40  ;;  %v1377_v46 = vpop.f32.mrb[4].mxu1 }
 0x102   : > { %v461_v47 = vpop.f32.mrb[5].mxu0  ;;  %v1379_v48 = vpop.f32.mrb[5].mxu1  ;;  %v775_v63 = vmul.f32 %v1186_v44, %v1186_v44 }
 0x103   : > { %v735_v49 = vadd.f32 %v734_v45, %v461_v47  ;;  %v773_v50 = vmul.f32 %v461_v47, %v461_v47  ;;  %v803_v51 = vadd.f32 %v802_v43, %v772_v42  ;;  %v1187_v52 = vpop.f32.mrb[6].mxu0  ;;  %v1381_v53 = vpop.f32.mrb[6].mxu1 }
 0x104   : > { %v1063_v54 = vpack.c.bf16 %v1187_v52, %v1186_v44  ;;  %v464_v55 = vpop.f32.mrb[7].mxu0  ;;  %v1103_v56 = vpack.c.bf16 %v1381_v53, %v1377_v46  ;;  %v1385_v57 = vpop.f32.mrb[7].mxu1  ;;  %v776_v2 = vmul.f32 %v1187_v52, %v1187_v52 }
 0x105   : > { %v804_v58 = vadd.f32 %v803_v51, %v773_v50  ;;  %v1058_v59 = vpack.c.bf16 %v464_v55, %v461_v47  ;;  %v736_v60 = vadd.f32 %v735_v49, %v464_v55  ;;  %v774_v61 = vmul.f32 %v464_v55, %v464_v55 }
 0x106   : > { %1127 = vst [vmem:[%s1363_s14 + $0x18] sm:$0xff] %v1063_v54   ;;  %1135 = vst [vmem:[%s1363_s14 + $0x58] sm:$0xff] %v1103_v56   ;;  %v1098_v62 = vpack.c.bf16 %v1385_v57, %v1379_v48 }
 0x107   : > { %1126 = vst [vmem:[%s1363_s14 + $0x10] sm:$0xff] %v1058_v59   ;;  %v737_v0 = vadd.f32 %v1186_v44, %v736_v60  ;;  %v805_v1 = vadd.f32 %v804_v58, %v774_v61  ;;  %v785_v61 = vmul.f32 %v1356_v27, %v1356_v27 }
 0x108   : > { %1134 = vst [vmem:[%s1363_s14 + $0x50] sm:$0xff] %v1098_v62  }
 0x109   : > { %v806_v3 = vadd.f32 %v805_v1, %v775_v63  ;;  %v1190_v4 = vpop.f32.mrb[8].mxu0  ;;  %v738_v5 = vadd.f32 %v1187_v52, %v737_v0  ;;  %v1393_v6 = vpop.f32.mrb[8].mxu1 }
 0x10a   : > { %v477_v7 = vpop.f32.mrb[9].mxu0  ;;  %v1395_v8 = vpop.f32.mrb[9].mxu1  ;;  %v779_v23 = vmul.f32 %v1190_v4, %v1190_v4 }
 0x10b   : > { %v739_v9 = vadd.f32 %v738_v5, %v477_v7  ;;  %v777_v10 = vmul.f32 %v477_v7, %v477_v7  ;;  %v807_v11 = vadd.f32 %v806_v3, %v776_v2  ;;  %v1191_v12 = vpop.f32.mrb[10].mxu0  ;;  %v1397_v13 = vpop.f32.mrb[10].mxu1  ;;  %v786_v2 = vmul.f32 %v1369_v34, %v1369_v34 }
 0x10c   : > { %v1073_v14 = vpack.c.bf16 %v1191_v12, %v1190_v4  ;;  %v480_v15 = vpop.f32.mrb[11].mxu0  ;;  %v1113_v16 = vpack.c.bf16 %v1397_v13, %v1393_v6  ;;  %v1401_v17 = vpop.f32.mrb[11].mxu1  ;;  %v780_v28 = vmul.f32 %v1191_v12, %v1191_v12  ;;  %v787_v3 = vmul.f32 %v1354_v25, %v1354_v25 }
 0x10d   : > { %v808_v18 = vadd.f32 %v807_v11, %v777_v10  ;;  %v1068_v19 = vpack.c.bf16 %v480_v15, %v477_v7  ;;  %v740_v20 = vadd.f32 %v739_v9, %v480_v15  ;;  %v778_v21 = vmul.f32 %v480_v15, %v480_v15 }
 0x10e   : > { %1129 = vst [vmem:[%s1363_s14 + $0x28] sm:$0xff] %v1073_v14   ;;  %1137 = vst [vmem:[%s1363_s14 + $0x68] sm:$0xff] %v1113_v16   ;;  %v1108_v22 = vpack.c.bf16 %v1401_v17, %v1395_v8  ;;  %v788_v7 = vmul.f32 %v1365_v29, %v1365_v29  ;;  %v790_v15 = vmul.f32 %v1385_v57, %v1385_v57 }
 0x10f   : > { %1128 = vst [vmem:[%s1363_s14 + $0x20] sm:$0xff] %v1068_v19   ;;  %v741_v24 = vadd.f32 %v1190_v4, %v740_v20  ;;  %v809_v26 = vadd.f32 %v808_v18, %v778_v21 }
 0x110   : > { %1136 = vst [vmem:[%s1363_s14 + $0x60] sm:$0xff] %v1108_v22  }
 0x111   : > { %v810_v30 = vadd.f32 %v809_v26, %v779_v23  ;;  %v1194_v31 = vpop.f32.mrb[12].mxu0  ;;  %v742_v32 = vadd.f32 %v1191_v12, %v741_v24  ;;  %v1409_v33 = vpop.f32.mrb[12].mxu1  ;;  %v794_v24 = vmul.f32 %v1401_v17, %v1401_v17 }
 0x112   : > { %v493_v35 = vpop.f32.mrb[13].mxu0  ;;  %v557_v36 = vpop.f32.mrb[13].mxu1  ;;  %v783_v54 = vmul.f32 %v1194_v31, %v1194_v31 }
 0x113   : > { %v743_v37 = vadd.f32 %v742_v32, %v493_v35  ;;  %v781_v38 = vmul.f32 %v493_v35, %v493_v35  ;;  %v811_v39 = vadd.f32 %v810_v30, %v780_v28  ;;  %v1195_v40 = vpop.f32.mrb[14].mxu0  ;;  %v1411_v41 = vpop.f32.mrb[14].mxu1 }
 0x114   : > { %v1083_v42 = vpack.c.bf16 %v1195_v40, %v1194_v31  ;;  %v496_v43 = vpop.f32.mrb[15].mxu0  ;;  %v1123_v44 = vpack.c.bf16 %v1411_v41, %v1409_v33  ;;  %v560_v45 = vpop.f32.mrb[15].mxu1  ;;  %v784_v58 = vmul.f32 %v1195_v40, %v1195_v40 }
 0x115   : > { %v812_v47 = vadd.f32 %v811_v39, %v781_v38  ;;  %v1078_v49 = vpack.c.bf16 %v496_v43, %v493_v35  ;;  %v744_v50 = vadd.f32 %v743_v37, %v496_v43  ;;  %v782_v51 = vmul.f32 %v496_v43, %v496_v43 }
 0x116   : > { %1131 = vst [vmem:[%s1363_s14 + $0x38] sm:$0xff] %v1083_v42   ;;  %1139 = vst [vmem:[%s1363_s14 + $0x78] sm:$0xff] %v1123_v44   ;;  %v1118_v52 = vpack.c.bf16 %v560_v45, %v557_v36  ;;  %v799_v39 = vmul.f32 %v1409_v33, %v1409_v33  ;;  %v800_v42 = vmul.f32 %v1411_v41, %v1411_v41 }
 0x117   : > { %1130 = vst [vmem:[%s1363_s14 + $0x30] sm:$0xff] %v1078_v49   ;;  %v745_v55 = vadd.f32 %v1194_v31, %v744_v50  ;;  %v813_v56 = vadd.f32 %v812_v47, %v782_v51  ;;  %v797_v31 = vmul.f32 %v557_v36, %v557_v36 }
 0x118   : > { %1138 = vst [vmem:[%s1363_s14 + $0x70] sm:$0xff] %v1118_v52  }
 0x119   : > { %v814_v59 = vadd.f32 %v813_v56, %v783_v54  ;;  %v746_v60 = vadd.f32 %v1195_v40, %v745_v55 }
 0x11b   : > { %v747_v62 = vadd.f32 %v746_v60, %v1356_v27  ;;  %v815_v63 = vadd.f32 %v814_v59, %v784_v58  ;;  %v789_v27 = vmul.f32 %v1379_v48, %v1379_v48 }
 0x11d   : > { %v816_v0 = vadd.f32 %v815_v63, %v785_v61  ;;  %v748_v1 = vadd.f32 %v747_v62, %v1369_v34 }
 0x11f   : > { %v749_v4 = vadd.f32 %v1354_v25, %v748_v1  ;;  %v817_v5 = vadd.f32 %v816_v0, %v786_v2  ;;  %v791_v25 = vmul.f32 %v1377_v46, %v1377_v46 }
 0x121   : > { %v818_v9 = vadd.f32 %v817_v5, %v787_v3  ;;  %v750_v10 = vadd.f32 %v1365_v29, %v749_v4  ;;  %v792_v29 = vmul.f32 %v1381_v53, %v1381_v53 }
 0x123   : > { %v751_v11 = vadd.f32 %v750_v10, %v1379_v48  ;;  %v819_v12 = vadd.f32 %v818_v9, %v788_v7  ;;  %v793_v48 = vmul.f32 %v1395_v8, %v1395_v8 }
 0x125   : > { %v820_v14 = vadd.f32 %v819_v12, %v789_v27  ;;  %v752_v34 = vadd.f32 %v751_v11, %v1385_v57 }
 0x127   : > { %v753_v16 = vadd.f32 %v1377_v46, %v752_v34  ;;  %v821_v18 = vadd.f32 %v820_v14, %v790_v15  ;;  %v795_v46 = vmul.f32 %v1393_v6, %v1393_v6 }
 0x129   : > { %v822_v19 = vadd.f32 %v821_v18, %v791_v25  ;;  %v754_v20 = vadd.f32 %v1381_v53, %v753_v16  ;;  %v796_v53 = vmul.f32 %v1397_v13, %v1397_v13 }
 0x12b   : > { %v755_v21 = vadd.f32 %v754_v20, %v1395_v8  ;;  %v823_v22 = vadd.f32 %v822_v19, %v792_v29 }
 0x12d   : > { %v824_v23 = vadd.f32 %v823_v22, %v793_v48  ;;  %v756_v57 = vadd.f32 %v755_v21, %v1401_v17  ;;  %v798_v17 = vmul.f32 %v560_v45, %v560_v45 }
 0x12f   : > { %v757_v26 = vadd.f32 %v1393_v6, %v756_v57  ;;  %v825_v28 = vadd.f32 %v824_v23, %v794_v24 }
 0x131   : > { %v826_v30 = vadd.f32 %v825_v28, %v795_v46  ;;  %v758_v8 = vadd.f32 %v1397_v13, %v757_v26 }
 0x133   : > { %v759_v32 = vadd.f32 %v758_v8, %v557_v36  ;;  %v827_v35 = vadd.f32 %v826_v30, %v796_v53 }
 0x135   : > { %v828_v37 = vadd.f32 %v827_v35, %v797_v31  ;;  %v760_v38 = vadd.f32 %v759_v32, %v560_v45 }
 0x137   : > { %v761_v6 = vadd.f32 %v1409_v33, %v760_v38  ;;  %v829_v40 = vadd.f32 %v828_v37, %v798_v17 }
 0x139   : > { %v762_v43 = vadd.f32 %v1411_v41, %v761_v6  ;;  %v830_v44 = vadd.f32 %v829_v40, %v799_v39 }
 0x13b   : > { %v763_v13 = vrot.slane %v762_v43, 4  ;;  %v831_v47 = vadd.f32 %v830_v44, %v800_v42 }
 0x13d   : > { %v764_v36 = vadd.f32 %v763_v13, %v762_v43  ;;  %v832_v49 = vrot.slane %v831_v47, 4 }
 0x13f   : > { %v765_v50 = vrot.slane %v764_v36, 2  ;;  %v833_v51 = vadd.f32 %v832_v49, %v831_v47 }
 0x141   : > { %v766_v45 = vadd.f32 %v765_v50, %v764_v36  ;;  %v834_v52 = vrot.slane %v833_v51, 2 }
 0x143   : > { %v767_v54 = vrot.slane %v766_v45, 1  ;;  %v835_v55 = vadd.f32 %v834_v52, %v833_v51 }
 0x145   : > { %v768_v33 = vadd.f32 %v767_v54, %v766_v45  ;;  %v836_v56 = vrot.slane %v835_v55, 1 }
 0x147   : > { %v837_v41 = vadd.f32 %v836_v56, %v835_v55  ;;  %838 = vst [vmem:[%s214_s19] sm:$0x1] %v768_v33 }
 0x149   : > { %839 = vst [vmem:[%s217_s22] sm:$0x1] %v837_v41 }
 0x14a PF: > { %s15_s15 = sadd.s32 1, %s1266_s15  }
 0x14b   : > { %p12_p5 = scmp.ge.s32.totalorder %s15_s15, 4  }
 0x14d   :  { %14 = sbr.rel (!%p12_p5) target bundleno = 1 (0x1), region = 82 }

// kernel: a_call__.7
= control target key start
LH: loop header
LB: loop body
LE: loop exit
PB: predicated region body
PF: predicated region fallthrough
CT: control target
= control target key end

     0   :  { %s851_s12 = smov 0   ;;  %s985_s0 = inlined_call_operand.vmem [shape: bf16[512,128], index: 0, kind: input, shape index: {}]   ;;  %s986_s1 = inlined_call_operand.vmem [shape: f32[1,128], index: 1, kind: input, shape index: {}]   ;;  %s987_s2 = inlined_call_operand.vmem [shape: f32[1,128], index: 2, kind: input, shape index: {}]   ;;  %s988_s3 = inlined_call_operand.vmem [shape: bf16[512,128], index: 3, kind: output, shape index: {}]  }
   0x1 LB: > { %s564_s13 = sadd.s32 4294967295, %s829_s12   ;;  %p568_p0 = scmp.ge.s32.totalorder %s829_s12, 1  ;;  %s829_s12 = sphi %s851_s12, %s13_s12  }
   0x2   : > { %p138_p1 = scmp.lt.s32.totalorder %s829_s12, 3 }
   0x4   : > { %p139_p2 = pnand %p568_p0, %p138_p1 }
   0x5   : > { %s569_s14 = sshll.u32 (!%p139_p2), %s564_s13, 5  ;;  %v872_v0 = vld [vmem:[%s986_s1] ss:$0 sm:$0xff] (!%p139_p2) }
   0x6   : > { %142 = sbr.rel (%p139_p2) target bundleno = 59 (0x3b), region = 32  ;;  %p163_p3 = scmp.lt.s32.totalorder (!%p139_p2), %s569_s14, 63  ;;  %v881_v9 = vld [vmem:[%s987_s2] ss:$0 sm:$0xff] (!%p139_p2) }
   0xd   : > { %s990_s14 = smov (!%p163_p3, %s569_s14), 63 }
   0xe   : > { %s570_s15 = sshll.u32 %s990_s14, 2 }
   0xf   : > { %s867_s18 = scalar_lea.vmem %s985_s0, %s570_s15  ;;  %s906_s25 = scalar_lea.vmem %s988_s3, %s570_s15 }
  0x10   : > { %v642_v1 = vld [vmem:[%s867_s18] sm:$0xff]   ;;  %v785_v2 = vld [vmem:[%s867_s18 + $0x8] sm:$0xff]   ;;  %v786_v3 = vld [vmem:[%s867_s18 + $0x10] sm:$0xff]  }
  0x11   : > { %v643_v4 = vunpack.c.l.bf16 %v642_v1  ;;  %v644_v5 = vunpack.c.h.bf16 %v642_v1  ;;  %v647_v6 = vunpack.c.l.bf16 %v785_v2  ;;  %v648_v7 = vunpack.c.h.bf16 %v785_v2  ;;  %v787_v8 = vld [vmem:[%s867_s18 + $0x18] sm:$0xff]   ;;  %v788_v30 = vld [vmem:[%s867_s18 + $0x20] sm:$0xff]   ;;  %v789_v35 = vld [vmem:[%s867_s18 + $0x28] sm:$0xff]  }
  0x12   : > { %v651_v10 = vunpack.c.l.bf16 %v786_v3  ;;  %v652_v11 = vunpack.c.h.bf16 %v786_v3  ;;  %v655_v12 = vunpack.c.l.bf16 %v787_v8  ;;  %v656_v13 = vunpack.c.h.bf16 %v787_v8  ;;  %v790_v40 = vld [vmem:[%s867_s18 + $0x30] sm:$0xff]   ;;  %v791_v45 = vld [vmem:[%s867_s18 + $0x38] sm:$0xff]   ;;  %v792_v3 = vld [vmem:[%s867_s18 + $0x40] sm:$0xff]  }
  0x13   : > { %v245_v14 = vmul.f32 %v643_v4, %v872_v0  ;;  %v246_v15 = vmul.f32 %v644_v5, %v872_v0  ;;  %v247_v16 = vmul.f32 %v647_v6, %v872_v0  ;;  %v248_v17 = vmul.f32 %v648_v7, %v872_v0 }
  0x14   : > { %v249_v18 = vmul.f32 %v651_v10, %v872_v0  ;;  %v250_v19 = vmul.f32 %v652_v11, %v872_v0  ;;  %v251_v20 = vmul.f32 %v655_v12, %v872_v0  ;;  %v252_v21 = vmul.f32 %v656_v13, %v872_v0  ;;  %v793_v13 = vld [vmem:[%s867_s18 + $0x48] sm:$0xff]  }
  0x15   : > { %v284_v22 = vadd.f32 %v881_v9, %v245_v14  ;;  %v285_v23 = vadd.f32 %v881_v9, %v246_v15  ;;  %v286_v24 = vadd.f32 %v881_v9, %v247_v16  ;;  %v287_v25 = vadd.f32 %v881_v9, %v248_v17 }
  0x16   : > { %v288_v26 = vadd.f32 %v881_v9, %v249_v18  ;;  %v289_v27 = vadd.f32 %v881_v9, %v250_v19  ;;  %v290_v28 = vadd.f32 %v881_v9, %v251_v20  ;;  %v291_v29 = vadd.f32 %v881_v9, %v252_v21  ;;  %v794_v18 = vld [vmem:[%s867_s18 + $0x50] sm:$0xff]  }
  0x17   : > { %v316_v31 = vmax.f32 %v284_v22, 0.0  ;;  %v317_v32 = vmax.f32 %v285_v23, 0.0  ;;  %v318_v33 = vmax.f32 %v286_v24, 0.0  ;;  %v319_v34 = vmax.f32 %v287_v25, 0.0  ;;  %v795_v23 = vld [vmem:[%s867_s18 + $0x58] sm:$0xff]  }
  0x18   : > { %v320_v36 = vmax.f32 %v288_v26, 0.0  ;;  %v321_v37 = vmax.f32 %v289_v27, 0.0  ;;  %v322_v38 = vmax.f32 %v290_v28, 0.0  ;;  %v323_v39 = vmax.f32 %v291_v29, 0.0 }
  0x19   : > { %v708_v41 = vpack.c.bf16 %v317_v32, %v316_v31  ;;  %v713_v42 = vpack.c.bf16 %v319_v34, %v318_v33  ;;  %v659_v43 = vunpack.c.l.bf16 %v788_v30  ;;  %v660_v44 = vunpack.c.h.bf16 %v788_v30 }
  0x1a   : > { %v718_v46 = vpack.c.bf16 %v321_v37, %v320_v36  ;;  %v723_v47 = vpack.c.bf16 %v323_v39, %v322_v38  ;;  %v663_v48 = vunpack.c.l.bf16 %v789_v35  ;;  %v664_v49 = vunpack.c.h.bf16 %v789_v35 }
  0x1b   : > { %709 = vst [vmem:[%s906_s25] sm:$0xff] %v708_v41   ;;  %800 = vst [vmem:[%s906_s25 + $0x8] sm:$0xff] %v713_v42   ;;  %v253_v50 = vmul.f32 %v659_v43, %v872_v0  ;;  %v254_v51 = vmul.f32 %v660_v44, %v872_v0  ;;  %v667_v52 = vunpack.c.l.bf16 %v790_v40  ;;  %v668_v53 = vunpack.c.h.bf16 %v790_v40  ;;  %v796_v40 = vld [vmem:[%s867_s18 + $0x60] sm:$0xff]  }
  0x1c   : > { %801 = vst [vmem:[%s906_s25 + $0x10] sm:$0xff] %v718_v46   ;;  %802 = vst [vmem:[%s906_s25 + $0x18] sm:$0xff] %v723_v47   ;;  %v255_v54 = vmul.f32 %v663_v48, %v872_v0  ;;  %v256_v55 = vmul.f32 %v664_v49, %v872_v0  ;;  %v671_v56 = vunpack.c.l.bf16 %v791_v45  ;;  %v672_v57 = vunpack.c.h.bf16 %v791_v45 }
  0x1d   : > { %v292_v58 = vadd.f32 %v881_v9, %v253_v50  ;;  %v293_v59 = vadd.f32 %v881_v9, %v254_v51  ;;  %v257_v60 = vmul.f32 %v667_v52, %v872_v0  ;;  %v258_v61 = vmul.f32 %v668_v53, %v872_v0  ;;  %v797_v53 = vld [vmem:[%s867_s18 + $0x68] sm:$0xff]  }
  0x1e   : > { %v294_v62 = vadd.f32 %v881_v9, %v255_v54  ;;  %v295_v63 = vadd.f32 %v881_v9, %v256_v55  ;;  %v259_v1 = vmul.f32 %v671_v56, %v872_v0  ;;  %v260_v2 = vmul.f32 %v672_v57, %v872_v0 }
  0x1f   : > { %v324_v4 = vmax.f32 %v292_v58, 0.0  ;;  %v325_v5 = vmax.f32 %v293_v59, 0.0  ;;  %v296_v6 = vadd.f32 %v881_v9, %v257_v60  ;;  %v297_v7 = vadd.f32 %v881_v9, %v258_v61  ;;  %v798_v58 = vld [vmem:[%s867_s18 + $0x70] sm:$0xff]  }
  0x20   : > { %v326_v8 = vmax.f32 %v294_v62, 0.0  ;;  %v327_v10 = vmax.f32 %v295_v63, 0.0  ;;  %v298_v11 = vadd.f32 %v881_v9, %v259_v1  ;;  %v299_v12 = vadd.f32 %v881_v9, %v260_v2  ;;  %v799_v63 = vld [vmem:[%s867_s18 + $0x78] sm:$0xff]  }
  0x21   : > { %v728_v14 = vpack.c.bf16 %v325_v5, %v324_v4  ;;  %v328_v15 = vmax.f32 %v296_v6, 0.0  ;;  %v329_v16 = vmax.f32 %v297_v7, 0.0  ;;  %v675_v17 = vunpack.c.l.bf16 %v792_v3 }
  0x22   : > { %v733_v19 = vpack.c.bf16 %v327_v10, %v326_v8  ;;  %v330_v20 = vmax.f32 %v298_v11, 0.0  ;;  %v331_v21 = vmax.f32 %v299_v12, 0.0  ;;  %v676_v22 = vunpack.c.h.bf16 %v792_v3 }
  0x23   : > { %803 = vst [vmem:[%s906_s25 + $0x20] sm:$0xff] %v728_v14   ;;  %v738_v24 = vpack.c.bf16 %v329_v16, %v328_v15  ;;  %v261_v25 = vmul.f32 %v675_v17, %v872_v0  ;;  %v679_v26 = vunpack.c.l.bf16 %v793_v13  ;;  %v680_v27 = vunpack.c.h.bf16 %v793_v13 }
  0x24   : > { %804 = vst [vmem:[%s906_s25 + $0x28] sm:$0xff] %v733_v19   ;;  %v743_v28 = vpack.c.bf16 %v331_v21, %v330_v20  ;;  %v262_v29 = vmul.f32 %v676_v22, %v872_v0  ;;  %v683_v30 = vunpack.c.l.bf16 %v794_v18  ;;  %v684_v31 = vunpack.c.h.bf16 %v794_v18 }
  0x25   : > { %805 = vst [vmem:[%s906_s25 + $0x30] sm:$0xff] %v738_v24   ;;  %v300_v32 = vadd.f32 %v881_v9, %v261_v25  ;;  %v263_v33 = vmul.f32 %v679_v26, %v872_v0  ;;  %v264_v34 = vmul.f32 %v680_v27, %v872_v0  ;;  %v687_v35 = vunpack.c.l.bf16 %v795_v23 }
  0x26   : > { %806 = vst [vmem:[%s906_s25 + $0x38] sm:$0xff] %v743_v28   ;;  %v301_v36 = vadd.f32 %v881_v9, %v262_v29  ;;  %v265_v37 = vmul.f32 %v683_v30, %v872_v0  ;;  %v266_v38 = vmul.f32 %v684_v31, %v872_v0  ;;  %v688_v39 = vunpack.c.h.bf16 %v795_v23 }
  0x27   : > { %v332_v41 = vmax.f32 %v300_v32, 0.0  ;;  %v302_v42 = vadd.f32 %v881_v9, %v263_v33  ;;  %v303_v43 = vadd.f32 %v881_v9, %v264_v34  ;;  %v267_v44 = vmul.f32 %v687_v35, %v872_v0 }
  0x28   : > { %v333_v45 = vmax.f32 %v301_v36, 0.0  ;;  %v304_v46 = vadd.f32 %v881_v9, %v265_v37  ;;  %v305_v47 = vadd.f32 %v881_v9, %v266_v38  ;;  %v268_v48 = vmul.f32 %v688_v39, %v872_v0 }
  0x29   : > { %v334_v49 = vmax.f32 %v302_v42, 0.0  ;;  %v335_v50 = vmax.f32 %v303_v43, 0.0  ;;  %v306_v51 = vadd.f32 %v881_v9, %v267_v44  ;;  %v691_v52 = vunpack.c.l.bf16 %v796_v40 }
  0x2a   : > { %v748_v54 = vpack.c.bf16 %v333_v45, %v332_v41  ;;  %v336_v55 = vmax.f32 %v304_v46, 0.0  ;;  %v337_v56 = vmax.f32 %v305_v47, 0.0  ;;  %v307_v57 = vadd.f32 %v881_v9, %v268_v48 }
  0x2b   : > { %v753_v59 = vpack.c.bf16 %v335_v50, %v334_v49  ;;  %v338_v60 = vmax.f32 %v306_v51, 0.0  ;;  %v692_v61 = vunpack.c.h.bf16 %v796_v40  ;;  %v269_v62 = vmul.f32 %v691_v52, %v872_v0 }
  0x2c   : > { %807 = vst [vmem:[%s906_s25 + $0x40] sm:$0xff] %v748_v54   ;;  %v758_v1 = vpack.c.bf16 %v337_v56, %v336_v55  ;;  %v339_v2 = vmax.f32 %v307_v57, 0.0  ;;  %v695_v3 = vunpack.c.l.bf16 %v797_v53  ;;  %v696_v4 = vunpack.c.h.bf16 %v797_v53 }
  0x2d   : > { %808 = vst [vmem:[%s906_s25 + $0x48] sm:$0xff] %v753_v59   ;;  %v270_v5 = vmul.f32 %v692_v61, %v872_v0  ;;  %v308_v6 = vadd.f32 %v881_v9, %v269_v62  ;;  %v699_v7 = vunpack.c.l.bf16 %v798_v58  ;;  %v700_v8 = vunpack.c.h.bf16 %v798_v58 }
  0x2e   : > { %809 = vst [vmem:[%s906_s25 + $0x50] sm:$0xff] %v758_v1   ;;  %v763_v10 = vpack.c.bf16 %v339_v2, %v338_v60  ;;  %v271_v11 = vmul.f32 %v695_v3, %v872_v0  ;;  %v272_v12 = vmul.f32 %v696_v4, %v872_v0  ;;  %v703_v13 = vunpack.c.l.bf16 %v799_v63 }
  0x2f   : > { %v309_v14 = vadd.f32 %v881_v9, %v270_v5  ;;  %v340_v15 = vmax.f32 %v308_v6, 0.0  ;;  %v273_v16 = vmul.f32 %v699_v7, %v872_v0  ;;  %v274_v17 = vmul.f32 %v700_v8, %v872_v0 }
  0x30   : > { %810 = vst [vmem:[%s906_s25 + $0x58] sm:$0xff] %v763_v10   ;;  %v310_v18 = vadd.f32 %v881_v9, %v271_v11  ;;  %v311_v19 = vadd.f32 %v881_v9, %v272_v12  ;;  %v704_v20 = vunpack.c.h.bf16 %v799_v63  ;;  %v275_v21 = vmul.f32 %v703_v13, %v872_v0 }
  0x31   : > { %v341_v22 = vmax.f32 %v309_v14, 0.0  ;;  %v312_v23 = vadd.f32 %v881_v9, %v273_v16  ;;  %v313_v24 = vadd.f32 %v881_v9, %v274_v17 }
  0x32   : > { %v342_v25 = vmax.f32 %v310_v18, 0.0  ;;  %v343_v26 = vmax.f32 %v311_v19, 0.0  ;;  %v276_v27 = vmul.f32 %v704_v20, %v872_v0  ;;  %v314_v28 = vadd.f32 %v881_v9, %v275_v21 }
  0x33   : > { %v768_v29 = vpack.c.bf16 %v341_v22, %v340_v15  ;;  %v344_v30 = vmax.f32 %v312_v23, 0.0  ;;  %v345_v31 = vmax.f32 %v313_v24, 0.0 }
  0x34   : > { %v773_v32 = vpack.c.bf16 %v343_v26, %v342_v25  ;;  %v315_v33 = vadd.f32 %v881_v9, %v276_v27  ;;  %v346_v34 = vmax.f32 %v314_v28, 0.0 }
  0x35   : > { %811 = vst [vmem:[%s906_s25 + $0x60] sm:$0xff] %v768_v29   ;;  %v778_v35 = vpack.c.bf16 %v345_v31, %v344_v30 }
  0x36   : > { %812 = vst [vmem:[%s906_s25 + $0x68] sm:$0xff] %v773_v32   ;;  %v347_v36 = vmax.f32 %v315_v33, 0.0 }
  0x37   : > { %813 = vst [vmem:[%s906_s25 + $0x70] sm:$0xff] %v778_v35  }
  0x38   : > { %v783_v37 = vpack.c.bf16 %v347_v36, %v346_v34 }
  0x3a   : > { %814 = vst [vmem:[%s906_s25 + $0x78] sm:$0xff] %v783_v37  }
  0x3b PF: > { %s13_s12 = sadd.s32 1, %s829_s12  }
  0x3c   : > { %p10_p4 = scmp.ge.s32.totalorder %s13_s12, 4  }
  0x3e   :  { %12 = sbr.rel (!%p10_p4) target bundleno = 1 (0x1), region = 62 }

// kernel: a_call__.11
= control target key start
LH: loop header
LB: loop body
LE: loop exit
PB: predicated region body
PF: predicated region fallthrough
CT: control target
= control target key end

     0   :  { %s535_s0 = inlined_call_operand.vmem [shape: bf16[128,128], index: 0, kind: input, shape index: {}]   ;;  %s536_s1 = inlined_call_operand.vmem [shape: f32[1,128], index: 1, kind: input, shape index: {}]   ;;  %s537_s2 = inlined_call_operand.vmem [shape: f32[1,128], index: 2, kind: input, shape index: {}]   ;;  %s538_s3 = inlined_call_operand.vmem [shape: bf16[128,128], index: 3, kind: input, shape index: {}]   ;;  %s539_s4 = inlined_call_operand.vmem [shape: f32[1,128], index: 4, kind: input, shape index: {}]   ;;  %s540_s5 = inlined_call_operand.vmem [shape: f32[1,128], index: 5, kind: input, shape index: {}]   ;;  %s541_s6 = inlined_call_operand.hbm [shape: f32[128,128], index: 6, kind: output, shape index: {}]  }
   0x1   :  { %v249_v0 = vld [vmem:[%s535_s0] sm:$0xff]   ;;  %v312_v9 = vld [vmem:[%s535_s0 + $0x8] sm:$0xff]   ;;  %v313_v20 = vld [vmem:[%s535_s0 + $0x10] sm:$0xff]  }
   0x2   :  { %v397_v1 = vld [vmem:[%s536_s1] ss:$0 sm:$0xff]  ;;  %v250_v2 = vunpack.c.l.bf16 %v249_v0  ;;  %v251_v5 = vunpack.c.h.bf16 %v249_v0  ;;  %v319_v10 = vld [vmem:[%s538_s3 + $0x8] sm:$0xff]   ;;  %v254_v14 = vunpack.c.l.bf16 %v312_v9  ;;  %v255_v18 = vunpack.c.h.bf16 %v312_v9  ;;  %v320_v21 = vld [vmem:[%s538_s3 + $0x10] sm:$0xff]  }
   0x3   :  { %v281_v3 = vld [vmem:[%s538_s3] sm:$0xff]   ;;  %v286_v15 = vunpack.c.l.bf16 %v319_v10  ;;  %v287_v19 = vunpack.c.h.bf16 %v319_v10 }
   0x4   :  { %v405_v4 = vld [vmem:[%s539_s4] ss:$0 sm:$0xff]  ;;  %v282_v7 = vunpack.c.l.bf16 %v281_v3  ;;  %v283_v8 = vunpack.c.h.bf16 %v281_v3  ;;  %v63_v11 = vmul.f32 %v250_v2, %v397_v1  ;;  %v64_v13 = vmul.f32 %v251_v5, %v397_v1 }
   0x5   :  { %v410_v6 = vld [vmem:[%s537_s2] ss:$0 sm:$0xff]  ;;  %v65_v24 = vmul.f32 %v254_v14, %v397_v1  ;;  %v143_v25 = vmul.f32 %v286_v15, %v405_v4  ;;  %v66_v28 = vmul.f32 %v255_v18, %v397_v1  ;;  %v144_v29 = vmul.f32 %v287_v19, %v405_v4 }
   0x6   :  { %v422_v12 = vld [vmem:[%s540_s5] ss:$0 sm:$0xff]  ;;  %v141_v16 = vmul.f32 %v282_v7, %v405_v4  ;;  %v142_v17 = vmul.f32 %v283_v8, %v405_v4  ;;  %v86_v22 = vadd.f32 %v410_v6, %v63_v11  ;;  %v87_v23 = vadd.f32 %v410_v6, %v64_v13 }
   0x8   :  { %v164_v26 = vadd.f32 %v422_v12, %v141_v16  ;;  %v165_v27 = vadd.f32 %v422_v12, %v142_v17 }
   0x9   :  { %11 = vsyncpa [#allocation3], 0  ;;  %v88_v30 = vadd.f32 %v410_v6, %v65_v24  ;;  %v166_v31 = vadd.f32 %v422_v12, %v143_v25  ;;  %v258_v32 = vunpack.c.l.bf16 %v313_v20  ;;  %v290_v33 = vunpack.c.l.bf16 %v320_v21  ;;  %v314_v42 = vld [vmem:[%s535_s0 + $0x18] sm:$0xff]   ;;  %v315_v52 = vld [vmem:[%s535_s0 + $0x20] sm:$0xff]  }
   0xa   :  { %v180_v34 = vadd.f32 %v164_v26, %v86_v22  ;;  %v181_v35 = vadd.f32 %v165_v27, %v87_v23  ;;  %v89_v36 = vadd.f32 %v410_v6, %v66_v28  ;;  %v167_v37 = vadd.f32 %v422_v12, %v144_v29  ;;  %v321_v43 = vld [vmem:[%s538_s3 + $0x18] sm:$0xff]   ;;  %v322_v57 = vld [vmem:[%s538_s3 + $0x20] sm:$0xff]   ;;  %v316_v14 = vld [vmem:[%s535_s0 + $0x28] sm:$0xff]  }
   0xb   :  { %v182_v38 = vadd.f32 %v166_v31, %v88_v30  ;;  %v67_v39 = vmul.f32 %v258_v32, %v397_v1  ;;  %v145_v40 = vmul.f32 %v290_v33, %v405_v4  ;;  %v259_v41 = vunpack.c.h.bf16 %v313_v20  ;;  %v323_v19 = vld [vmem:[%s538_s3 + $0x28] sm:$0xff]   ;;  %v317_v32 = vld [vmem:[%s535_s0 + $0x30] sm:$0xff]  }
   0xc   :  { %v196_v44 = vmax.f32 %v180_v34, 0.0  ;;  %v197_v45 = vmax.f32 %v181_v35, 0.0  ;;  %v183_v46 = vadd.f32 %v167_v37, %v89_v36  ;;  %v291_v47 = vunpack.c.h.bf16 %v320_v21  ;;  %v324_v33 = vld [vmem:[%s538_s3 + $0x30] sm:$0xff]  }
   0xd   :  { %v198_v48 = vmax.f32 %v182_v38, 0.0  ;;  %v90_v49 = vadd.f32 %v410_v6, %v67_v39  ;;  %v168_v50 = vadd.f32 %v422_v12, %v145_v40  ;;  %v68_v51 = vmul.f32 %v259_v41, %v397_v1 }
   0xe   :  { %212 = vst [vmem:[#allocation2] sm:$0xff] %v196_v44  ;;  %213 = vst [vmem:[#allocation2 + $0x8] sm:$0xff] %v197_v45  ;;  %v199_v53 = vmax.f32 %v183_v46, 0.0  ;;  %v146_v54 = vmul.f32 %v291_v47, %v405_v4  ;;  %v262_v55 = vunpack.c.l.bf16 %v314_v42  ;;  %v294_v56 = vunpack.c.l.bf16 %v321_v43  ;;  %v318_v46 = vld [vmem:[%s535_s0 + $0x38] sm:$0xff]   ;;  %s353_s0 = smov [#allocation2]  }
   0xf   :  { %214 = vst [vmem:[#allocation2 + $0x10] sm:$0xff] %v198_v48  ;;  %v184_v58 = vadd.f32 %v168_v50, %v90_v49  ;;  %v91_v59 = vadd.f32 %v410_v6, %v68_v51  ;;  %v263_v60 = vunpack.c.h.bf16 %v314_v42  ;;  %v295_v61 = vunpack.c.h.bf16 %v321_v43 }
  0x10   :  { %215 = vst [vmem:[#allocation2 + $0x18] sm:$0xff] %v199_v53  ;;  %v169_v62 = vadd.f32 %v422_v12, %v146_v54  ;;  %v69_v63 = vmul.f32 %v262_v55, %v397_v1  ;;  %v147_v0 = vmul.f32 %v294_v56, %v405_v4  ;;  %v266_v2 = vunpack.c.l.bf16 %v315_v52  ;;  %v325_v55 = vld [vmem:[%s538_s3 + $0x38] sm:$0xff]   ;;  %s233_s3 = sshll.u32 %s353_s0, 4  ;;  %s234_s3 = int_to_ptr.vmem [resolvable:$true] %s233_s3 }
  0x11   :  { %v200_v3 = vmax.f32 %v184_v58, 0.0  ;;  %v70_v5 = vmul.f32 %v263_v60, %v397_v1  ;;  %v148_v7 = vmul.f32 %v295_v61, %v405_v4  ;;  %v298_v8 = vunpack.c.l.bf16 %v322_v57  ;;  %s329_s8 = scalar_lea.vmem %s234_s3, 2048  ;;  %p334_p1 = scmp.lt.s32.totalorder %s234_s3, %s234_s3 }
  0x12   :  { %v185_v9 = vadd.f32 %v169_v62, %v91_v59  ;;  %v92_v10 = vadd.f32 %v410_v6, %v69_v63  ;;  %v170_v11 = vadd.f32 %v422_v12, %v147_v0  ;;  %v71_v13 = vmul.f32 %v266_v2, %v397_v1  ;;  %p330_p0 = scmp.ne.s32.totalorder %s234_s3, %s329_s8  ;;  %p335_p2 = scmp.lt.s32.totalorder %s329_s8, %s329_s8 }
  0x13   :  { %216 = vst [vmem:[#allocation2 + $0x20] sm:$0xff] %v200_v3  ;;  %v93_v15 = vadd.f32 %v410_v6, %v70_v5  ;;  %v171_v16 = vadd.f32 %v422_v12, %v148_v7  ;;  %v149_v17 = vmul.f32 %v298_v8, %v405_v4  ;;  %v267_v18 = vunpack.c.h.bf16 %v315_v52 }
  0x14   :  { %v201_v20 = vmax.f32 %v185_v9, 0.0  ;;  %v186_v21 = vadd.f32 %v170_v11, %v92_v10  ;;  %v94_v22 = vadd.f32 %v410_v6, %v71_v13  ;;  %v299_v23 = vunpack.c.h.bf16 %v322_v57  ;;  %p336_p3 = por %p335_p2, %p334_p1 }
  0x15   :  { %v187_v24 = vadd.f32 %v171_v16, %v93_v15  ;;  %v172_v25 = vadd.f32 %v422_v12, %v149_v17  ;;  %v72_v26 = vmul.f32 %v267_v18, %v397_v1  ;;  %v270_v27 = vunpack.c.l.bf16 %v316_v14 }
  0x16   :  { %217 = vst [vmem:[#allocation2 + $0x28] sm:$0xff] %v201_v20  ;;  %v202_v28 = vmax.f32 %v186_v21, 0.0  ;;  %v150_v29 = vmul.f32 %v299_v23, %v405_v4  ;;  %v302_v30 = vunpack.c.l.bf16 %v323_v19  ;;  %v271_v31 = vunpack.c.h.bf16 %v316_v14  ;;  %p337_p4 = pnand %p336_p3, %p330_p0 }
  0x17   :  { %v203_v34 = vmax.f32 %v187_v24, 0.0  ;;  %v188_v35 = vadd.f32 %v172_v25, %v94_v22  ;;  %v95_v36 = vadd.f32 %v410_v6, %v72_v26  ;;  %v73_v37 = vmul.f32 %v270_v27, %v397_v1 }
  0x18   :  { %218 = vst [vmem:[#allocation2 + $0x30] sm:$0xff] %v202_v28  ;;  %v173_v38 = vadd.f32 %v422_v12, %v150_v29  ;;  %v151_v39 = vmul.f32 %v302_v30, %v405_v4  ;;  %v74_v40 = vmul.f32 %v271_v31, %v397_v1  ;;  %v303_v41 = vunpack.c.h.bf16 %v323_v19 }
  0x19   :  { %219 = vst [vmem:[#allocation2 + $0x38] sm:$0xff] %v203_v34  ;;  %v204_v42 = vmax.f32 %v188_v35, 0.0  ;;  %v96_v43 = vadd.f32 %v410_v6, %v73_v37  ;;  %v274_v44 = vunpack.c.l.bf16 %v317_v32  ;;  %v306_v45 = vunpack.c.l.bf16 %v324_v33 }
  0x1a   :  { %v189_v47 = vadd.f32 %v173_v38, %v95_v36  ;;  %v174_v48 = vadd.f32 %v422_v12, %v151_v39  ;;  %v97_v49 = vadd.f32 %v410_v6, %v74_v40  ;;  %v152_v50 = vmul.f32 %v303_v41, %v405_v4 }
  0x1b   :  { %220 = vst [vmem:[#allocation2 + $0x40] sm:$0xff] %v204_v42  ;;  %v75_v51 = vmul.f32 %v274_v44, %v397_v1  ;;  %v153_v52 = vmul.f32 %v306_v45, %v405_v4  ;;  %v275_v53 = vunpack.c.h.bf16 %v317_v32  ;;  %v307_v54 = vunpack.c.h.bf16 %v324_v33 }
  0x1c   :  { %v205_v56 = vmax.f32 %v189_v47, 0.0  ;;  %v190_v57 = vadd.f32 %v174_v48, %v96_v43  ;;  %v175_v58 = vadd.f32 %v422_v12, %v152_v50  ;;  %v278_v59 = vunpack.c.l.bf16 %v318_v46 }
  0x1d   :  { %v98_v60 = vadd.f32 %v410_v6, %v75_v51  ;;  %v176_v61 = vadd.f32 %v422_v12, %v153_v52  ;;  %v76_v62 = vmul.f32 %v275_v53, %v397_v1  ;;  %v154_v63 = vmul.f32 %v307_v54, %v405_v4 }
  0x1e   :  { %221 = vst [vmem:[#allocation2 + $0x48] sm:$0xff] %v205_v56  ;;  %v206_v0 = vmax.f32 %v190_v57, 0.0  ;;  %v191_v2 = vadd.f32 %v175_v58, %v97_v49  ;;  %v77_v3 = vmul.f32 %v278_v59, %v397_v1  ;;  %v310_v5 = vunpack.c.l.bf16 %v325_v55 }
  0x1f   :  { %v192_v7 = vadd.f32 %v176_v61, %v98_v60  ;;  %v99_v8 = vadd.f32 %v410_v6, %v76_v62  ;;  %v177_v9 = vadd.f32 %v422_v12, %v154_v63  ;;  %v279_v10 = vunpack.c.h.bf16 %v318_v46 }
  0x20   :  { %222 = vst [vmem:[#allocation2 + $0x50] sm:$0xff] %v206_v0  ;;  %v207_v11 = vmax.f32 %v191_v2, 0.0  ;;  %v100_v13 = vadd.f32 %v410_v6, %v77_v3  ;;  %v155_v14 = vmul.f32 %v310_v5, %v405_v4  ;;  %v311_v15 = vunpack.c.h.bf16 %v325_v55 }
  0x21   :  { %v208_v16 = vmax.f32 %v192_v7, 0.0  ;;  %v193_v17 = vadd.f32 %v177_v9, %v99_v8  ;;  %v78_v18 = vmul.f32 %v279_v10, %v397_v1 }
  0x22   :  { %223 = vst [vmem:[#allocation2 + $0x58] sm:$0xff] %v207_v11  ;;  %v178_v19 = vadd.f32 %v422_v12, %v155_v14  ;;  %v156_v20 = vmul.f32 %v311_v15, %v405_v4 }
  0x23   :  { %224 = vst [vmem:[#allocation2 + $0x60] sm:$0xff] %v208_v16  ;;  %v209_v21 = vmax.f32 %v193_v17, 0.0  ;;  %v101_v22 = vadd.f32 %v410_v6, %v78_v18 }
  0x24   :  { %v194_v23 = vadd.f32 %v178_v19, %v100_v13  ;;  %v179_v24 = vadd.f32 %v422_v12, %v156_v20 }
  0x25   :  { %225 = vst [vmem:[#allocation2 + $0x68] sm:$0xff] %v209_v21 }
  0x26   :  { %v210_v25 = vmax.f32 %v194_v23, 0.0  ;;  %v195_v26 = vadd.f32 %v179_v24, %v101_v22 }
  0x28   :  { %226 = vst [vmem:[#allocation2 + $0x70] sm:$0xff] %v210_v25  ;;  %v211_v1 = vmax.f32 %v195_v26, 0.0 }
  0x2a   :  { %227 = vst [vmem:[#allocation2 + $0x78] sm:$0xff] %v211_v1 }
  0x2b   :  { %340 = shalt.err (!%p337_p4)
}
  0x2c   :  { %s341_s10 = scalar_lea.hbm %s541_s6, 2048 }
  0x2d   :  { %p342_p5 = scmp.ne.s32.totalorder %s541_s6, %s341_s10  ;;  %p345_p6 = scmp.lt.u32.totalorder %s341_s10, %s541_s6 }
  0x2f   :  { %p347_p7 = pnand %p345_p6, %p342_p5 }
  0x31   :  { %350 = shalt.err (!%p347_p7)
}
  0x32   :  { %s354_s5 = smov 128   ;;  %s355_s14 = smov 8  }
  0x33   :  { %239 = dma.vmem_to_hbm [thread:$0]  %s234_s3, 2048, %s541_s6, [#allocation3], %s354_s5, %s354_s5, %s355_s14  }
  0x34   :  { %351 = dma.done.wait [#allocation3], 2048  }
  0x35   :  { %352 = vsyncadd [#allocation3], 4294965248 }
  0x36   :  { %243 = vsyncpa [#allocation3], 1 }

// kernel: a_call__.9
= control target key start
LH: loop header
LB: loop body
LE: loop exit
PB: predicated region body
PF: predicated region fallthrough
CT: control target
= control target key end

     0   :  { %s791_s1 = inlined_call_operand.vmem [shape: bf16[128,128], index: 1, kind: input, shape index: {}]   ;;  %s792_s0 = inlined_call_operand.vmem [shape: bf16[128,128], index: 0, kind: input, shape index: {}]   ;;  %s793_s2 = inlined_call_operand.vmem [shape: f32[1,128], index: 2, kind: input, shape index: {}]   ;;  %s794_s3 = inlined_call_operand.vmem [shape: f32[1,128], index: 3, kind: input, shape index: {}]   ;;  %s795_s4 = inlined_call_operand.vmem [shape: bf16[128,128], index: 4, kind: output, shape index: {0}]   ;;  %s796_s5 = inlined_call_operand.vmem [shape: f32[1,1,128], index: 5, kind: output, shape index: {1}]   ;;  %s797_s6 = inlined_call_operand.vmem [shape: f32[1,1,128], index: 6, kind: output, shape index: {2}]  }
   0x1   :  { %v628_v0 = vld [vmem:[%s791_s1] sm:$0xff]   ;;  %v629_v1 = vld [vmem:[%s791_s1 + $0x8] sm:$0xff]   ;;  %v630_v2 = vld [vmem:[%s791_s1 + $0x10] sm:$0xff]  }
   0x2   :  { %580 = vmatprep.subr.bf16.mxu0 %v628_v0  ;;  %612 = vmatprep.subr.bf16.mxu1 %v628_v0  ;;  %v631_v3 = vld [vmem:[%s791_s1 + $0x18] sm:$0xff]   ;;  %v479_v4 = vld [vmem:[%s792_s0] sm:$0xff]   ;;  %v550_v8 = vld [vmem:[%s792_s0 + $0x8] sm:$0xff]  }
   0x3   :  { %581 = vmatpush3.bf16.msra.mxu0 %v628_v0  ;;  %620 = vmatpush3.bf16.msra.mxu1 %v628_v0  ;;  %v689_v5 = vld [vmem:[%s793_s2] ss:$0 sm:$0xff]  ;;  %v480_v6 = vunpack.c.l.bf16 %v479_v4  ;;  %v481_v7 = vunpack.c.h.bf16 %v479_v4  ;;  %v551_v9 = vld [vmem:[%s792_s0 + $0x10] sm:$0xff]   ;;  %v484_v11 = vunpack.c.l.bf16 %v550_v8  ;;  %v485_v14 = vunpack.c.h.bf16 %v550_v8  ;;  %v552_v22 = vld [vmem:[%s792_s0 + $0x18] sm:$0xff]  }
   0x4   :  { %582 = vmatprep.subr.bf16.mxu0 %v629_v1  ;;  %613 = vmatprep.subr.bf16.mxu1 %v629_v1  ;;  %v700_v10 = vld [vmem:[%s794_s3] ss:$0 sm:$0xff]  ;;  %v488_v17 = vunpack.c.l.bf16 %v551_v9  ;;  %v489_v21 = vunpack.c.h.bf16 %v551_v9  ;;  %v554_v27 = vld [vmem:[%s792_s0 + $0x28] sm:$0xff]   ;;  %v555_v30 = vld [vmem:[%s792_s0 + $0x30] sm:$0xff]   ;;  %v492_v32 = vunpack.c.l.bf16 %v552_v22  ;;  %v493_v33 = vunpack.c.h.bf16 %v552_v22 }
   0x5   :  { %v60_v12 = vmul.f32 %v480_v6, %v689_v5  ;;  %v61_v13 = vmul.f32 %v481_v7, %v689_v5  ;;  %v553_v15 = vld [vmem:[%s792_s0 + $0x20] sm:$0xff]   ;;  %v62_v20 = vmul.f32 %v484_v11, %v689_v5  ;;  %v63_v26 = vmul.f32 %v485_v14, %v689_v5  ;;  %v633_v28 = vld [vmem:[%s791_s1 + $0x28] sm:$0xff]   ;;  %v556_v39 = vld [vmem:[%s792_s0 + $0x38] sm:$0xff]  }
   0x6   :  { %v632_v16 = vld [vmem:[%s791_s1 + $0x20] sm:$0xff]   ;;  %v496_v23 = vunpack.c.l.bf16 %v553_v15  ;;  %v64_v29 = vmul.f32 %v488_v17, %v689_v5  ;;  %v497_v34 = vunpack.c.h.bf16 %v553_v15  ;;  %v65_v36 = vmul.f32 %v489_v21, %v689_v5  ;;  %v634_v44 = vld [vmem:[%s791_s1 + $0x30] sm:$0xff]   ;;  %v635_v61 = vld [vmem:[%s791_s1 + $0x38] sm:$0xff]  }
   0x7   :  { %583 = vmatpush3.bf16.msra.mxu0 %v629_v1  ;;  %621 = vmatpush3.bf16.msra.mxu1 %v629_v1  ;;  %v83_v18 = vadd.f32 %v700_v10, %v60_v12  ;;  %v84_v19 = vadd.f32 %v700_v10, %v61_v13  ;;  %v85_v35 = vadd.f32 %v700_v10, %v62_v20  ;;  %v500_v38 = vunpack.c.l.bf16 %v554_v27 }
   0x8   :  { %584 = vmatprep.subr.bf16.mxu0 %v630_v2  ;;  %614 = vmatprep.subr.bf16.mxu1 %v630_v2  ;;  %v68_v37 = vmul.f32 %v496_v23, %v689_v5  ;;  %v86_v40 = vadd.f32 %v700_v10, %v63_v26  ;;  %v69_v41 = vmul.f32 %v497_v34, %v689_v5  ;;  %v501_v42 = vunpack.c.h.bf16 %v554_v27 }
   0x9   :  { %v99_v24 = vmax.f32 %v83_v18, 0.0  ;;  %v100_v25 = vmax.f32 %v84_v19, 0.0  ;;  %v504_v43 = vunpack.c.l.bf16 %v555_v30  ;;  %v87_v45 = vadd.f32 %v700_v10, %v64_v29 }
   0xa   :  { %v91_v46 = vadd.f32 %v700_v10, %v68_v37  ;;  %v70_v47 = vmul.f32 %v500_v38, %v689_v5  ;;  %v505_v48 = vunpack.c.h.bf16 %v555_v30  ;;  %v92_v49 = vadd.f32 %v700_v10, %v69_v41 }
   0xb   :  { %585 = vmatpush3.bf16.msra.mxu0 %v630_v2  ;;  %622 = vmatpush3.bf16.msra.mxu1 %v630_v2  ;;  %v115_v31 = vpack.c.bf16 %v100_v25, %v99_v24  ;;  %v71_v50 = vmul.f32 %v501_v42, %v689_v5  ;;  %v72_v51 = vmul.f32 %v504_v43, %v689_v5  ;;  %v508_v52 = vunpack.c.l.bf16 %v556_v39 }
   0xc   :  { %586 = vmatprep.subr.bf16.mxu0 %v631_v3  ;;  %615 = vmatprep.subr.bf16.mxu1 %v631_v3  ;;  %v107_v53 = vmax.f32 %v91_v46, 0.0  ;;  %v93_v54 = vadd.f32 %v700_v10, %v70_v47  ;;  %v73_v55 = vmul.f32 %v505_v48, %v689_v5  ;;  %v509_v56 = vunpack.c.h.bf16 %v556_v39 }
   0xd   :  { %596 = vmatprep.mubr.bf16.mxu0 %v115_v31  ;;  %v88_v57 = vadd.f32 %v700_v10, %v65_v36  ;;  %v108_v58 = vmax.f32 %v92_v49, 0.0  ;;  %v94_v59 = vadd.f32 %v700_v10, %v71_v50  ;;  %v95_v60 = vadd.f32 %v700_v10, %v72_v51 }
   0xe   :  { %v66_v62 = vmul.f32 %v492_v32, %v689_v5  ;;  %v96_v63 = vadd.f32 %v700_v10, %v73_v55  ;;  %v101_v0 = vmax.f32 %v85_v35, 0.0  ;;  %v102_v1 = vmax.f32 %v86_v40, 0.0 }
   0xf   :  { %587 = vmatpush3.bf16.msra.mxu0 %v631_v3  ;;  %623 = vmatpush3.bf16.msra.mxu1 %v631_v3  ;;  %v67_v2 = vmul.f32 %v493_v33, %v689_v5  ;;  %v119_v3 = vpack.c.bf16 %v108_v58, %v107_v53  ;;  %v109_v4 = vmax.f32 %v93_v54, 0.0  ;;  %v110_v6 = vmax.f32 %v94_v59, 0.0 }
  0x10   :  { %588 = vmatprep.subr.bf16.mxu0 %v632_v16  ;;  %616 = vmatprep.subr.bf16.mxu1 %v632_v16  ;;  %v74_v7 = vmul.f32 %v508_v52, %v689_v5  ;;  %v75_v8 = vmul.f32 %v509_v56, %v689_v5  ;;  %v103_v9 = vmax.f32 %v87_v45, 0.0  ;;  %v104_v11 = vmax.f32 %v88_v57, 0.0 }
  0x11   :  { %v111_v12 = vmax.f32 %v95_v60, 0.0  ;;  %v112_v13 = vmax.f32 %v96_v63, 0.0  ;;  %v89_v14 = vadd.f32 %v700_v10, %v66_v62  ;;  %v90_v15 = vadd.f32 %v700_v10, %v67_v2  ;;  %604 = vmatprep.mubr.bf16.mxu1 %v119_v3 }
  0x12   :  { %v120_v17 = vpack.c.bf16 %v110_v6, %v109_v4  ;;  %v97_v18 = vadd.f32 %v700_v10, %v74_v7  ;;  %v98_v19 = vadd.f32 %v700_v10, %v75_v8  ;;  %v117_v5 = vpack.c.bf16 %v104_v11, %v103_v9 }
  0x13   :  { %589 = vmatpush3.bf16.msra.mxu0 %v632_v16  ;;  %624 = vmatpush3.bf16.msra.mxu1 %v632_v16  ;;  %v116_v16 = vpack.c.bf16 %v102_v1, %v101_v0  ;;  %v121_v20 = vpack.c.bf16 %v112_v13, %v111_v12  ;;  %v105_v21 = vmax.f32 %v89_v14, 0.0  ;;  %v106_v22 = vmax.f32 %v90_v15, 0.0 }
  0x14   :  { %590 = vmatprep.subr.bf16.mxu0 %v633_v28  ;;  %617 = vmatprep.subr.bf16.mxu1 %v633_v28  ;;  %v113_v23 = vmax.f32 %v97_v18, 0.0  ;;  %v114_v24 = vmax.f32 %v98_v19, 0.0 }
  0x15   :  { %v118_v25 = vpack.c.bf16 %v106_v22, %v105_v21 }
  0x16   :  { %v122_v26 = vpack.c.bf16 %v114_v24, %v113_v23 }
  0x17   :  { %591 = vmatpush3.bf16.msra.mxu0 %v633_v28  ;;  %625 = vmatpush3.bf16.msra.mxu1 %v633_v28 }
  0x18   :  { %592 = vmatprep.subr.bf16.mxu0 %v634_v44  ;;  %618 = vmatprep.subr.bf16.mxu1 %v634_v44 }
  0x1b   :  { %593 = vmatpush3.bf16.msra.mxu0 %v634_v44  ;;  %626 = vmatpush3.bf16.msra.mxu1 %v634_v44 }
  0x1c   :  { %594 = vmatprep.subr.bf16.mxu0 %v635_v61  ;;  %619 = vmatprep.subr.bf16.mxu1 %v635_v61 }
  0x1f   :  { %595 = vmatpush3.bf16.msra.mxu0 %v635_v61  ;;  %627 = vmatpush3.bf16.msra.mxu1 %v635_v61 }
  0x22   :  { %597 = vmatmul.mubr.bf16.vlgmr.msra.gmra.mrb[0].mxu0 %v116_v16  ;;  %605 = vmatmul.mubr.bf16.vlgmr.msra.gmra.mrb[0].mxu1 %v120_v17 }
  0x23   :  { %600 = vmatprep.mubr.bf16.mxu0 %v117_v5  ;;  %608 = vmatprep.mubr.bf16.mxu1 %v121_v20 }
  0x2a   :  { %601 = vmatmul.mubr.bf16.gmra.mrb[4].mxu0 %v118_v25  ;;  %609 = vmatmul.mubr.bf16.gmra.mrb[4].mxu1 %v122_v26 }
  0xf5   :  { %v598_v27 = vpop.f32.mrb[0].mxu0  ;;  %v606_v28 = vpop.f32.mrb[0].mxu1 }
  0xf6   :  { %v221_v29 = vpop.f32.mrb[1].mxu0  ;;  %v253_v10 = vpop.f32.mrb[1].mxu1  ;;  %v387_v41 = vmul.f32 %v598_v27, %v598_v27  ;;  %v395_v15 = vmul.f32 %v606_v28, %v606_v28 }
  0xf7   :  { %v599_v30 = vpop.f32.mrb[2].mxu0  ;;  %v607_v31 = vpop.f32.mrb[2].mxu1  ;;  %v385_v32 = vmul.f32 %v221_v29, %v221_v29  ;;  %v393_v8 = vmul.f32 %v253_v10, %v253_v10 }
  0xf8   :  { %v518_v33 = vpack.c.bf16 %v599_v30, %v598_v27  ;;  %v224_v34 = vpop.f32.mrb[3].mxu0  ;;  %v538_v35 = vpack.c.bf16 %v607_v31, %v606_v28  ;;  %v256_v36 = vpop.f32.mrb[3].mxu1  ;;  %v388_v44 = vmul.f32 %v599_v30, %v599_v30  ;;  %v396_v18 = vmul.f32 %v607_v31, %v607_v31 }
  0xf9   :  { %v513_v37 = vpack.c.bf16 %v224_v34, %v221_v29  ;;  %v364_v38 = vadd.f32 %v224_v34, %v221_v29  ;;  %v386_v39 = vmul.f32 %v224_v34, %v224_v34  ;;  %v533_v40 = vpack.c.bf16 %v256_v36, %v253_v10 }
  0xfa   :  { %557 = vst [vmem:[%s795_s4 + $0x8] sm:$0xff] %v518_v33   ;;  %561 = vst [vmem:[%s795_s4 + $0x28] sm:$0xff] %v538_v35   ;;  %v394_v14 = vmul.f32 %v256_v36, %v256_v36 }
  0xfb   :  { %514 = vst [vmem:[%s795_s4] sm:$0xff] %v513_v37   ;;  %v365_v42 = vadd.f32 %v598_v27, %v364_v38  ;;  %v401_v43 = vadd.f32 %v386_v39, %v385_v32  ;;  %560 = vst [vmem:[%s795_s4 + $0x20] sm:$0xff] %v533_v40  }
  0xfd   :  { %v402_v45 = vadd.f32 %v401_v43, %v387_v41  ;;  %v602_v46 = vpop.f32.mrb[4].mxu0  ;;  %v366_v47 = vadd.f32 %v599_v30, %v365_v42  ;;  %v610_v48 = vpop.f32.mrb[4].mxu1 }
  0xfe   :  { %v237_v49 = vpop.f32.mrb[5].mxu0  ;;  %v269_v50 = vpop.f32.mrb[5].mxu1  ;;  %v391_v1 = vmul.f32 %v602_v46, %v602_v46  ;;  %v399_v26 = vmul.f32 %v610_v48, %v610_v48 }
  0xff   :  { %v367_v51 = vadd.f32 %v366_v47, %v237_v49  ;;  %v389_v52 = vmul.f32 %v237_v49, %v237_v49  ;;  %v403_v53 = vadd.f32 %v402_v45, %v388_v44  ;;  %v603_v54 = vpop.f32.mrb[6].mxu0  ;;  %v611_v55 = vpop.f32.mrb[6].mxu1  ;;  %v397_v20 = vmul.f32 %v269_v50, %v269_v50 }
 0x100   :  { %v528_v56 = vpack.c.bf16 %v603_v54, %v602_v46  ;;  %v240_v57 = vpop.f32.mrb[7].mxu0  ;;  %v548_v58 = vpack.c.bf16 %v611_v55, %v610_v48  ;;  %v272_v59 = vpop.f32.mrb[7].mxu1  ;;  %v392_v4 = vmul.f32 %v603_v54, %v603_v54 }
 0x101   :  { %v404_v60 = vadd.f32 %v403_v53, %v389_v52  ;;  %v523_v61 = vpack.c.bf16 %v240_v57, %v237_v49  ;;  %v368_v62 = vadd.f32 %v367_v51, %v240_v57  ;;  %v390_v63 = vmul.f32 %v240_v57, %v240_v57 }
 0x102   :  { %559 = vst [vmem:[%s795_s4 + $0x18] sm:$0xff] %v528_v56   ;;  %563 = vst [vmem:[%s795_s4 + $0x38] sm:$0xff] %v548_v58   ;;  %v543_v0 = vpack.c.bf16 %v272_v59, %v269_v50  ;;  %v398_v25 = vmul.f32 %v272_v59, %v272_v59 }
 0x103   :  { %558 = vst [vmem:[%s795_s4 + $0x10] sm:$0xff] %v523_v61   ;;  %v369_v2 = vadd.f32 %v602_v46, %v368_v62  ;;  %v405_v3 = vadd.f32 %v404_v60, %v390_v63 }
 0x104   :  { %562 = vst [vmem:[%s795_s4 + $0x30] sm:$0xff] %v543_v0  }
 0x105   :  { %v406_v6 = vadd.f32 %v405_v3, %v391_v1  ;;  %v370_v7 = vadd.f32 %v603_v54, %v369_v2 }
 0x107   :  { %v371_v9 = vadd.f32 %v370_v7, %v253_v10  ;;  %v407_v11 = vadd.f32 %v406_v6, %v392_v4  ;;  %v400_v10 = vmul.f32 %v611_v55, %v611_v55 }
 0x109   :  { %v408_v12 = vadd.f32 %v407_v11, %v393_v8  ;;  %v372_v13 = vadd.f32 %v371_v9, %v256_v36 }
 0x10b   :  { %v373_v16 = vadd.f32 %v606_v28, %v372_v13  ;;  %v409_v17 = vadd.f32 %v408_v12, %v394_v14 }
 0x10d   :  { %v410_v19 = vadd.f32 %v409_v17, %v395_v15  ;;  %v374_v5 = vadd.f32 %v607_v31, %v373_v16 }
 0x10f   :  { %v375_v21 = vadd.f32 %v374_v5, %v269_v50  ;;  %v411_v22 = vadd.f32 %v410_v19, %v396_v18 }
 0x111   :  { %v412_v23 = vadd.f32 %v411_v22, %v397_v20  ;;  %v376_v24 = vadd.f32 %v375_v21, %v272_v59 }
 0x113   :  { %v377_v27 = vadd.f32 %v610_v48, %v376_v24  ;;  %v413_v29 = vadd.f32 %v412_v23, %v398_v25 }
 0x115   :  { %v378_v30 = vadd.f32 %v611_v55, %v377_v27  ;;  %v414_v32 = vadd.f32 %v413_v29, %v399_v26 }
 0x117   :  { %v379_v33 = vrot.slane %v378_v30, 4  ;;  %v415_v34 = vadd.f32 %v414_v32, %v400_v10 }
 0x119   :  { %v380_v35 = vadd.f32 %v379_v33, %v378_v30  ;;  %v416_v28 = vrot.slane %v415_v34, 4 }
 0x11b   :  { %v381_v36 = vrot.slane %v380_v35, 2  ;;  %v417_v37 = vadd.f32 %v416_v28, %v415_v34 }
 0x11d   :  { %v382_v38 = vadd.f32 %v381_v36, %v380_v35  ;;  %v418_v31 = vrot.slane %v417_v37, 2 }
 0x11f   :  { %v383_v39 = vrot.slane %v382_v38, 1  ;;  %v419_v40 = vadd.f32 %v418_v31, %v417_v37 }
 0x121   :  { %v384_v41 = vadd.f32 %v383_v39, %v382_v38  ;;  %v420_v42 = vrot.slane %v419_v40, 1 }
 0x123   :  { %v421_v43 = vadd.f32 %v420_v42, %v419_v40  ;;  %422 = vst [vmem:[%s796_s5] sm:$0x1] %v384_v41 }
 0x125   :  { %423 = vst [vmem:[%s797_s6] sm:$0x1] %v421_v43 }

// kernel: a_call__.8
= control target key start
LH: loop header
LB: loop body
LE: loop exit
PB: predicated region body
PF: predicated region fallthrough
CT: control target
= control target key end

     0   :  { %s2978_s1 = inlined_call_operand.vmem [shape: bf16[1152,128], index: 1, kind: input, shape index: {}]   ;;  %s2979_s0 = inlined_call_operand.vmem [shape: bf16[128,1152], index: 0, kind: input, shape index: {}]   ;;  %s2980_s2 = inlined_call_operand.vmem [shape: bf16[128,128], index: 2, kind: output, shape index: {0}]   ;;  %s2981_s3 = inlined_call_operand.vmem [shape: f32[1,1,128], index: 3, kind: output, shape index: {1}]   ;;  %s2982_s4 = inlined_call_operand.vmem [shape: f32[1,1,128], index: 4, kind: output, shape index: {2}]  }
   0x1   :  { %v2219_v0 = vld [vmem:[%s2978_s1 + $0x40] sm:$0xff]   ;;  %v2223_v4 = vld [vmem:[%s2978_s1 + $0x48] sm:$0xff]   ;;  %v2227_v8 = vld [vmem:[%s2978_s1 + $0x50] sm:$0xff]  }
   0x2   :  { %v2220_v1 = vld [vmem:[%s2978_s1 + $0xc0] sm:$0xff]   ;;  %1899 = vmatprep.subr.bf16.mxu0 %v2219_v0  ;;  %v2224_v5 = vld [vmem:[%s2978_s1 + $0xc8] sm:$0xff]   ;;  %v2228_v9 = vld [vmem:[%s2978_s1 + $0xd0] sm:$0xff]  }
   0x3   :  { %v2221_v2 = vld [vmem:[%s2978_s1] sm:$0xff]   ;;  %1963 = vmatprep.subr.bf16.mxu1 %v2220_v1  ;;  %v2225_v6 = vld [vmem:[%s2978_s1 + $0x8] sm:$0xff]   ;;  %v2229_v10 = vld [vmem:[%s2978_s1 + $0x10] sm:$0xff]  }
   0x4   :  { %v2222_v3 = vld [vmem:[%s2978_s1 + $0x80] sm:$0xff]   ;;  %1900 = vmatpush3.bf16.msra.mxu0 %v2221_v2  ;;  %v2226_v7 = vld [vmem:[%s2978_s1 + $0x88] sm:$0xff]   ;;  %v2230_v11 = vld [vmem:[%s2978_s1 + $0x90] sm:$0xff]  }
   0x5   :  { %1964 = vmatpush3.bf16.msra.mxu1 %v2222_v3  ;;  %1901 = vmatprep.subr.bf16.mxu0 %v2223_v4  ;;  %v2231_v12 = vld [vmem:[%s2978_s1 + $0x58] sm:$0xff]   ;;  %v2235_v16 = vld [vmem:[%s2978_s1 + $0x60] sm:$0xff]   ;;  %v2239_v20 = vld [vmem:[%s2978_s1 + $0x68] sm:$0xff]  }
   0x6   :  { %1965 = vmatprep.subr.bf16.mxu1 %v2224_v5  ;;  %v2232_v13 = vld [vmem:[%s2978_s1 + $0xd8] sm:$0xff]   ;;  %v2236_v17 = vld [vmem:[%s2978_s1 + $0xe0] sm:$0xff]   ;;  %v2240_v21 = vld [vmem:[%s2978_s1 + $0xe8] sm:$0xff]  }
   0x7   :  { %v2233_v14 = vld [vmem:[%s2978_s1 + $0x18] sm:$0xff]   ;;  %v2237_v18 = vld [vmem:[%s2978_s1 + $0x20] sm:$0xff]   ;;  %v2241_v22 = vld [vmem:[%s2978_s1 + $0x28] sm:$0xff]  }
   0x8   :  { %1902 = vmatpush3.bf16.msra.mxu0 %v2225_v6  ;;  %v2234_v15 = vld [vmem:[%s2978_s1 + $0x98] sm:$0xff]   ;;  %v2238_v19 = vld [vmem:[%s2978_s1 + $0xa0] sm:$0xff]   ;;  %v2242_v23 = vld [vmem:[%s2978_s1 + $0xa8] sm:$0xff]  }
   0x9   :  { %1966 = vmatpush3.bf16.msra.mxu1 %v2226_v7  ;;  %1903 = vmatprep.subr.bf16.mxu0 %v2227_v8  ;;  %v2243_v24 = vld [vmem:[%s2978_s1 + $0x70] sm:$0xff]   ;;  %v2247_v28 = vld [vmem:[%s2978_s1 + $0x78] sm:$0xff]   ;;  %v2251_v32 = vld [vmem:[%s2979_s0] ss:$36 sps:$4 sm:$0xff]  }
   0xa   :  { %1967 = vmatprep.subr.bf16.mxu1 %v2228_v9  ;;  %v2244_v25 = vld [vmem:[%s2978_s1 + $0xf0] sm:$0xff]   ;;  %v2248_v29 = vld [vmem:[%s2978_s1 + $0xf8] sm:$0xff]   ;;  %v2253_v33 = vld [vmem:[%s2979_s0 + $0x4] ss:$36 sps:$4 sm:$0xff]  }
   0xb   :  { %v2245_v26 = vld [vmem:[%s2978_s1 + $0x30] sm:$0xff]   ;;  %v2249_v30 = vld [vmem:[%s2978_s1 + $0x38] sm:$0xff]   ;;  %v2254_v34 = vld [vmem:[%s2979_s0 + $0x8] ss:$36 sps:$4 sm:$0xff]   ;;  %1071 = vmatprep.mubr.bf16.mxu0 %v2253_v33 }
   0xc   :  { %1904 = vmatpush3.bf16.msra.mxu0 %v2229_v10  ;;  %v2246_v27 = vld [vmem:[%s2978_s1 + $0xb0] sm:$0xff]   ;;  %v2250_v31 = vld [vmem:[%s2978_s1 + $0xb8] sm:$0xff]   ;;  %v2257_v36 = vld [vmem:[%s2978_s1 + $0x140] sm:$0xff]  }
   0xd   :  { %1968 = vmatpush3.bf16.msra.mxu1 %v2230_v11  ;;  %1905 = vmatprep.subr.bf16.mxu0 %v2231_v12  ;;  %v2256_v35 = vld [vmem:[%s2979_s0 + $0xc] ss:$36 sps:$4 sm:$0xff]   ;;  %v2258_v37 = vld [vmem:[%s2978_s1 + $0x100] sm:$0xff]   ;;  %v2261_v39 = vld [vmem:[%s2979_s0 + $0x54] ss:$36 sps:$4 sm:$0xff]  }
   0xe   :  { %1969 = vmatprep.subr.bf16.mxu1 %v2232_v13  ;;  %1168 = vmatprep.mubr.bf16.mxu1 %v2256_v35  ;;  %v2259_v38 = vld [vmem:[%s2979_s0 + $0x4c] ss:$36 sps:$4 sm:$0xff]   ;;  %v2267_v44 = vld [vmem:[%s2979_s0 + $0x94] ss:$36 sps:$4 sm:$0xff]   ;;  %v2269_v45 = vld [vmem:[%s2979_s0 + $0x9c] ss:$36 sps:$4 sm:$0xff]  }
   0xf   :  { %v2263_v40 = vld [vmem:[%s2979_s0 + $0x48] ss:$36 sps:$4 sm:$0xff]   ;;  %v2264_v41 = vld [vmem:[%s2979_s0 + $0x50] ss:$36 sps:$4 sm:$0xff]   ;;  %v2274_v47 = vld [vmem:[%s2978_s1 + $0x1c0] sm:$0xff]  }
  0x10   :  { %1906 = vmatpush3.bf16.msra.mxu0 %v2233_v14  ;;  %v2265_v42 = vld [vmem:[%s2978_s1 + $0x148] sm:$0xff]   ;;  %v2273_v46 = vld [vmem:[%s2978_s1 + $0x150] sm:$0xff]   ;;  %v2276_v50 = vld [vmem:[%s2978_s1 + $0x180] sm:$0xff]  }
  0x11   :  { %1970 = vmatpush3.bf16.msra.mxu1 %v2234_v15  ;;  %1907 = vmatprep.subr.bf16.mxu0 %v2235_v16  ;;  %v2266_v43 = vld [vmem:[%s2978_s1 + $0x108] sm:$0xff]   ;;  %v2271_v48 = vld [vmem:[%s2979_s0 + $0x90] ss:$36 sps:$4 sm:$0xff]   ;;  %v2272_v51 = vld [vmem:[%s2979_s0 + $0x98] ss:$36 sps:$4 sm:$0xff]  }
  0x12   :  { %1971 = vmatprep.subr.bf16.mxu1 %v2236_v17  ;;  %v2275_v49 = vld [vmem:[%s2978_s1 + $0x110] sm:$0xff]   ;;  %v2277_v52 = vld [vmem:[%s2979_s0 + $0xdc] ss:$36 sps:$4 sm:$0xff]   ;;  %v2279_v53 = vld [vmem:[%s2979_s0 + $0xe4] ss:$36 sps:$4 sm:$0xff]  }
  0x13   :  { %v2283_v54 = vld [vmem:[%s2978_s1 + $0x158] sm:$0xff]   ;;  %v2284_v55 = vld [vmem:[%s2978_s1 + $0x1c8] sm:$0xff]   ;;  %v2282_v59 = vld [vmem:[%s2979_s0 + $0xe0] ss:$36 sps:$4 sm:$0xff]  }
  0x14   :  { %1908 = vmatpush3.bf16.msra.mxu0 %v2237_v18  ;;  %v2285_v56 = vld [vmem:[%s2978_s1 + $0x118] sm:$0xff]   ;;  %v2286_v57 = vld [vmem:[%s2978_s1 + $0x188] sm:$0xff]   ;;  %v2293_v62 = vld [vmem:[%s2978_s1 + $0x160] sm:$0xff]  }
  0x15   :  { %1972 = vmatpush3.bf16.msra.mxu1 %v2238_v19  ;;  %1909 = vmatprep.subr.bf16.mxu0 %v2239_v20  ;;  %v2281_v58 = vld [vmem:[%s2979_s0 + $0xd8] ss:$36 sps:$4 sm:$0xff]   ;;  %v2287_v60 = vld [vmem:[%s2979_s0 + $0x124] ss:$36 sps:$4 sm:$0xff]   ;;  %v2289_v61 = vld [vmem:[%s2979_s0 + $0x12c] ss:$36 sps:$4 sm:$0xff]  }
  0x16   :  { %1973 = vmatprep.subr.bf16.mxu1 %v2240_v21  ;;  %v2294_v63 = vld [vmem:[%s2978_s1 + $0x1d0] sm:$0xff]   ;;  %v2295_v0 = vld [vmem:[%s2978_s1 + $0x120] sm:$0xff]   ;;  %v2292_v3 = vld [vmem:[%s2979_s0 + $0x128] ss:$36 sps:$4 sm:$0xff]  }
  0x17   :  { %v2296_v1 = vld [vmem:[%s2978_s1 + $0x190] sm:$0xff]   ;;  %v2291_v2 = vld [vmem:[%s2979_s0 + $0x120] ss:$36 sps:$4 sm:$0xff]   ;;  %v2303_v6 = vld [vmem:[%s2978_s1 + $0x168] sm:$0xff]  }
  0x18   :  { %1910 = vmatpush3.bf16.msra.mxu0 %v2241_v22  ;;  %v2297_v4 = vld [vmem:[%s2979_s0 + $0x16c] ss:$36 sps:$4 sm:$0xff]   ;;  %v2299_v5 = vld [vmem:[%s2979_s0 + $0x174] ss:$36 sps:$4 sm:$0xff]   ;;  %v2309_v14 = vld [vmem:[%s2979_s0 + $0x1bc] ss:$36 sps:$4 sm:$0xff]  }
  0x19   :  { %1974 = vmatpush3.bf16.msra.mxu1 %v2242_v23  ;;  %1911 = vmatprep.subr.bf16.mxu0 %v2243_v24  ;;  %v2304_v7 = vld [vmem:[%s2978_s1 + $0x1d8] sm:$0xff]   ;;  %v2305_v8 = vld [vmem:[%s2978_s1 + $0x128] sm:$0xff]   ;;  %v2302_v11 = vld [vmem:[%s2979_s0 + $0x170] ss:$36 sps:$4 sm:$0xff]  }
  0x1a   :  { %1975 = vmatprep.subr.bf16.mxu1 %v2244_v25  ;;  %v2306_v9 = vld [vmem:[%s2978_s1 + $0x198] sm:$0xff]   ;;  %v2301_v10 = vld [vmem:[%s2979_s0 + $0x168] ss:$36 sps:$4 sm:$0xff]   ;;  %v2313_v13 = vld [vmem:[%s2978_s1 + $0x170] sm:$0xff]  }
  0x1b   :  { %v2307_v12 = vld [vmem:[%s2979_s0 + $0x1b4] ss:$36 sps:$4 sm:$0xff]   ;;  %v2314_v15 = vld [vmem:[%s2978_s1 + $0x1e0] sm:$0xff]   ;;  %v2317_v18 = vld [vmem:[%s2978_s1 + $0x1e8] sm:$0xff]  }
  0x1c   :  { %1912 = vmatpush3.bf16.msra.mxu0 %v2245_v26  ;;  %v2315_v16 = vld [vmem:[%s2978_s1 + $0x130] sm:$0xff]   ;;  %v2316_v17 = vld [vmem:[%s2978_s1 + $0x1a0] sm:$0xff]   ;;  %v2318_v19 = vld [vmem:[%s2978_s1 + $0x1a8] sm:$0xff]  }
  0x1d   :  { %1976 = vmatpush3.bf16.msra.mxu1 %v2246_v27  ;;  %1913 = vmatprep.subr.bf16.mxu0 %v2247_v28  ;;  %v2311_v20 = vld [vmem:[%s2979_s0 + $0x1b0] ss:$36 sps:$4 sm:$0xff]   ;;  %v2312_v21 = vld [vmem:[%s2979_s0 + $0x1b8] ss:$36 sps:$4 sm:$0xff]   ;;  %v2321_v23 = vld [vmem:[%s2979_s0 + $0x204] ss:$36 sps:$4 sm:$0xff]  }
  0x1e   :  { %1977 = vmatprep.subr.bf16.mxu1 %v2248_v29  ;;  %v2319_v22 = vld [vmem:[%s2979_s0 + $0x1fc] ss:$36 sps:$4 sm:$0xff]   ;;  %v2326_v25 = vld [vmem:[%s2978_s1 + $0x1f0] sm:$0xff]  }
  0x1f   :  { %v2325_v24 = vld [vmem:[%s2978_s1 + $0x178] sm:$0xff]   ;;  %v2328_v27 = vld [vmem:[%s2978_s1 + $0x1b0] sm:$0xff]  }
  0x20   :  { %1914 = vmatpush3.bf16.msra.mxu0 %v2249_v30  ;;  %v2327_v26 = vld [vmem:[%s2978_s1 + $0x138] sm:$0xff]   ;;  %v2324_v30 = vld [vmem:[%s2979_s0 + $0x200] ss:$36 sps:$4 sm:$0xff]   ;;  %v2331_v35 = vld [vmem:[%s2979_s0 + $0x10] ss:$36 sps:$4 sm:$0xff]  }
  0x21   :  { %1978 = vmatpush3.bf16.msra.mxu1 %v2250_v31  ;;  %2027 = vmatprep.subr.bf16.mxu0 %v2257_v36  ;;  %v2329_v28 = vld [vmem:[%s2978_s1 + $0x1f8] sm:$0xff]  }
  0x22   :  { %2091 = vmatprep.subr.bf16.mxu1 %v2274_v47  ;;  %v2323_v29 = vld [vmem:[%s2979_s0 + $0x1f8] ss:$36 sps:$4 sm:$0xff]   ;;  %v2349_v47 = vld [vmem:[%s2979_s0 + $0xa0] ss:$36 sps:$4 sm:$0xff]  }
  0x23   :  { %1072 = vmatmul.mubr.bf16.vlgmr.msra.gmra.mrb[0].mxu0 %v2251_v32  ;;  %v2330_v31 = vld [vmem:[%s2978_s1 + $0x1b8] sm:$0xff]   ;;  %v2337_v32 = vld [vmem:[%s2978_s1 + $0x200] sm:$0xff]  }
  0x24   :  { %1169 = vmatmul.mubr.bf16.vlgmr.msra.gmra.mrb[0].mxu1 %v2254_v34  ;;  %2028 = vmatpush3.bf16.msra.mxu0 %v2258_v37  ;;  %v2333_v33 = vld [vmem:[%s2979_s0 + $0x14] ss:$36 sps:$4 sm:$0xff]   ;;  %v2336_v34 = vld [vmem:[%s2979_s0 + $0x1c] ss:$36 sps:$4 sm:$0xff]  }
  0x25   :  { %1079 = vmatprep.mubr.bf16.mxu0 %v2259_v38  ;;  %1176 = vmatprep.mubr.bf16.mxu1 %v2261_v39  ;;  %v2334_v36 = vld [vmem:[%s2979_s0 + $0x18] ss:$36 sps:$4 sm:$0xff]   ;;  %v2340_v38 = vld [vmem:[%s2979_s0 + $0x64] ss:$36 sps:$4 sm:$0xff]  }
  0x26   :  { %2029 = vmatprep.subr.bf16.mxu0 %v2265_v42  ;;  %2092 = vmatpush3.bf16.msra.mxu1 %v2276_v50  ;;  %v2338_v37 = vld [vmem:[%s2979_s0 + $0x5c] ss:$36 sps:$4 sm:$0xff]   ;;  %v2344_v39 = vld [vmem:[%s2978_s1 + $0x208] sm:$0xff]   ;;  %v2354_v50 = vld [vmem:[%s2979_s0 + $0xf4] ss:$36 sps:$4 sm:$0xff]  }
  0x27   :  { %2093 = vmatprep.subr.bf16.mxu1 %v2284_v55  ;;  %v2343_v42 = vld [vmem:[%s2979_s0 + $0x60] ss:$36 sps:$4 sm:$0xff]   ;;  %v2359_v55 = vld [vmem:[%s2979_s0 + $0x134] ss:$36 sps:$4 sm:$0xff]  }
  0x28   :  { %2030 = vmatpush3.bf16.msra.mxu0 %v2266_v43  ;;  %v2345_v43 = vld [vmem:[%s2979_s0 + $0xa4] ss:$36 sps:$4 sm:$0xff]  }
  0x29   :  { %2031 = vmatprep.subr.bf16.mxu0 %v2273_v46  ;;  %v2365_v46 = vld [vmem:[%s2978_s1 + $0x220] sm:$0xff]  }
  0x2a   :  { %2094 = vmatpush3.bf16.msra.mxu1 %v2286_v57  ;;  %v2386_v57 = vld [vmem:[%s2978_s1 + $0x238] sm:$0xff]  }
  0x2b   :  { %1080 = vmatmul.mubr.bf16.gmra.mrb[4].mxu0 %v2263_v40  ;;  %2095 = vmatprep.subr.bf16.mxu1 %v2294_v63  ;;  %v2351_v40 = vld [vmem:[%s2978_s1 + $0x210] sm:$0xff]   ;;  %v2371_v63 = vld [vmem:[%s2979_s0 + $0x180] ss:$36 sps:$4 sm:$0xff]  }
  0x2c   :  { %1177 = vmatmul.mubr.bf16.gmra.mrb[4].mxu1 %v2264_v41  ;;  %1087 = vmatprep.mubr.bf16.mxu0 %v2267_v44  ;;  %v2342_v41 = vld [vmem:[%s2979_s0 + $0x58] ss:$36 sps:$4 sm:$0xff]   ;;  %v2347_v44 = vld [vmem:[%s2979_s0 + $0xac] ss:$36 sps:$4 sm:$0xff]  }
  0x2d   :  { %1184 = vmatprep.mubr.bf16.mxu1 %v2269_v45  ;;  %2032 = vmatpush3.bf16.msra.mxu0 %v2275_v49  ;;  %v2358_v45 = vld [vmem:[%s2978_s1 + $0x218] sm:$0xff]   ;;  %v2352_v49 = vld [vmem:[%s2979_s0 + $0xec] ss:$36 sps:$4 sm:$0xff]  }
  0x2e   :  { %2033 = vmatprep.subr.bf16.mxu0 %v2283_v54  ;;  %2096 = vmatpush3.bf16.msra.mxu1 %v2296_v1  ;;  %v2357_v54 = vld [vmem:[%s2979_s0 + $0xf0] ss:$36 sps:$4 sm:$0xff]  }
  0x2f   :  { %2097 = vmatprep.subr.bf16.mxu1 %v2304_v7  ;;  %v2375_v1 = vld [vmem:[%s2979_s0 + $0x1cc] ss:$36 sps:$4 sm:$0xff]  }
  0x30   :  { %v2385_v7 = vld [vmem:[%s2979_s0 + $0x210] ss:$36 sps:$4 sm:$0xff]  }
  0x31   :  { %2034 = vmatpush3.bf16.msra.mxu0 %v2285_v56  ;;  %v2361_v56 = vld [vmem:[%s2979_s0 + $0x13c] ss:$36 sps:$4 sm:$0xff]  }
  0x32   :  { %2035 = vmatprep.subr.bf16.mxu0 %v2293_v62  ;;  %2098 = vmatpush3.bf16.msra.mxu1 %v2306_v9  ;;  %v2370_v62 = vld [vmem:[%s2979_s0 + $0x178] ss:$36 sps:$4 sm:$0xff]   ;;  %v2388_v9 = vld [vmem:[%s2979_s0 + $0x140] ss:$36 sps:$4 sm:$0xff]  }
  0x33   :  { %1088 = vmatmul.mubr.bf16.gmra.mrb[8].mxu0 %v2271_v48  ;;  %2099 = vmatprep.subr.bf16.mxu1 %v2314_v15  ;;  %v2350_v48 = vld [vmem:[%s2979_s0 + $0xa8] ss:$36 sps:$4 sm:$0xff]   ;;  %v2394_v15 = vld [vmem:[%s2979_s0 + $0x218] ss:$36 sps:$4 sm:$0xff]  }
  0x34   :  { %1185 = vmatmul.mubr.bf16.gmra.mrb[8].mxu1 %v2272_v51  ;;  %1095 = vmatprep.mubr.bf16.mxu0 %v2277_v52  ;;  %v2372_v51 = vld [vmem:[%s2978_s1 + $0x228] sm:$0xff]  }
  0x35   :  { %1192 = vmatprep.mubr.bf16.mxu1 %v2279_v53  ;;  %2036 = vmatpush3.bf16.msra.mxu0 %v2295_v0  ;;  %v2356_v52 = vld [vmem:[%s2979_s0 + $0xe8] ss:$36 sps:$4 sm:$0xff]   ;;  %v2379_v53 = vld [vmem:[%s2978_s1 + $0x230] sm:$0xff]  }
  0x36   :  { %2037 = vmatprep.subr.bf16.mxu0 %v2303_v6  ;;  %2100 = vmatpush3.bf16.msra.mxu1 %v2316_v17  ;;  %v2373_v0 = vld [vmem:[%s2979_s0 + $0x1c4] ss:$36 sps:$4 sm:$0xff]  }
  0x37   :  { %2101 = vmatprep.subr.bf16.mxu1 %v2317_v18  ;;  %v2384_v6 = vld [vmem:[%s2979_s0 + $0x208] ss:$36 sps:$4 sm:$0xff]  }
  0x39   :  { %2038 = vmatpush3.bf16.msra.mxu0 %v2305_v8  ;;  %v2387_v8 = vld [vmem:[%s2979_s0 + $0x20] ss:$36 sps:$4 sm:$0xff]  }
  0x3a   :  { %2039 = vmatprep.subr.bf16.mxu0 %v2313_v13  ;;  %2102 = vmatpush3.bf16.msra.mxu1 %v2318_v19  ;;  %v2392_v13 = vld [vmem:[%s2979_s0 + $0x1d0] ss:$36 sps:$4 sm:$0xff]  }
  0x3b   :  { %1096 = vmatmul.mubr.bf16.gmra.mrb[12].mxu0 %v2281_v58  ;;  %2103 = vmatprep.subr.bf16.mxu1 %v2326_v25  ;;  %v2363_v58 = vld [vmem:[%s2979_s0 + $0x130] ss:$36 sps:$4 sm:$0xff]  }
  0x3c   :  { %1193 = vmatmul.mubr.bf16.gmra.mrb[12].mxu1 %v2282_v59  ;;  %1103 = vmatprep.mubr.bf16.mxu0 %v2287_v60  ;;  %v2364_v59 = vld [vmem:[%s2979_s0 + $0x138] ss:$36 sps:$4 sm:$0xff]  }
  0x3d   :  { %1200 = vmatprep.mubr.bf16.mxu1 %v2289_v61  ;;  %2040 = vmatpush3.bf16.msra.mxu0 %v2315_v16  ;;  %v2366_v60 = vld [vmem:[%s2979_s0 + $0x17c] ss:$36 sps:$4 sm:$0xff]   ;;  %v2368_v61 = vld [vmem:[%s2979_s0 + $0x184] ss:$36 sps:$4 sm:$0xff]  }
  0x3e   :  { %2041 = vmatprep.subr.bf16.mxu0 %v2325_v24  ;;  %2104 = vmatpush3.bf16.msra.mxu1 %v2328_v27 }
  0x3f   :  { %2105 = vmatprep.subr.bf16.mxu1 %v2329_v28 }
  0x41   :  { %2042 = vmatpush3.bf16.msra.mxu0 %v2327_v26 }
  0x42   :  { %2171 = vmatprep.subr.bf16.mxu0 %v2337_v32  ;;  %2106 = vmatpush3.bf16.msra.mxu1 %v2330_v31 }
  0x43   :  { %1104 = vmatmul.mubr.bf16.gmra.mrb[16].mxu0 %v2291_v2  ;;  %2203 = vmatprep.subr.bf16.mxu1 %v2337_v32  ;;  %v2377_v2 = vld [vmem:[%s2979_s0 + $0x1c0] ss:$36 sps:$4 sm:$0xff]  }
  0x44   :  { %1201 = vmatmul.mubr.bf16.gmra.mrb[16].mxu1 %v2292_v3  ;;  %1111 = vmatprep.mubr.bf16.mxu0 %v2297_v4  ;;  %v2378_v3 = vld [vmem:[%s2979_s0 + $0x1c8] ss:$36 sps:$4 sm:$0xff]  }
  0x45   :  { %1208 = vmatprep.mubr.bf16.mxu1 %v2299_v5  ;;  %v2380_v4 = vld [vmem:[%s2979_s0 + $0x20c] ss:$36 sps:$4 sm:$0xff]   ;;  %v2382_v5 = vld [vmem:[%s2979_s0 + $0x214] ss:$36 sps:$4 sm:$0xff]  }
  0x4b   :  { %1112 = vmatmul.mubr.bf16.gmra.mrb[20].mxu0 %v2301_v10  ;;  %v2389_v10 = vld [vmem:[%s2979_s0 + $0x68] ss:$36 sps:$4 sm:$0xff]  }
  0x4c   :  { %1209 = vmatmul.mubr.bf16.gmra.mrb[20].mxu1 %v2302_v11  ;;  %1119 = vmatprep.mubr.bf16.mxu0 %v2307_v12  ;;  %v2390_v11 = vld [vmem:[%s2979_s0 + $0x188] ss:$36 sps:$4 sm:$0xff]   ;;  %v2391_v12 = vld [vmem:[%s2979_s0 + $0xb0] ss:$36 sps:$4 sm:$0xff]  }
  0x4d   :  { %1216 = vmatprep.mubr.bf16.mxu1 %v2309_v14  ;;  %v2393_v14 = vld [vmem:[%s2979_s0 + $0xf8] ss:$36 sps:$4 sm:$0xff]  }
  0x53   :  { %1120 = vmatmul.mubr.bf16.gmra.mrb[24].mxu0 %v2311_v20 }
  0x54   :  { %1217 = vmatmul.mubr.bf16.gmra.mrb[24].mxu1 %v2312_v21  ;;  %1127 = vmatprep.mubr.bf16.mxu0 %v2319_v22 }
  0x55   :  { %1224 = vmatprep.mubr.bf16.mxu1 %v2321_v23 }
  0x5b   :  { %1128 = vmatmul.mubr.bf16.gmra.mrb[28].mxu0 %v2323_v29 }
  0x5c   :  { %1225 = vmatmul.mubr.bf16.gmra.mrb[28].mxu1 %v2324_v30  ;;  %1265 = vmatprep.mubr.bf16.mxu0 %v2333_v33 }
  0x5d   :  { %1362 = vmatprep.mubr.bf16.mxu1 %v2336_v34 }
  0x63   :  { %1266 = vmatmul.mubr.bf16.vlgmr.msra.gmra.mrb[32].mxu0 %v2331_v35 }
  0x64   :  { %1363 = vmatmul.mubr.bf16.vlgmr.msra.gmra.mrb[32].mxu1 %v2334_v36  ;;  %2172 = vmatpush3.bf16.msra.mxu0 %v2337_v32 }
  0x65   :  { %1273 = vmatprep.mubr.bf16.mxu0 %v2338_v37  ;;  %1370 = vmatprep.mubr.bf16.mxu1 %v2340_v38 }
  0x66   :  { %2173 = vmatprep.subr.bf16.mxu0 %v2344_v39  ;;  %2211 = vmatpush3.bf16.msra.mxu1 %v2337_v32 }
  0x67   :  { %2204 = vmatprep.subr.bf16.mxu1 %v2344_v39 }
  0x68   :  { %2174 = vmatpush3.bf16.msra.mxu0 %v2344_v39 }
  0x69   :  { %2175 = vmatprep.subr.bf16.mxu0 %v2351_v40 }
  0x6a   :  { %2212 = vmatpush3.bf16.msra.mxu1 %v2344_v39 }
  0x6b   :  { %1274 = vmatmul.mubr.bf16.gmra.mrb[36].mxu0 %v2342_v41  ;;  %2205 = vmatprep.subr.bf16.mxu1 %v2351_v40 }
  0x6c   :  { %1371 = vmatmul.mubr.bf16.gmra.mrb[36].mxu1 %v2343_v42  ;;  %1281 = vmatprep.mubr.bf16.mxu0 %v2345_v43 }
  0x6d   :  { %1378 = vmatprep.mubr.bf16.mxu1 %v2347_v44  ;;  %2176 = vmatpush3.bf16.msra.mxu0 %v2351_v40 }
  0x6e   :  { %2177 = vmatprep.subr.bf16.mxu0 %v2358_v45  ;;  %2213 = vmatpush3.bf16.msra.mxu1 %v2351_v40 }
  0x6f   :  { %2206 = vmatprep.subr.bf16.mxu1 %v2358_v45 }
  0x71   :  { %2178 = vmatpush3.bf16.msra.mxu0 %v2358_v45 }
  0x72   :  { %2179 = vmatprep.subr.bf16.mxu0 %v2365_v46  ;;  %2214 = vmatpush3.bf16.msra.mxu1 %v2358_v45 }
  0x73   :  { %1282 = vmatmul.mubr.bf16.gmra.mrb[40].mxu0 %v2349_v47  ;;  %2207 = vmatprep.subr.bf16.mxu1 %v2365_v46 }
  0x74   :  { %1379 = vmatmul.mubr.bf16.gmra.mrb[40].mxu1 %v2350_v48  ;;  %1289 = vmatprep.mubr.bf16.mxu0 %v2352_v49 }
  0x75   :  { %1386 = vmatprep.mubr.bf16.mxu1 %v2354_v50  ;;  %2180 = vmatpush3.bf16.msra.mxu0 %v2365_v46 }
  0x76   :  { %2181 = vmatprep.subr.bf16.mxu0 %v2372_v51  ;;  %2215 = vmatpush3.bf16.msra.mxu1 %v2365_v46 }
  0x77   :  { %2208 = vmatprep.subr.bf16.mxu1 %v2372_v51 }
  0x79   :  { %2182 = vmatpush3.bf16.msra.mxu0 %v2372_v51 }
  0x7a   :  { %2183 = vmatprep.subr.bf16.mxu0 %v2379_v53  ;;  %2216 = vmatpush3.bf16.msra.mxu1 %v2372_v51 }
  0x7b   :  { %1290 = vmatmul.mubr.bf16.gmra.mrb[44].mxu0 %v2356_v52  ;;  %2209 = vmatprep.subr.bf16.mxu1 %v2379_v53 }
  0x7c   :  { %1387 = vmatmul.mubr.bf16.gmra.mrb[44].mxu1 %v2357_v54  ;;  %1297 = vmatprep.mubr.bf16.mxu0 %v2359_v55 }
  0x7d   :  { %1394 = vmatprep.mubr.bf16.mxu1 %v2361_v56  ;;  %2184 = vmatpush3.bf16.msra.mxu0 %v2379_v53 }
  0x7e   :  { %2185 = vmatprep.subr.bf16.mxu0 %v2386_v57  ;;  %2217 = vmatpush3.bf16.msra.mxu1 %v2379_v53 }
  0x7f   :  { %2210 = vmatprep.subr.bf16.mxu1 %v2386_v57 }
  0x81   :  { %2186 = vmatpush3.bf16.msra.mxu0 %v2386_v57 }
  0x82   :  { %2218 = vmatpush3.bf16.msra.mxu1 %v2386_v57 }
  0x83   :  { %1298 = vmatmul.mubr.bf16.gmra.mrb[48].mxu0 %v2363_v58 }
  0x84   :  { %1395 = vmatmul.mubr.bf16.gmra.mrb[48].mxu1 %v2364_v59  ;;  %1305 = vmatprep.mubr.bf16.mxu0 %v2366_v60 }
  0x85   :  { %1402 = vmatprep.mubr.bf16.mxu1 %v2368_v61 }
  0x8b   :  { %1306 = vmatmul.mubr.bf16.gmra.mrb[52].mxu0 %v2370_v62 }
  0x8c   :  { %1403 = vmatmul.mubr.bf16.gmra.mrb[52].mxu1 %v2371_v63  ;;  %1313 = vmatprep.mubr.bf16.mxu0 %v2373_v0 }
  0x8d   :  { %1410 = vmatprep.mubr.bf16.mxu1 %v2375_v1 }
  0x93   :  { %1314 = vmatmul.mubr.bf16.gmra.mrb[56].mxu0 %v2377_v2 }
  0x94   :  { %1411 = vmatmul.mubr.bf16.gmra.mrb[56].mxu1 %v2378_v3  ;;  %1321 = vmatprep.mubr.bf16.mxu0 %v2380_v4 }
  0x95   :  { %1418 = vmatprep.mubr.bf16.mxu1 %v2382_v5 }
  0x9b   :  { %1322 = vmatmul.mubr.bf16.gmra.mrb[60].mxu0 %v2384_v6 }
  0x9c   :  { %1419 = vmatmul.mubr.bf16.gmra.mrb[60].mxu1 %v2385_v7  ;;  %2187 = vmatprep.mubr.bf16.mxu0 %v2387_v8 }
  0x9d   :  { %2195 = vmatprep.mubr.bf16.mxu1 %v2388_v9 }
  0xa3   :  { %2188 = vmatmul.mubr.bf16.vlgmr.msra.gmra.mrb[64].mxu0 %v2389_v10 }
  0xa4   :  { %2196 = vmatmul.mubr.bf16.vlgmr.msra.gmra.mrb[64].mxu1 %v2390_v11  ;;  %2191 = vmatprep.mubr.bf16.mxu0 %v2391_v12 }
  0xa5   :  { %2199 = vmatprep.mubr.bf16.mxu1 %v2392_v13 }
  0xab   :  { %2192 = vmatmul.mubr.bf16.gmra.mrb[68].mxu0 %v2393_v14 }
  0xac   :  { %2200 = vmatmul.mubr.bf16.gmra.mrb[68].mxu1 %v2394_v15 }
  0xf6   :  { %v1915_v16 = vpop.f32.mrb[0].mxu0 }
  0xf7   :  { %v1979_v17 = vpop.f32.mrb[0].mxu1  ;;  %v1916_v18 = vpop.f32.mrb[1].mxu0 }
  0xf8   :  { %v1917_v19 = vadd.f32 %v1916_v18, %v1915_v16  ;;  %v1980_v20 = vpop.f32.mrb[1].mxu1  ;;  %v1918_v21 = vpop.f32.mrb[2].mxu0 }
  0xf9   :  { %v1981_v22 = vadd.f32 %v1980_v20, %v1979_v17  ;;  %v1982_v23 = vpop.f32.mrb[2].mxu1  ;;  %v1919_v24 = vpop.f32.mrb[3].mxu0 }
  0xfa   :  { %v1920_v25 = vadd.f32 %v1919_v24, %v1918_v21  ;;  %v1983_v26 = vpop.f32.mrb[3].mxu1 }
  0xfb   :  { %v2852_v27 = vadd.f32 %v1981_v22, %v1917_v19  ;;  %v1984_v28 = vadd.f32 %v1983_v26, %v1982_v23 }
  0xfd   :  { %v2854_v29 = vadd.f32 %v1984_v28, %v1920_v25 }
  0xfe   :  { %v1921_v30 = vpop.f32.mrb[4].mxu0 }
  0xff   :  { %v1985_v31 = vpop.f32.mrb[4].mxu1  ;;  %v1922_v32 = vpop.f32.mrb[5].mxu0 }
 0x100   :  { %v1923_v33 = vadd.f32 %v1922_v32, %v1921_v30  ;;  %v1986_v34 = vpop.f32.mrb[5].mxu1  ;;  %v1924_v35 = vpop.f32.mrb[6].mxu0 }
 0x101   :  { %v1987_v36 = vadd.f32 %v1986_v34, %v1985_v31  ;;  %v1988_v37 = vpop.f32.mrb[6].mxu1  ;;  %v1925_v38 = vpop.f32.mrb[7].mxu0 }
 0x102   :  { %v1926_v39 = vadd.f32 %v1925_v38, %v1924_v35  ;;  %v1989_v40 = vpop.f32.mrb[7].mxu1 }
 0x103   :  { %v2856_v41 = vadd.f32 %v1987_v36, %v1923_v33  ;;  %v1990_v42 = vadd.f32 %v1989_v40, %v1988_v37 }
 0x105   :  { %v2858_v43 = vadd.f32 %v1990_v42, %v1926_v39 }
 0x106   :  { %v1927_v44 = vpop.f32.mrb[8].mxu0 }
 0x107   :  { %v1991_v45 = vpop.f32.mrb[8].mxu1  ;;  %v1928_v46 = vpop.f32.mrb[9].mxu0 }
 0x108   :  { %v1929_v47 = vadd.f32 %v1928_v46, %v1927_v44  ;;  %v1992_v48 = vpop.f32.mrb[9].mxu1  ;;  %v1930_v49 = vpop.f32.mrb[10].mxu0 }
 0x109   :  { %v1993_v50 = vadd.f32 %v1992_v48, %v1991_v45  ;;  %v1994_v51 = vpop.f32.mrb[10].mxu1  ;;  %v1931_v52 = vpop.f32.mrb[11].mxu0 }
 0x10a   :  { %v1932_v53 = vadd.f32 %v1931_v52, %v1930_v49  ;;  %v1995_v54 = vpop.f32.mrb[11].mxu1 }
 0x10b   :  { %v2860_v55 = vadd.f32 %v1993_v50, %v1929_v47  ;;  %v1996_v56 = vadd.f32 %v1995_v54, %v1994_v51 }
 0x10d   :  { %v2862_v57 = vadd.f32 %v1996_v56, %v1932_v53 }
 0x10e   :  { %v1933_v58 = vpop.f32.mrb[12].mxu0 }
 0x10f   :  { %v1997_v59 = vpop.f32.mrb[12].mxu1  ;;  %v1934_v60 = vpop.f32.mrb[13].mxu0 }
 0x110   :  { %v1935_v61 = vadd.f32 %v1934_v60, %v1933_v58  ;;  %v1998_v62 = vpop.f32.mrb[13].mxu1  ;;  %v1936_v63 = vpop.f32.mrb[14].mxu0 }
 0x111   :  { %v1999_v0 = vadd.f32 %v1998_v62, %v1997_v59  ;;  %v2000_v1 = vpop.f32.mrb[14].mxu1  ;;  %v1937_v2 = vpop.f32.mrb[15].mxu0 }
 0x112   :  { %v1938_v3 = vadd.f32 %v1937_v2, %v1936_v63  ;;  %v2001_v4 = vpop.f32.mrb[15].mxu1 }
 0x113   :  { %v2864_v5 = vadd.f32 %v1999_v0, %v1935_v61  ;;  %v2002_v6 = vadd.f32 %v2001_v4, %v2000_v1 }
 0x115   :  { %v2866_v7 = vadd.f32 %v2002_v6, %v1938_v3 }
 0x116   :  { %v1939_v8 = vpop.f32.mrb[16].mxu0 }
 0x117   :  { %v2003_v9 = vpop.f32.mrb[16].mxu1  ;;  %v1940_v10 = vpop.f32.mrb[17].mxu0 }
 0x118   :  { %v1941_v11 = vadd.f32 %v1940_v10, %v1939_v8  ;;  %v2004_v12 = vpop.f32.mrb[17].mxu1  ;;  %v1942_v13 = vpop.f32.mrb[18].mxu0 }
 0x119   :  { %v2005_v14 = vadd.f32 %v2004_v12, %v2003_v9  ;;  %v2006_v15 = vpop.f32.mrb[18].mxu1  ;;  %v1943_v16 = vpop.f32.mrb[19].mxu0 }
 0x11a   :  { %v1944_v17 = vadd.f32 %v1943_v16, %v1942_v13  ;;  %v2007_v18 = vpop.f32.mrb[19].mxu1 }
 0x11b   :  { %v2868_v19 = vadd.f32 %v2005_v14, %v1941_v11  ;;  %v2008_v20 = vadd.f32 %v2007_v18, %v2006_v15 }
 0x11d   :  { %v2870_v21 = vadd.f32 %v2008_v20, %v1944_v17 }
 0x11e   :  { %v1945_v22 = vpop.f32.mrb[20].mxu0 }
 0x11f   :  { %v2009_v23 = vpop.f32.mrb[20].mxu1  ;;  %v1946_v24 = vpop.f32.mrb[21].mxu0 }
 0x120   :  { %v1947_v25 = vadd.f32 %v1946_v24, %v1945_v22  ;;  %v2010_v26 = vpop.f32.mrb[21].mxu1  ;;  %v1948_v28 = vpop.f32.mrb[22].mxu0 }
 0x121   :  { %v2011_v30 = vadd.f32 %v2010_v26, %v2009_v23  ;;  %v2012_v31 = vpop.f32.mrb[22].mxu1  ;;  %v1949_v32 = vpop.f32.mrb[23].mxu0 }
 0x122   :  { %v1950_v33 = vadd.f32 %v1949_v32, %v1948_v28  ;;  %v2013_v34 = vpop.f32.mrb[23].mxu1 }
 0x123   :  { %v2872_v35 = vadd.f32 %v2011_v30, %v1947_v25  ;;  %v2014_v36 = vadd.f32 %v2013_v34, %v2012_v31 }
 0x125   :  { %v2874_v37 = vadd.f32 %v2014_v36, %v1950_v33 }
 0x126   :  { %v1951_v38 = vpop.f32.mrb[24].mxu0 }
 0x127   :  { %v2015_v39 = vpop.f32.mrb[24].mxu1  ;;  %v1952_v40 = vpop.f32.mrb[25].mxu0 }
 0x128   :  { %v1953_v42 = vadd.f32 %v1952_v40, %v1951_v38  ;;  %v2016_v44 = vpop.f32.mrb[25].mxu1  ;;  %v1954_v45 = vpop.f32.mrb[26].mxu0 }
 0x129   :  { %v2017_v46 = vadd.f32 %v2016_v44, %v2015_v39  ;;  %v2018_v47 = vpop.f32.mrb[26].mxu1  ;;  %v1955_v48 = vpop.f32.mrb[27].mxu0 }
 0x12a   :  { %v1956_v49 = vadd.f32 %v1955_v48, %v1954_v45  ;;  %v2019_v50 = vpop.f32.mrb[27].mxu1 }
 0x12b   :  { %v2876_v51 = vadd.f32 %v2017_v46, %v1953_v42  ;;  %v2020_v52 = vadd.f32 %v2019_v50, %v2018_v47 }
 0x12d   :  { %v2878_v53 = vadd.f32 %v2020_v52, %v1956_v49 }
 0x12e   :  { %v1957_v54 = vpop.f32.mrb[28].mxu0 }
 0x12f   :  { %v2021_v56 = vpop.f32.mrb[28].mxu1  ;;  %v1958_v58 = vpop.f32.mrb[29].mxu0 }
 0x130   :  { %v1959_v59 = vadd.f32 %v1958_v58, %v1957_v54  ;;  %v2022_v60 = vpop.f32.mrb[29].mxu1  ;;  %v1960_v61 = vpop.f32.mrb[30].mxu0 }
 0x131   :  { %v2023_v62 = vadd.f32 %v2022_v60, %v2021_v56  ;;  %v2024_v63 = vpop.f32.mrb[30].mxu1  ;;  %v1961_v0 = vpop.f32.mrb[31].mxu0 }
 0x132   :  { %v1962_v1 = vadd.f32 %v1961_v0, %v1960_v61  ;;  %v2025_v2 = vpop.f32.mrb[31].mxu1 }
 0x133   :  { %v2880_v3 = vadd.f32 %v2023_v62, %v1959_v59  ;;  %v2026_v4 = vadd.f32 %v2025_v2, %v2024_v63 }
 0x135   :  { %v2882_v6 = vadd.f32 %v2026_v4, %v1962_v1 }
 0x136   :  { %v2043_v8 = vpop.f32.mrb[32].mxu0 }
 0x137   :  { %v2044_v9 = vpop.f32.mrb[33].mxu0  ;;  %v2107_v10 = vpop.f32.mrb[32].mxu1 }
 0x138   :  { %v2045_v11 = vadd.f32 %v2044_v9, %v2043_v8  ;;  %v2046_v12 = vpop.f32.mrb[34].mxu0  ;;  %v2108_v13 = vpop.f32.mrb[33].mxu1 }
 0x139   :  { %v2047_v14 = vpop.f32.mrb[35].mxu0  ;;  %v2109_v15 = vadd.f32 %v2108_v13, %v2107_v10  ;;  %v2110_v16 = vpop.f32.mrb[34].mxu1 }
 0x13a   :  { %v1268_v17 = vadd.f32 %v2045_v11, %v2852_v27  ;;  %v2048_v18 = vadd.f32 %v2047_v14, %v2046_v12  ;;  %v2111_v20 = vpop.f32.mrb[35].mxu1 }
 0x13b   :  { %v2112_v22 = vadd.f32 %v2111_v20, %v2110_v16 }
 0x13c   :  { %v1271_v23 = vadd.f32 %v2048_v18, %v2854_v29  ;;  %v2886_v24 = vadd.f32 %v2109_v15, %v1268_v17 }
 0x13e   :  { %v2049_v25 = vpop.f32.mrb[36].mxu0  ;;  %v2888_v26 = vadd.f32 %v2112_v22, %v1271_v23 }
 0x13f   :  { %v2050_v28 = vpop.f32.mrb[37].mxu0  ;;  %v2113_v30 = vpop.f32.mrb[36].mxu1 }
 0x140   :  { %v2051_v31 = vadd.f32 %v2050_v28, %v2049_v25  ;;  %v2052_v32 = vpop.f32.mrb[38].mxu0  ;;  %v2114_v33 = vpop.f32.mrb[37].mxu1 }
 0x141   :  { %v2053_v34 = vpop.f32.mrb[39].mxu0  ;;  %v2115_v36 = vadd.f32 %v2114_v33, %v2113_v30  ;;  %v2116_v38 = vpop.f32.mrb[38].mxu1 }
 0x142   :  { %v1276_v27 = vadd.f32 %v2051_v31, %v2856_v41  ;;  %v2054_v39 = vadd.f32 %v2053_v34, %v2052_v32  ;;  %v2117_v40 = vpop.f32.mrb[39].mxu1 }
 0x143   :  { %v2118_v42 = vadd.f32 %v2117_v40, %v2116_v38 }
 0x144   :  { %v1279_v29 = vadd.f32 %v2054_v39, %v2858_v43  ;;  %v2892_v44 = vadd.f32 %v2115_v36, %v1276_v27 }
 0x146   :  { %v2055_v45 = vpop.f32.mrb[40].mxu0  ;;  %v2894_v46 = vadd.f32 %v2118_v42, %v1279_v29 }
 0x147   :  { %v2056_v47 = vpop.f32.mrb[41].mxu0  ;;  %v2119_v48 = vpop.f32.mrb[40].mxu1 }
 0x148   :  { %v2057_v49 = vadd.f32 %v2056_v47, %v2055_v45  ;;  %v2058_v50 = vpop.f32.mrb[42].mxu0  ;;  %v2120_v52 = vpop.f32.mrb[41].mxu1 }
 0x149   :  { %v2059_v54 = vpop.f32.mrb[43].mxu0  ;;  %v2121_v56 = vadd.f32 %v2120_v52, %v2119_v48  ;;  %v2122_v58 = vpop.f32.mrb[42].mxu1 }
 0x14a   :  { %v1284_v41 = vadd.f32 %v2057_v49, %v2860_v55  ;;  %v2060_v59 = vadd.f32 %v2059_v54, %v2058_v50  ;;  %v2123_v60 = vpop.f32.mrb[43].mxu1 }
 0x14b   :  { %v2124_v61 = vadd.f32 %v2123_v60, %v2122_v58 }
 0x14c   :  { %v1287_v43 = vadd.f32 %v2060_v59, %v2862_v57  ;;  %v2898_v62 = vadd.f32 %v2121_v56, %v1284_v41 }
 0x14e   :  { %v2061_v63 = vpop.f32.mrb[44].mxu0  ;;  %v2900_v0 = vadd.f32 %v2124_v61, %v1287_v43 }
 0x14f   :  { %v2062_v1 = vpop.f32.mrb[45].mxu0  ;;  %v2125_v2 = vpop.f32.mrb[44].mxu1 }
 0x150   :  { %v2063_v4 = vadd.f32 %v2062_v1, %v2061_v63  ;;  %v2064_v8 = vpop.f32.mrb[46].mxu0  ;;  %v2126_v9 = vpop.f32.mrb[45].mxu1 }
 0x151   :  { %v2065_v10 = vpop.f32.mrb[47].mxu0  ;;  %v2127_v11 = vadd.f32 %v2126_v9, %v2125_v2  ;;  %v2128_v12 = vpop.f32.mrb[46].mxu1 }
 0x152   :  { %v1292_v55 = vadd.f32 %v2063_v4, %v2864_v5  ;;  %v2066_v13 = vadd.f32 %v2065_v10, %v2064_v8  ;;  %v2129_v14 = vpop.f32.mrb[47].mxu1 }
 0x153   :  { %v2130_v15 = vadd.f32 %v2129_v14, %v2128_v12 }
 0x154   :  { %v1295_v57 = vadd.f32 %v2066_v13, %v2866_v7  ;;  %v2904_v16 = vadd.f32 %v2127_v11, %v1292_v55 }
 0x156   :  { %v2067_v17 = vpop.f32.mrb[48].mxu0  ;;  %v2906_v18 = vadd.f32 %v2130_v15, %v1295_v57 }
 0x157   :  { %v2068_v20 = vpop.f32.mrb[49].mxu0  ;;  %v2131_v22 = vpop.f32.mrb[48].mxu1 }
 0x158   :  { %v2069_v23 = vadd.f32 %v2068_v20, %v2067_v17  ;;  %v2070_v25 = vpop.f32.mrb[50].mxu0  ;;  %v2132_v28 = vpop.f32.mrb[49].mxu1 }
 0x159   :  { %v2071_v30 = vpop.f32.mrb[51].mxu0  ;;  %v2133_v31 = vadd.f32 %v2132_v28, %v2131_v22  ;;  %v2134_v32 = vpop.f32.mrb[50].mxu1 }
 0x15a   :  { %v1300_v5 = vadd.f32 %v2069_v23, %v2868_v19  ;;  %v2072_v33 = vadd.f32 %v2071_v30, %v2070_v25  ;;  %v2135_v34 = vpop.f32.mrb[51].mxu1 }
 0x15b   :  { %v2136_v36 = vadd.f32 %v2135_v34, %v2134_v32 }
 0x15c   :  { %v1303_v7 = vadd.f32 %v2072_v33, %v2870_v21  ;;  %v1397_v38 = vadd.f32 %v2133_v31, %v1300_v5 }
 0x15e   :  { %v2073_v27 = vpop.f32.mrb[52].mxu0  ;;  %v2910_v39 = vadd.f32 %v2136_v36, %v1303_v7 }
 0x15f   :  { %v2074_v40 = vpop.f32.mrb[53].mxu0  ;;  %v2137_v42 = vpop.f32.mrb[52].mxu1 }
 0x160   :  { %v2075_v29 = vadd.f32 %v2074_v40, %v2073_v27  ;;  %v2076_v45 = vpop.f32.mrb[54].mxu0  ;;  %v2138_v47 = vpop.f32.mrb[53].mxu1 }
 0x161   :  { %v2077_v48 = vpop.f32.mrb[55].mxu0  ;;  %v2139_v49 = vadd.f32 %v2138_v47, %v2137_v42  ;;  %v2140_v50 = vpop.f32.mrb[54].mxu1 }
 0x162   :  { %v1308_v52 = vadd.f32 %v2075_v29, %v2872_v35  ;;  %v2078_v19 = vadd.f32 %v2077_v48, %v2076_v45  ;;  %v2141_v54 = vpop.f32.mrb[55].mxu1 }
 0x163   :  { %v2142_v56 = vadd.f32 %v2141_v54, %v2140_v50 }
 0x164   :  { %v1311_v58 = vadd.f32 %v2078_v19, %v2874_v37  ;;  %v1405_v21 = vadd.f32 %v2139_v49, %v1308_v52 }
 0x166   :  { %v2079_v41 = vpop.f32.mrb[56].mxu0  ;;  %v1408_v59 = vadd.f32 %v2142_v56, %v1311_v58 }
 0x167   :  { %v2080_v60 = vpop.f32.mrb[57].mxu0  ;;  %v2143_v61 = vpop.f32.mrb[56].mxu1 }
 0x168   :  { %v2081_v43 = vadd.f32 %v2080_v60, %v2079_v41  ;;  %v2082_v63 = vpop.f32.mrb[58].mxu0  ;;  %v2144_v1 = vpop.f32.mrb[57].mxu1 }
 0x169   :  { %v2083_v2 = vpop.f32.mrb[59].mxu0  ;;  %v2145_v4 = vadd.f32 %v2144_v1, %v2143_v61  ;;  %v2146_v8 = vpop.f32.mrb[58].mxu1 }
 0x16a   :  { %v1316_v9 = vadd.f32 %v2081_v43, %v2876_v51  ;;  %v2084_v10 = vadd.f32 %v2083_v2, %v2082_v63  ;;  %v2147_v35 = vpop.f32.mrb[59].mxu1 }
 0x16b   :  { %v2148_v11 = vadd.f32 %v2147_v35, %v2146_v8 }
 0x16c   :  { %v1319_v12 = vadd.f32 %v2084_v10, %v2878_v53  ;;  %v1413_v55 = vadd.f32 %v2145_v4, %v1316_v9 }
 0x16e   :  { %v2085_v37 = vpop.f32.mrb[60].mxu0  ;;  %v2916_v13 = vadd.f32 %v2148_v11, %v1319_v12 }
 0x16f   :  { %v2086_v14 = vpop.f32.mrb[61].mxu0  ;;  %v2149_v15 = vpop.f32.mrb[60].mxu1 }
 0x170   :  { %v2087_v57 = vadd.f32 %v2086_v14, %v2085_v37  ;;  %v2088_v17 = vpop.f32.mrb[62].mxu0  ;;  %v2150_v20 = vpop.f32.mrb[61].mxu1 }
 0x171   :  { %v2089_v22 = vpop.f32.mrb[63].mxu0  ;;  %v2151_v23 = vadd.f32 %v2150_v20, %v2149_v15  ;;  %v2152_v25 = vpop.f32.mrb[62].mxu1 }
 0x172   :  { %v1324_v28 = vadd.f32 %v2087_v57, %v2880_v3  ;;  %v2090_v51 = vadd.f32 %v2089_v22, %v2088_v17  ;;  %v2153_v30 = vpop.f32.mrb[63].mxu1 }
 0x173   :  { %v2154_v31 = vadd.f32 %v2153_v30, %v2152_v25 }
 0x174   :  { %v1327_v32 = vadd.f32 %v2090_v51, %v2882_v6  ;;  %v1421_v53 = vadd.f32 %v2151_v23, %v1324_v28 }
 0x176   :  { %v2189_v5 = vpop.f32.mrb[64].mxu0  ;;  %v1424_v33 = vadd.f32 %v2154_v31, %v1327_v32 }
 0x177   :  { %v1470_v34 = vadd.f32 %v2189_v5, %v2892_v44  ;;  %v2197_v36 = vpop.f32.mrb[64].mxu1  ;;  %v1461_v7 = vpop.f32.mrb[65].mxu0 }
 0x178   :  { %v2921_v27 = vadd.f32 %v2197_v36, %v1405_v21  ;;  %v1462_v40 = vadd.f32 %v1461_v7, %v2886_v24  ;;  %v1493_v42 = vpop.f32.mrb[65].mxu1  ;;  %v2190_v29 = vpop.f32.mrb[66].mxu0 }
 0x179   :  { %v2924_v45 = vadd.f32 %v1493_v42, %v1397_v38  ;;  %v1473_v3 = vadd.f32 %v2190_v29, %v2894_v46  ;;  %v2198_v47 = vpop.f32.mrb[66].mxu1  ;;  %v1464_v48 = vpop.f32.mrb[67].mxu0  ;;  %v1627_v58 = vmul.f32 %v1470_v34, %v1470_v34 }
 0x17a   :  { %v2927_v6 = vadd.f32 %v2198_v47, %v1408_v59  ;;  %v1465_v49 = vadd.f32 %v1464_v48, %v2888_v26  ;;  %v1496_v50 = vpop.f32.mrb[67].mxu1  ;;  %v1625_v56 = vmul.f32 %v1462_v40, %v1462_v40  ;;  %v1635_v7 = vmul.f32 %v2921_v27, %v2921_v27 }
 0x17b   :  { %v1860_v44 = vpack.c.bf16 %v1473_v3, %v1470_v34  ;;  %v1497_v52 = vadd.f32 %v1496_v50, %v2910_v39  ;;  %v1628_v4 = vmul.f32 %v1473_v3, %v1473_v3  ;;  %v1633_v32 = vmul.f32 %v2924_v45, %v2924_v45 }
 0x17c   :  { %v1880_v19 = vpack.c.bf16 %v2927_v6, %v2921_v27  ;;  %v1855_v24 = vpack.c.bf16 %v1465_v49, %v1462_v40  ;;  %v1604_v54 = vadd.f32 %v1465_v49, %v1462_v40  ;;  %v1626_v46 = vmul.f32 %v1465_v49, %v1465_v49 }
 0x17d   :  { %1892 = vst [vmem:[%s2980_s2 + $0x8] sm:$0xff] %v1860_v44   ;;  %v1875_v38 = vpack.c.bf16 %v1497_v52, %v2924_v45  ;;  %v1636_v29 = vmul.f32 %v2927_v6, %v2927_v6 }
 0x17e   :  { %1896 = vst [vmem:[%s2980_s2 + $0x28] sm:$0xff] %v1880_v19   ;;  %1856 = vst [vmem:[%s2980_s2] sm:$0xff] %v1855_v24   ;;  %v1605_v26 = vadd.f32 %v1604_v54, %v1470_v34  ;;  %v2193_v39 = vpop.f32.mrb[68].mxu0  ;;  %v1641_v21 = vadd.f32 %v1626_v46, %v1625_v56 }
 0x17f   :  { %1895 = vst [vmem:[%s2980_s2 + $0x20] sm:$0xff] %v1875_v38   ;;  %v1486_v41 = vadd.f32 %v2193_v39, %v2904_v16  ;;  %v2201_v59 = vpop.f32.mrb[68].mxu1  ;;  %v1477_v60 = vpop.f32.mrb[69].mxu0 }
 0x180   :  { %v1518_v61 = vadd.f32 %v2201_v59, %v1421_v53  ;;  %v1478_v43 = vadd.f32 %v1477_v60, %v2898_v62  ;;  %v1606_v63 = vadd.f32 %v1605_v26, %v1473_v3  ;;  %v1509_v1 = vpop.f32.mrb[69].mxu1  ;;  %v2194_v2 = vpop.f32.mrb[70].mxu0  ;;  %v1642_v8 = vadd.f32 %v1641_v21, %v1627_v58 }
 0x181   :  { %v1510_v9 = vadd.f32 %v1509_v1, %v1413_v55  ;;  %v1489_v10 = vadd.f32 %v2194_v2, %v2906_v18  ;;  %v2202_v35 = vpop.f32.mrb[70].mxu1  ;;  %v1480_v11 = vpop.f32.mrb[71].mxu0  ;;  %v1631_v28 = vmul.f32 %v1486_v41, %v1486_v41 }
 0x182   :  { %v1607_v12 = vadd.f32 %v1606_v63, %v1478_v43  ;;  %v1629_v37 = vmul.f32 %v1478_v43, %v1478_v43  ;;  %v1521_v14 = vadd.f32 %v2202_v35, %v1424_v33  ;;  %v1512_v15 = vpop.f32.mrb[71].mxu1  ;;  %v1643_v16 = vadd.f32 %v1642_v8, %v1628_v4 }
 0x183   :  { %v1870_v57 = vpack.c.bf16 %v1489_v10, %v1486_v41  ;;  %v1481_v20 = vadd.f32 %v1480_v11, %v2900_v0  ;;  %v1513_v62 = vadd.f32 %v1512_v15, %v2916_v13  ;;  %v1632_v51 = vmul.f32 %v1489_v10, %v1489_v10 }
 0x184   :  { %v1890_v17 = vpack.c.bf16 %v1521_v14, %v1518_v61  ;;  %v1644_v22 = vadd.f32 %v1643_v16, %v1629_v37  ;;  %v1634_v33 = vmul.f32 %v1497_v52, %v1497_v52  ;;  %v1637_v48 = vmul.f32 %v1510_v9, %v1510_v9 }
 0x185   :  { %1894 = vst [vmem:[%s2980_s2 + $0x18] sm:$0xff] %v1870_v57   ;;  %v1865_v18 = vpack.c.bf16 %v1481_v20, %v1478_v43  ;;  %v1608_v55 = vadd.f32 %v1607_v12, %v1481_v20  ;;  %v1630_v23 = vmul.f32 %v1481_v20, %v1481_v20  ;;  %v1885_v25 = vpack.c.bf16 %v1513_v62, %v1510_v9 }
 0x186   :  { %1898 = vst [vmem:[%s2980_s2 + $0x38] sm:$0xff] %v1890_v17   ;;  %v1638_v44 = vmul.f32 %v1513_v62, %v1513_v62  ;;  %v1639_v24 = vmul.f32 %v1518_v61, %v1518_v61  ;;  %v1640_v56 = vmul.f32 %v1521_v14, %v1521_v14 }
 0x187   :  { %1893 = vst [vmem:[%s2980_s2 + $0x10] sm:$0xff] %v1865_v18   ;;  %v1609_v0 = vadd.f32 %v1608_v55, %v1486_v41  ;;  %v1645_v13 = vadd.f32 %v1644_v22, %v1630_v23  ;;  %1897 = vst [vmem:[%s2980_s2 + $0x30] sm:$0xff] %v1885_v25  }
 0x189   :  { %v1610_v30 = vadd.f32 %v1609_v0, %v1489_v10  ;;  %v1646_v31 = vadd.f32 %v1645_v13, %v1631_v28 }
 0x18b   :  { %v1611_v53 = vadd.f32 %v1610_v30, %v2924_v45  ;;  %v1647_v5 = vadd.f32 %v1646_v31, %v1632_v51 }
 0x18d   :  { %v1648_v34 = vadd.f32 %v1647_v5, %v1633_v32  ;;  %v1612_v36 = vadd.f32 %v1611_v53, %v1497_v52 }
 0x18f   :  { %v1613_v40 = vadd.f32 %v1612_v36, %v2921_v27  ;;  %v1649_v42 = vadd.f32 %v1648_v34, %v1634_v33 }
 0x191   :  { %v1614_v3 = vadd.f32 %v1613_v40, %v2927_v6  ;;  %v1650_v47 = vadd.f32 %v1649_v42, %v1635_v7 }
 0x193   :  { %v1615_v49 = vadd.f32 %v1614_v3, %v1510_v9  ;;  %v1651_v50 = vadd.f32 %v1650_v47, %v1636_v29 }
 0x195   :  { %v1616_v45 = vadd.f32 %v1615_v49, %v1513_v62  ;;  %v1652_v19 = vadd.f32 %v1651_v50, %v1637_v48 }
 0x197   :  { %v1617_v52 = vadd.f32 %v1616_v45, %v1518_v61  ;;  %v1653_v54 = vadd.f32 %v1652_v19, %v1638_v44 }
 0x199   :  { %v1618_v46 = vadd.f32 %v1617_v52, %v1521_v14  ;;  %v1654_v38 = vadd.f32 %v1653_v54, %v1639_v24 }
 0x19b   :  { %v1619_v27 = vrot.slane %v1618_v46, 4  ;;  %v1655_v26 = vadd.f32 %v1654_v38, %v1640_v56 }
 0x19d   :  { %v1620_v39 = vadd.f32 %v1619_v27, %v1618_v46  ;;  %v1656_v58 = vrot.slane %v1655_v26, 4 }
 0x19f   :  { %v1621_v21 = vrot.slane %v1620_v39, 2  ;;  %v1657_v41 = vadd.f32 %v1656_v58, %v1655_v26 }
 0x1a1   :  { %v1622_v6 = vadd.f32 %v1621_v21, %v1620_v39  ;;  %v1658_v59 = vrot.slane %v1657_v41, 2 }
 0x1a3   :  { %v1623_v60 = vrot.slane %v1622_v6, 1  ;;  %v1659_v43 = vadd.f32 %v1658_v59, %v1657_v41 }
 0x1a5   :  { %v1624_v63 = vadd.f32 %v1623_v60, %v1622_v6  ;;  %v1660_v1 = vrot.slane %v1659_v43, 1 }
 0x1a7   :  { %v1661_v2 = vadd.f32 %v1660_v1, %v1659_v43  ;;  %1662 = vst [vmem:[%s2981_s3] sm:$0x1] %v1624_v63 }
 0x1a9   :  { %1663 = vst [vmem:[%s2982_s4] sm:$0x1] %v1661_v2 }

</bundles_post_ra>
